<compile_context>
chip_gen: v7x
topology: tpu7x:2x2x1
jax: 0.10.0
libtpu: 0.0.40
codegen_flags: <defaults>
</compile_context>

<pallas_src>
import functools

import jax
import jax.numpy as jnp
import numpy as np
from jax import lax
from jax.experimental import pallas as pl
from jax.experimental.pallas import tpu as pltpu

EPS = 1e-5


def _vmem_limit_bytes():
    # ~3/4 of physical VMEM, capped: v5e/v6e (128 MiB) -> 96 MiB, v7x (64 MiB)
    # -> 48 MiB.  Falls back to 48 MiB if the query is unavailable.
    try:
        cap = int(pltpu.get_tpu_info().vmem_capacity_bytes)
    except Exception:  # pragma: no cover - defensive
        cap = 64 * 1024 * 1024
    return int(min(cap * 3 // 4, 96 * 1024 * 1024))


def _pick_row_tile(H, W, target=1024):
    """Largest divisor of H with TH*W <= target (amortizes per-step overhead)."""
    divs = [d for d in range(1, H + 1) if H % d == 0]
    fitting = [d for d in divs if d * W <= target]
    return max(fitting) if fitting else 1


def _pad_tap_channels(c):
    """Lane-align each im2col tap segment for realistic channel counts."""
    return ((c + 127) // 128) * 128 if c >= 64 else c


def _fold_weights(w_oihw):
    """OIHW -> (9*Cin_p, Cout) bf16, tap-major (dy, dx, cin) ordering."""
    _, cin, _, _ = w_oihw.shape
    cin_p = _pad_tap_channels(cin)
    w = jnp.transpose(w_oihw, (2, 3, 1, 0))          # (3, 3, Cin, Cout)
    if cin_p > cin:
        w = jnp.pad(w, ((0, 0), (0, 0), (0, cin_p - cin), (0, 0)))
    return w.reshape(9 * cin_p, w.shape[-1]).astype(jnp.bfloat16)


# --------------------------------------------------------------------------
# Kernel 1/2: 3x3 conv (im2col, single MXU matmul per tile) + BN partial sums.
# Optionally applies an input-side affine+relu (the *previous* layer's BN)
# before convolving — this fuses bn1+relu into conv2.  The halo (conv zero
# padding) is built in VMEM from the UNPADDED input.
# --------------------------------------------------------------------------
def conv3x3_bn_stats_kernel(*refs, apply_input_bn_relu):
    if apply_input_bn_relu:
        x_ref, w_ref, scale_ref, shift_ref, out_ref, stats_ref = refs
    else:
        x_ref, w_ref, out_ref, stats_ref = refs
        scale_ref = shift_ref = None

    _, H, W, Cin = x_ref.shape
    _, TH, _, Cout = out_ref.shape
    Cin_p = w_ref.shape[0] // 9          # lane-padded per-tap channel count

    t = pl.program_id(1)
    row0 = pl.multiple_of(t * TH, TH)    # first output row of this tile

    # ---- gather TH+2 haloed rows; out-of-image rows are clamped here and
    # ---- zeroed by the ring mask below (so their content is irrelevant).
    top = x_ref[0, pl.ds(jnp.maximum(row0 - 1, 0), 1), :, :]
    mid = x_ref[0, pl.ds(row0, TH), :, :]
    bot = x_ref[0, pl.ds(jnp.minimum(row0 + TH, H - 1), 1), :, :]
    rows = jnp.concatenate([top, mid, bot], axis=0)       # (TH+2, W, Cin)

    if apply_input_bn_relu:
        scale = scale_ref[...].reshape(1, 1, Cin)
        shift = shift_ref[...].reshape(1, 1, Cin)
        rows = jnp.maximum(rows.astype(jnp.float32) * scale + shift, 0.0)
    rows = rows.astype(jnp.bfloat16)

    # ---- zero column pad + ring mask (conv zero padding on the activated
    # ---- input; also zeroes the clamped out-of-image halo rows).
    zc = jnp.zeros((TH + 2, 1, Cin), jnp.bfloat16)
    tile = jnp.concatenate([zc, rows, zc], axis=1)        # (TH+2, W+2, Cin)
    prow = row0 + lax.broadcasted_iota(jnp.int32, (TH + 2, W + 2, 1), 0)
    pcol = lax.broadcasted_iota(jnp.int32, (TH + 2, W + 2, 1), 1)
    valid = (prow >= 1) & (prow <= H) & (pcol >= 1) & (pcol <= W)
    tile = jnp.where(valid, tile, jnp.zeros((), jnp.bfloat16))

    # ---- optional lane alignment of the 9 tap segments (Cin -> Cin_p).
    if Cin_p > Cin:
        tile = jnp.concatenate(
            [tile, jnp.zeros((TH + 2, W + 2, Cin_p - Cin), jnp.bfloat16)],
            axis=-1)

    # ---- im2col: 9 shifted views folded into the contraction dim.
    parts = [tile[dy:dy + TH, dx:dx + W, :]
             for dy in range(3) for dx in range(3)]
    patch = jnp.concatenate(parts, axis=-1).reshape(TH * W, 9 * Cin_p)

    # One big-K matmul on the MXU, f32 accumulation.
    acc = jnp.dot(patch, w_ref[...], preferred_element_type=jnp.float32)

    out_ref[...] = acc.reshape(1, TH, W, Cout).astype(out_ref.dtype)

    # Fused BN partial statistics (sum, sum of squares), single store.
    s = jnp.sum(acc, axis=0, keepdims=True)               # (1, Cout)
    ss = jnp.sum(acc * acc, axis=0, keepdims=True)        # (1, Cout)
    stats_ref[...] = jnp.concatenate([s, ss], axis=0).reshape(1, 1, 2, Cout)


def _conv3x3_bn_stats(x, w_mat, scale, shift, *, TH, apply_input_bn_relu,
                      vmem_limit):
    N, H, W, Cin = x.shape
    Cout = w_mat.shape[1]
    HT = H // TH
    kern = functools.partial(conv3x3_bn_stats_kernel,
                             apply_input_bn_relu=apply_input_bn_relu)

    # Full (unpadded) image resident per batch item; re-fetched only per n.
    in_specs = [pl.BlockSpec((1, H, W, Cin), lambda n, t: (n, 0, 0, 0)),
                pl.BlockSpec(w_mat.shape, lambda n, t: (0, 0))]
    args = [x, w_mat]
    if apply_input_bn_relu:
        in_specs += [pl.BlockSpec((1, Cin), lambda n, t: (0, 0)),
                     pl.BlockSpec((1, Cin), lambda n, t: (0, 0))]
        args += [scale, shift]

    return pl.pallas_call(
        kern,
        grid=(N, HT),
        in_specs=in_specs,
        out_specs=[
            pl.BlockSpec((1, TH, W, Cout), lambda n, t: (n, t, 0, 0)),
            pl.BlockSpec((1, 1, 2, Cout), lambda n, t: (n, t, 0, 0)),
        ],
        out_shape=[
            jax.ShapeDtypeStruct((N, H, W, Cout), jnp.bfloat16),   # bf16 intermediate
            jax.ShapeDtypeStruct((N, HT, 2, Cout), jnp.float32),
        ],
        compiler_params=pltpu.CompilerParams(
            dimension_semantics=("parallel", "parallel"),
            vmem_limit_bytes=vmem_limit),
    )(*args)


# --------------------------------------------------------------------------
# Kernel 3: bn2 (folded affine) + residual add + relu, lane-dense (W*C) layout.
# Pure streaming elementwise: one full-image block per batch item.
# --------------------------------------------------------------------------
def bn_residual_relu_kernel(y_ref, x_ref, scale_ref, shift_ref, out_ref):
    scale = scale_ref[...].reshape(1, 1, -1)
    shift = shift_ref[...].reshape(1, 1, -1)
    out_ref[...] = jnp.maximum(
        y_ref[...].astype(jnp.float32) * scale + shift + x_ref[...], 0.0)


def _bn_residual_relu(y, x, scale_flat, shift_flat, *, vmem_limit):
    N, H, WC = y.shape
    return pl.pallas_call(
        bn_residual_relu_kernel,
        grid=(N,),
        in_specs=[
            pl.BlockSpec((1, H, WC), lambda n: (n, 0, 0)),
            pl.BlockSpec((1, H, WC), lambda n: (n, 0, 0)),
            pl.BlockSpec((1, WC), lambda n: (0, 0)),
            pl.BlockSpec((1, WC), lambda n: (0, 0)),
        ],
        out_specs=pl.BlockSpec((1, H, WC), lambda n: (n, 0, 0)),
        out_shape=jax.ShapeDtypeStruct((N, H, WC), jnp.float32),
        compiler_params=pltpu.CompilerParams(
            dimension_semantics=("parallel",),
            vmem_limit_bytes=vmem_limit),
    )(y, x, scale_flat, shift_flat)


# --------------------------------------------------------------------------
# Tiny JAX glue: fold the per-tile partial sums into BN scale/shift.
# --------------------------------------------------------------------------
def _bn_scale_shift(stats, gamma, beta, count):
    sums = jnp.sum(stats, axis=(0, 1))                      # (2, C)
    mean = sums[0] / count
    var = jnp.maximum(sums[1] / count - mean * mean, 0.0)   # biased variance
    scale = gamma * lax.rsqrt(var + EPS)
    shift = beta - mean * scale
    return scale.reshape(1, -1), shift.reshape(1, -1)


@jax.jit
def basic_block_forward(x_nchw, w1_oihw, w2_oihw, g1, b1, g2, b2):
    """x_nchw: (N, Cin, H, W) -> (N, Cout, H, W). stride=1, no downsample."""
    N, Cin, H, W = x_nchw.shape
    Cout = w1_oihw.shape[0]
    assert Cin == Cout, "identity residual requires inplanes == planes"
    TH = _pick_row_tile(H, W)
    vmem_limit = _vmem_limit_bytes()

    # NCHW -> NHWC, f32 (feeds conv1 directly and serves as the residual).
    x_nhwc = jnp.transpose(x_nchw, (0, 2, 3, 1)).astype(jnp.float32)

    w1_mat = _fold_weights(w1_oihw)
    w2_mat = _fold_weights(w2_oihw)
    count = N * H * W

    # conv1 (raw, bf16 out) + bn1 partial stats (from the f32 accumulator).
    c1, stats1 = _conv3x3_bn_stats(x_nhwc, w1_mat, None, None, TH=TH,
                                   apply_input_bn_relu=False,
                                   vmem_limit=vmem_limit)
    scale1, shift1 = _bn_scale_shift(stats1, g1.astype(jnp.float32),
                                     b1.astype(jnp.float32), count)

    # conv2 with bn1+relu fused into its patch construction; + bn2 stats.
    c2, stats2 = _conv3x3_bn_stats(c1, w2_mat, scale1, shift1, TH=TH,
                                   apply_input_bn_relu=True,
                                   vmem_limit=vmem_limit)
    scale2, shift2 = _bn_scale_shift(stats2, g2.astype(jnp.float32),
                                     b2.astype(jnp.float32), count)

    # bn2 + residual + relu in a lane-dense (N, H, W*C) layout.
    y = _bn_residual_relu(
        c2.reshape(N, H, W * Cout), x_nhwc.reshape(N, H, W * Cin),
        jnp.tile(scale2, (1, W)), jnp.tile(shift2, (1, W)),
        vmem_limit=vmem_limit)

    return jnp.transpose(y.reshape(N, H, W, Cout), (0, 3, 1, 2))


# ------------------------- pure-JAX reference -------------------------------
def basic_block_ref(x_nchw, w1, w2, g1, b1, g2, b2):
    x = jnp.transpose(x_nchw, (0, 2, 3, 1)).astype(jnp.float32)

    def conv(v, w):
        return lax.conv_general_dilated(
            v.astype(jnp.bfloat16),
            jnp.transpose(w, (2, 3, 1, 0)).astype(jnp.bfloat16),
            window_strides=(1, 1), padding=((1, 1), (1, 1)),
            dimension_numbers=("NHWC", "HWIO", "NHWC"),
            preferred_element_type=jnp.float32)

    def bn(v, g, b):
        mean = jnp.mean(v, axis=(0, 1, 2), keepdims=True)
        var = jnp.mean((v - mean) ** 2, axis=(0, 1, 2), keepdims=True)
        return (v - mean) * (g.reshape(1, 1, 1, -1) * lax.rsqrt(var + EPS)) \
            + b.reshape(1, 1, 1, -1)

    y = jnp.maximum(bn(conv(x, w1), g1, b1), 0.0)
    y = bn(conv(y, w2), g2, b2)
    y = jnp.maximum(y + x, 0.0)
    return jnp.transpose(y, (0, 3, 1, 2))


if __name__ == "__main__":
    # Small shapes: batch=2, inplanes=planes=4, spatial=16x16.
    N, C, H, W = 2, 4, 16, 16
    key = jax.random.PRNGKey(0)
    kx, kw1, kw2, kg1, kb1, kg2, kb2 = jax.random.split(key, 7)

    x = jax.random.normal(kx, (N, C, H, W), dtype=jnp.float32)
    w1 = jax.random.normal(kw1, (C, C, 3, 3), dtype=jnp.float32) * 0.1  # OIHW
    w2 = jax.random.normal(kw2, (C, C, 3, 3), dtype=jnp.float32) * 0.1  # OIHW
    g1 = 1.0 + 0.1 * jax.random.normal(kg1, (C,), dtype=jnp.float32)
    b1 = 0.1 * jax.random.normal(kb1, (C,), dtype=jnp.float32)
    g2 = 1.0 + 0.1 * jax.random.normal(kg2, (C,), dtype=jnp.float32)
    b2 = 0.1 * jax.random.normal(kb2, (C,), dtype=jnp.float32)

    out = jax.block_until_ready(basic_block_forward(x, w1, w2, g1, b1, g2, b2))
    ref = jax.block_until_ready(basic_block_ref(x, w1, w2, g1, b1, g2, b2))

    # bf16 MXU inputs AND bf16 intermediate activations (c1, c2) => compare
    # against the f32-intermediate reference with a tolerance that covers the
    # extra bf16 double-rounding of the intermediates.
    np.testing.assert_allclose(np.asarray(out), np.asarray(ref),
                               rtol=3e-2, atol=3e-2)
    print("KERNEL_OK")
</pallas_src>

<mosaic_0001>
module attributes {stable_mosaic.version = 11 : i64} {
  func.func @conv3x3_bn_stats_kernel(%arg0: i32, %arg1: i32, %arg2: memref<1x16x16x4xf32, #tpu.memory_space<vmem>>, %arg3: memref<36x4xbf16, #tpu.memory_space<vmem>>, %arg4: memref<1x16x16x4xbf16, #tpu.memory_space<vmem>>, %arg5: memref<1x1x2x4xf32, #tpu.memory_space<vmem>>) attributes {dimension_semantics = [#tpu.dimension_semantics<parallel>, #tpu.dimension_semantics<parallel>], iteration_bounds = array<i64: 2, 1>, scalar_prefetch = 0 : i64, scratch_operands = 0 : i64, tpu.core_type = #tpu.core_type<tc>, window_params = [{transform_indices = @transform_0, window_bounds = array<i64: 1, 16, 16, 4>}, {pipeline_mode = #tpu.pipeline_mode<synchronous>, transform_indices = @transform_1, window_bounds = array<i64: 36, 4>}, {transform_indices = @transform_2, window_bounds = array<i64: 1, 16, 16, 4>}, {transform_indices = @transform_3, window_bounds = array<i64: 1, 1, 2, 4>}]} {
    %c16_i32 = arith.constant 16 : i32
    %0 = arith.muli %arg1, %c16_i32 : i32
    %1 = tpu.assume_multiple %0, 16 : i32
    %c1_i32 = arith.constant 1 : i32
    %2 = arith.subi %1, %c1_i32 : i32
    %c0_i32 = arith.constant 0 : i32
    %3 = arith.maxsi %2, %c0_i32 : i32
    %c0 = arith.constant 0 : index
    %4 = arith.index_cast %3 : i32 to index
    %c0_0 = arith.constant 0 : index
    %c0_1 = arith.constant 0 : index
    %5 = vector.load %arg2[%c0, %4, %c0_0, %c0_1] : memref<1x16x16x4xf32, #tpu.memory_space<vmem>>, vector<1x1x16x4xf32>
    %6 = vector.shape_cast %5 : vector<1x1x16x4xf32> to vector<1x16x4xf32>
    %c0_2 = arith.constant 0 : index
    %7 = arith.index_cast %1 : i32 to index
    %c0_3 = arith.constant 0 : index
    %c0_4 = arith.constant 0 : index
    %8 = vector.load %arg2[%c0_2, %7, %c0_3, %c0_4] : memref<1x16x16x4xf32, #tpu.memory_space<vmem>>, vector<1x16x16x4xf32>
    %9 = vector.shape_cast %8 : vector<1x16x16x4xf32> to vector<16x16x4xf32>
    %c16_i32_5 = arith.constant 16 : i32
    %10 = arith.addi %1, %c16_i32_5 : i32
    %c15_i32 = arith.constant 15 : i32
    %11 = arith.minsi %10, %c15_i32 : i32
    %c0_6 = arith.constant 0 : index
    %12 = arith.index_cast %11 : i32 to index
    %c0_7 = arith.constant 0 : index
    %c0_8 = arith.constant 0 : index
    %13 = vector.load %arg2[%c0_6, %12, %c0_7, %c0_8] : memref<1x16x16x4xf32, #tpu.memory_space<vmem>>, vector<1x1x16x4xf32>
    %14 = vector.shape_cast %13 : vector<1x1x16x4xf32> to vector<1x16x4xf32>
    %15 = tpu.concatenate %6, %9, %14 in 0 : vector<1x16x4xf32>, vector<16x16x4xf32>, vector<1x16x4xf32> -> vector<18x16x4xf32>
    %16 = arith.truncf %15 : vector<18x16x4xf32> to vector<18x16x4xbf16>
    %cst = arith.constant 0.000000e+00 : bf16
    %17 = vector.broadcast %cst : bf16 to vector<18x1x4xbf16>
    %18 = tpu.concatenate %17, %16, %17 in 1 : vector<18x1x4xbf16>, vector<18x16x4xbf16>, vector<18x1x4xbf16> -> vector<18x18x4xbf16>
    %19 = tpu.iota {dimensions = array<i32: 0>} : vector<18x18x1xi32>
    %20 = vector.broadcast %1 : i32 to vector<18x18x1xi32>
    %21 = arith.addi %20, %19 : vector<18x18x1xi32>
    %22 = tpu.iota {dimensions = array<i32: 1>} : vector<18x18x1xi32>
    %c1_i32_9 = arith.constant 1 : i32
    %23 = vector.broadcast %c1_i32_9 : i32 to vector<18x18x1xi32>
    %24 = arith.cmpi sge, %21, %23 : vector<18x18x1xi32>
    %c16_i32_10 = arith.constant 16 : i32
    %25 = vector.broadcast %c16_i32_10 : i32 to vector<18x18x1xi32>
    %26 = arith.cmpi sle, %21, %25 : vector<18x18x1xi32>
    %27 = arith.andi %24, %26 : vector<18x18x1xi1>
    %c1_i32_11 = arith.constant 1 : i32
    %28 = vector.broadcast %c1_i32_11 : i32 to vector<18x18x1xi32>
    %29 = arith.cmpi sge, %22, %28 : vector<18x18x1xi32>
    %30 = arith.andi %27, %29 : vector<18x18x1xi1>
    %c16_i32_12 = arith.constant 16 : i32
    %31 = vector.broadcast %c16_i32_12 : i32 to vector<18x18x1xi32>
    %32 = arith.cmpi sle, %22, %31 : vector<18x18x1xi32>
    %33 = arith.andi %30, %32 : vector<18x18x1xi1>
    %cst_13 = arith.constant 0.000000e+00 : bf16
    %34 = vector.shape_cast %33 : vector<18x18x1xi1> to vector<18x18x1xi1>
    %35 = vector.broadcast %34 : vector<18x18x1xi1> to vector<18x18x4xi1>
    %36 = vector.broadcast %cst_13 : bf16 to vector<18x18x4xbf16>
    %37 = arith.select %35, %18, %36 : vector<18x18x4xi1>, vector<18x18x4xbf16>
    %38 = vector.extract_strided_slice %37 {offsets = [0, 0, 0], sizes = [16, 16, 4], strides = [1, 1, 1]} : vector<18x18x4xbf16> to vector<16x16x4xbf16>
    %39 = vector.extract_strided_slice %37 {offsets = [0, 1, 0], sizes = [16, 16, 4], strides = [1, 1, 1]} : vector<18x18x4xbf16> to vector<16x16x4xbf16>
    %40 = vector.extract_strided_slice %37 {offsets = [0, 2, 0], sizes = [16, 16, 4], strides = [1, 1, 1]} : vector<18x18x4xbf16> to vector<16x16x4xbf16>
    %41 = vector.extract_strided_slice %37 {offsets = [1, 0, 0], sizes = [16, 16, 4], strides = [1, 1, 1]} : vector<18x18x4xbf16> to vector<16x16x4xbf16>
    %42 = vector.extract_strided_slice %37 {offsets = [1, 1, 0], sizes = [16, 16, 4], strides = [1, 1, 1]} : vector<18x18x4xbf16> to vector<16x16x4xbf16>
    %43 = vector.extract_strided_slice %37 {offsets = [1, 2, 0], sizes = [16, 16, 4], strides = [1, 1, 1]} : vector<18x18x4xbf16> to vector<16x16x4xbf16>
    %44 = vector.extract_strided_slice %37 {offsets = [2, 0, 0], sizes = [16, 16, 4], strides = [1, 1, 1]} : vector<18x18x4xbf16> to vector<16x16x4xbf16>
    %45 = vector.extract_strided_slice %37 {offsets = [2, 1, 0], sizes = [16, 16, 4], strides = [1, 1, 1]} : vector<18x18x4xbf16> to vector<16x16x4xbf16>
    %46 = vector.extract_strided_slice %37 {offsets = [2, 2, 0], sizes = [16, 16, 4], strides = [1, 1, 1]} : vector<18x18x4xbf16> to vector<16x16x4xbf16>
    %47 = tpu.concatenate %38, %39, %40, %41, %42, %43, %44, %45, %46 in 2 : vector<16x16x4xbf16>, vector<16x16x4xbf16>, vector<16x16x4xbf16>, vector<16x16x4xbf16>, vector<16x16x4xbf16>, vector<16x16x4xbf16>, vector<16x16x4xbf16>, vector<16x16x4xbf16>, vector<16x16x4xbf16> -> vector<16x16x36xbf16>
    %48 = vector.shape_cast %47 : vector<16x16x36xbf16> to vector<256x36xbf16>
    %c0_14 = arith.constant 0 : index
    %c0_15 = arith.constant 0 : index
    %49 = vector.load %arg3[%c0_14, %c0_15] : memref<36x4xbf16, #tpu.memory_space<vmem>>, vector<36x4xbf16>
    %cst_16 = arith.constant dense<0.000000e+00> : vector<256x4xf32>
    %50 = tpu.matmul %48, %49, %cst_16 {dimension_numbers = #tpu.dot_dimension_numbers<[1], [0], [0], [1], [0, 0, 1, 1], [], []>} : vector<256x36xbf16>, vector<36x4xbf16>, vector<256x4xf32> -> vector<256x4xf32>
    %51 = vector.shape_cast %50 : vector<256x4xf32> to vector<1x16x16x4xf32>
    %52 = arith.truncf %51 : vector<1x16x16x4xf32> to vector<1x16x16x4xbf16>
    %c0_17 = arith.constant 0 : index
    %c0_18 = arith.constant 0 : index
    %c0_19 = arith.constant 0 : index
    %c0_20 = arith.constant 0 : index
    %53 = vector.load %arg4[%c0_17, %c0_18, %c0_19, %c0_20] : memref<1x16x16x4xbf16, #tpu.memory_space<vmem>>, vector<1x16x16x4xbf16>
    tpu.vector_store %arg4[%c0_17, %c0_18, %c0_19, %c0_20], %52 {strides = array<i32>} : memref<1x16x16x4xbf16, #tpu.memory_space<vmem>>, vector<1x16x16x4xbf16>,
    %cst_21 = arith.constant dense<0.000000e+00> : vector<4xf32>
    %54 = vector.multi_reduction <add>, %50, %cst_21 [0] : vector<256x4xf32> to vector<4xf32>
    %55 = vector.shape_cast %54 : vector<4xf32> to vector<1x4xf32>
    %56 = arith.mulf %50, %50 : vector<256x4xf32>
    %cst_22 = arith.constant dense<0.000000e+00> : vector<4xf32>
    %57 = vector.multi_reduction <add>, %56, %cst_22 [0] : vector<256x4xf32> to vector<4xf32>
    %58 = vector.shape_cast %57 : vector<4xf32> to vector<1x4xf32>
    %59 = tpu.concatenate %55, %58 in 0 : vector<1x4xf32>, vector<1x4xf32> -> vector<2x4xf32>
    %60 = vector.shape_cast %59 : vector<2x4xf32> to vector<1x1x2x4xf32>
    %c0_23 = arith.constant 0 : index
    %c0_24 = arith.constant 0 : index
    %c0_25 = arith.constant 0 : index
    %c0_26 = arith.constant 0 : index
    %61 = vector.load %arg5[%c0_23, %c0_24, %c0_25, %c0_26] : memref<1x1x2x4xf32, #tpu.memory_space<vmem>>, vector<1x1x2x4xf32>
    tpu.vector_store %arg5[%c0_23, %c0_24, %c0_25, %c0_26], %60 {strides = array<i32>} : memref<1x1x2x4xf32, #tpu.memory_space<vmem>>, vector<1x1x2x4xf32>,
    return
  }
  func.func @transform_0(%arg0: i32, %arg1: i32) -> (i32, i32, i32, i32) {
    %c0_i32 = arith.constant 0 : i32
    %c0_i32_0 = arith.constant 0 : i32
    %c0_i32_1 = arith.constant 0 : i32
    %c0_i32_2 = arith.constant 0 : i32
    return %arg0, %c0_i32, %c0_i32_0, %c0_i32_1 : i32, i32, i32, i32
  }
  func.func @transform_1(%arg0: i32, %arg1: i32) -> (i32, i32) {
    %c0_i32 = arith.constant 0 : i32
    %c0_i32_0 = arith.constant 0 : i32
    %c0_i32_1 = arith.constant 0 : i32
    return %c0_i32, %c0_i32_0 : i32, i32
  }
  func.func @transform_2(%arg0: i32, %arg1: i32) -> (i32, i32, i32, i32) {
    %c0_i32 = arith.constant 0 : i32
    %c0_i32_0 = arith.constant 0 : i32
    %c0_i32_1 = arith.constant 0 : i32
    return %arg0, %arg1, %c0_i32, %c0_i32_0 : i32, i32, i32, i32
  }
  func.func @transform_3(%arg0: i32, %arg1: i32) -> (i32, i32, i32, i32) {
    %c0_i32 = arith.constant 0 : i32
    %c0_i32_0 = arith.constant 0 : i32
    %c0_i32_1 = arith.constant 0 : i32
    return %arg0, %arg1, %c0_i32, %c0_i32_0 : i32, i32, i32, i32
  }
}

module attributes {stable_mosaic.version = 11 : i64} {
  func.func @conv3x3_bn_stats_kernel(%arg0: i32, %arg1: i32, %arg2: memref<1x16x16x4xbf16, #tpu.memory_space<vmem>>, %arg3: memref<36x4xbf16, #tpu.memory_space<vmem>>, %arg4: memref<1x4xf32, #tpu.memory_space<vmem>>, %arg5: memref<1x4xf32, #tpu.memory_space<vmem>>, %arg6: memref<1x16x16x4xbf16, #tpu.memory_space<vmem>>, %arg7: memref<1x1x2x4xf32, #tpu.memory_space<vmem>>) attributes {dimension_semantics = [#tpu.dimension_semantics<parallel>, #tpu.dimension_semantics<parallel>], iteration_bounds = array<i64: 2, 1>, scalar_prefetch = 0 : i64, scratch_operands = 0 : i64, tpu.core_type = #tpu.core_type<tc>, window_params = [{transform_indices = @transform_0, window_bounds = array<i64: 1, 16, 16, 4>}, {pipeline_mode = #tpu.pipeline_mode<synchronous>, transform_indices = @transform_1, window_bounds = array<i64: 36, 4>}, {pipeline_mode = #tpu.pipeline_mode<synchronous>, transform_indices = @transform_2, window_bounds = array<i64: 1, 4>}, {pipeline_mode = #tpu.pipeline_mode<synchronous>, transform_indices = @transform_3, window_bounds = array<i64: 1, 4>}, {transform_indices = @transform_4, window_bounds = array<i64: 1, 16, 16, 4>}, {transform_indices = @transform_5, window_bounds = array<i64: 1, 1, 2, 4>}]} {
    %c16_i32 = arith.constant 16 : i32
    %0 = arith.muli %arg1, %c16_i32 : i32
    %1 = tpu.assume_multiple %0, 16 : i32
    %c1_i32 = arith.constant 1 : i32
    %2 = arith.subi %1, %c1_i32 : i32
    %c0_i32 = arith.constant 0 : i32
    %3 = arith.maxsi %2, %c0_i32 : i32
    %c0 = arith.constant 0 : index
    %4 = arith.index_cast %3 : i32 to index
    %c0_0 = arith.constant 0 : index
    %c0_1 = arith.constant 0 : index
    %5 = vector.load %arg2[%c0, %4, %c0_0, %c0_1] : memref<1x16x16x4xbf16, #tpu.memory_space<vmem>>, vector<1x1x16x4xbf16>
    %6 = vector.shape_cast %5 : vector<1x1x16x4xbf16> to vector<1x16x4xbf16>
    %c0_2 = arith.constant 0 : index
    %7 = arith.index_cast %1 : i32 to index
    %c0_3 = arith.constant 0 : index
    %c0_4 = arith.constant 0 : index
    %8 = vector.load %arg2[%c0_2, %7, %c0_3, %c0_4] : memref<1x16x16x4xbf16, #tpu.memory_space<vmem>>, vector<1x16x16x4xbf16>
    %9 = vector.shape_cast %8 : vector<1x16x16x4xbf16> to vector<16x16x4xbf16>
    %c16_i32_5 = arith.constant 16 : i32
    %10 = arith.addi %1, %c16_i32_5 : i32
    %c15_i32 = arith.constant 15 : i32
    %11 = arith.minsi %10, %c15_i32 : i32
    %c0_6 = arith.constant 0 : index
    %12 = arith.index_cast %11 : i32 to index
    %c0_7 = arith.constant 0 : index
    %c0_8 = arith.constant 0 : index
    %13 = vector.load %arg2[%c0_6, %12, %c0_7, %c0_8] : memref<1x16x16x4xbf16, #tpu.memory_space<vmem>>, vector<1x1x16x4xbf16>
    %14 = vector.shape_cast %13 : vector<1x1x16x4xbf16> to vector<1x16x4xbf16>
    %15 = tpu.concatenate %6, %9, %14 in 0 : vector<1x16x4xbf16>, vector<16x16x4xbf16>, vector<1x16x4xbf16> -> vector<18x16x4xbf16>
    %c0_9 = arith.constant 0 : index
    %c0_10 = arith.constant 0 : index
    %16 = vector.load %arg4[%c0_9, %c0_10] : memref<1x4xf32, #tpu.memory_space<vmem>>, vector<1x4xf32>
    %17 = vector.shape_cast %16 : vector<1x4xf32> to vector<1x1x4xf32>
    %c0_11 = arith.constant 0 : index
    %c0_12 = arith.constant 0 : index
    %18 = vector.load %arg5[%c0_11, %c0_12] : memref<1x4xf32, #tpu.memory_space<vmem>>, vector<1x4xf32>
    %19 = vector.shape_cast %18 : vector<1x4xf32> to vector<1x1x4xf32>
    %20 = arith.extf %15 : vector<18x16x4xbf16> to vector<18x16x4xf32>
    %21 = vector.broadcast %17 : vector<1x1x4xf32> to vector<18x16x4xf32>
    %22 = arith.mulf %20, %21 : vector<18x16x4xf32>
    %23 = vector.broadcast %19 : vector<1x1x4xf32> to vector<18x16x4xf32>
    %24 = arith.addf %22, %23 : vector<18x16x4xf32>
    %cst = arith.constant 0.000000e+00 : f32
    %25 = vector.broadcast %cst : f32 to vector<18x16x4xf32>
    %26 = arith.maximumf %24, %25 : vector<18x16x4xf32>
    %27 = arith.truncf %26 : vector<18x16x4xf32> to vector<18x16x4xbf16>
    %cst_13 = arith.constant 0.000000e+00 : bf16
    %28 = vector.broadcast %cst_13 : bf16 to vector<18x1x4xbf16>
    %29 = tpu.concatenate %28, %27, %28 in 1 : vector<18x1x4xbf16>, vector<18x16x4xbf16>, vector<18x1x4xbf16> -> vector<18x18x4xbf16>
    %30 = tpu.iota {dimensions = array<i32: 0>} : vector<18x18x1xi32>
    %31 = vector.broadcast %1 : i32 to vector<18x18x1xi32>
    %32 = arith.addi %31, %30 : vector<18x18x1xi32>
    %33 = tpu.iota {dimensions = array<i32: 1>} : vector<18x18x1xi32>
    %c1_i32_14 = arith.constant 1 : i32
    %34 = vector.broadcast %c1_i32_14 : i32 to vector<18x18x1xi32>
    %35 = arith.cmpi sge, %32, %34 : vector<18x18x1xi32>
    %c16_i32_15 = arith.constant 16 : i32
    %36 = vector.broadcast %c16_i32_15 : i32 to vector<18x18x1xi32>
    %37 = arith.cmpi sle, %32, %36 : vector<18x18x1xi32>
    %38 = arith.andi %35, %37 : vector<18x18x1xi1>
    %c1_i32_16 = arith.constant 1 : i32
    %39 = vector.broadcast %c1_i32_16 : i32 to vector<18x18x1xi32>
    %40 = arith.cmpi sge, %33, %39 : vector<18x18x1xi32>
    %41 = arith.andi %38, %40 : vector<18x18x1xi1>
    %c16_i32_17 = arith.constant 16 : i32
    %42 = vector.broadcast %c16_i32_17 : i32 to vector<18x18x1xi32>
    %43 = arith.cmpi sle, %33, %42 : vector<18x18x1xi32>
    %44 = arith.andi %41, %43 : vector<18x18x1xi1>
    %cst_18 = arith.constant 0.000000e+00 : bf16
    %45 = vector.shape_cast %44 : vector<18x18x1xi1> to vector<18x18x1xi1>
    %46 = vector.broadcast %45 : vector<18x18x1xi1> to vector<18x18x4xi1>
    %47 = vector.broadcast %cst_18 : bf16 to vector<18x18x4xbf16>
    %48 = arith.select %46, %29, %47 : vector<18x18x4xi1>, vector<18x18x4xbf16>
    %49 = vector.extract_strided_slice %48 {offsets = [0, 0, 0], sizes = [16, 16, 4], strides = [1, 1, 1]} : vector<18x18x4xbf16> to vector<16x16x4xbf16>
    %50 = vector.extract_strided_slice %48 {offsets = [0, 1, 0], sizes = [16, 16, 4], strides = [1, 1, 1]} : vector<18x18x4xbf16> to vector<16x16x4xbf16>
    %51 = vector.extract_strided_slice %48 {offsets = [0, 2, 0], sizes = [16, 16, 4], strides = [1, 1, 1]} : vector<18x18x4xbf16> to vector<16x16x4xbf16>
    %52 = vector.extract_strided_slice %48 {offsets = [1, 0, 0], sizes = [16, 16, 4], strides = [1, 1, 1]} : vector<18x18x4xbf16> to vector<16x16x4xbf16>
    %53 = vector.extract_strided_slice %48 {offsets = [1, 1, 0], sizes = [16, 16, 4], strides = [1, 1, 1]} : vector<18x18x4xbf16> to vector<16x16x4xbf16>
    %54 = vector.extract_strided_slice %48 {offsets = [1, 2, 0], sizes = [16, 16, 4], strides = [1, 1, 1]} : vector<18x18x4xbf16> to vector<16x16x4xbf16>
    %55 = vector.extract_strided_slice %48 {offsets = [2, 0, 0], sizes = [16, 16, 4], strides = [1, 1, 1]} : vector<18x18x4xbf16> to vector<16x16x4xbf16>
    %56 = vector.extract_strided_slice %48 {offsets = [2, 1, 0], sizes = [16, 16, 4], strides = [1, 1, 1]} : vector<18x18x4xbf16> to vector<16x16x4xbf16>
    %57 = vector.extract_strided_slice %48 {offsets = [2, 2, 0], sizes = [16, 16, 4], strides = [1, 1, 1]} : vector<18x18x4xbf16> to vector<16x16x4xbf16>
    %58 = tpu.concatenate %49, %50, %51, %52, %53, %54, %55, %56, %57 in 2 : vector<16x16x4xbf16>, vector<16x16x4xbf16>, vector<16x16x4xbf16>, vector<16x16x4xbf16>, vector<16x16x4xbf16>, vector<16x16x4xbf16>, vector<16x16x4xbf16>, vector<16x16x4xbf16>, vector<16x16x4xbf16> -> vector<16x16x36xbf16>
    %59 = vector.shape_cast %58 : vector<16x16x36xbf16> to vector<256x36xbf16>
    %c0_19 = arith.constant 0 : index
    %c0_20 = arith.constant 0 : index
    %60 = vector.load %arg3[%c0_19, %c0_20] : memref<36x4xbf16, #tpu.memory_space<vmem>>, vector<36x4xbf16>
    %cst_21 = arith.constant dense<0.000000e+00> : vector<256x4xf32>
    %61 = tpu.matmul %59, %60, %cst_21 {dimension_numbers = #tpu.dot_dimension_numbers<[1], [0], [0], [1], [0, 0, 1, 1], [], []>} : vector<256x36xbf16>, vector<36x4xbf16>, vector<256x4xf32> -> vector<256x4xf32>
    %62 = vector.shape_cast %61 : vector<256x4xf32> to vector<1x16x16x4xf32>
    %63 = arith.truncf %62 : vector<1x16x16x4xf32> to vector<1x16x16x4xbf16>
    %c0_22 = arith.constant 0 : index
    %c0_23 = arith.constant 0 : index
    %c0_24 = arith.constant 0 : index
    %c0_25 = arith.constant 0 : index
    %64 = vector.load %arg6[%c0_22, %c0_23, %c0_24, %c0_25] : memref<1x16x16x4xbf16, #tpu.memory_space<vmem>>, vector<1x16x16x4xbf16>
    tpu.vector_store %arg6[%c0_22, %c0_23, %c0_24, %c0_25], %63 {strides = array<i32>} : memref<1x16x16x4xbf16, #tpu.memory_space<vmem>>, vector<1x16x16x4xbf16>,
    %cst_26 = arith.constant dense<0.000000e+00> : vector<4xf32>
    %65 = vector.multi_reduction <add>, %61, %cst_26 [0] : vector<256x4xf32> to vector<4xf32>
    %66 = vector.shape_cast %65 : vector<4xf32> to vector<1x4xf32>
    %67 = arith.mulf %61, %61 : vector<256x4xf32>
    %cst_27 = arith.constant dense<0.000000e+00> : vector<4xf32>
    %68 = vector.multi_reduction <add>, %67, %cst_27 [0] : vector<256x4xf32> to vector<4xf32>
    %69 = vector.shape_cast %68 : vector<4xf32> to vector<1x4xf32>
    %70 = tpu.concatenate %66, %69 in 0 : vector<1x4xf32>, vector<1x4xf32> -> vector<2x4xf32>
    %71 = vector.shape_cast %70 : vector<2x4xf32> to vector<1x1x2x4xf32>
    %c0_28 = arith.constant 0 : index
    %c0_29 = arith.constant 0 : index
    %c0_30 = arith.constant 0 : index
    %c0_31 = arith.constant 0 : index
    %72 = vector.load %arg7[%c0_28, %c0_29, %c0_30, %c0_31] : memref<1x1x2x4xf32, #tpu.memory_space<vmem>>, vector<1x1x2x4xf32>
    tpu.vector_store %arg7[%c0_28, %c0_29, %c0_30, %c0_31], %71 {strides = array<i32>} : memref<1x1x2x4xf32, #tpu.memory_space<vmem>>, vector<1x1x2x4xf32>,
    return
  }
  func.func @transform_0(%arg0: i32, %arg1: i32) -> (i32, i32, i32, i32) {
    %c0_i32 = arith.constant 0 : i32
    %c0_i32_0 = arith.constant 0 : i32
    %c0_i32_1 = arith.constant 0 : i32
    %c0_i32_2 = arith.constant 0 : i32
    return %arg0, %c0_i32, %c0_i32_0, %c0_i32_1 : i32, i32, i32, i32
  }
  func.func @transform_1(%arg0: i32, %arg1: i32) -> (i32, i32) {
    %c0_i32 = arith.constant 0 : i32
    %c0_i32_0 = arith.constant 0 : i32
    %c0_i32_1 = arith.constant 0 : i32
    return %c0_i32, %c0_i32_0 : i32, i32
  }
  func.func @transform_2(%arg0: i32, %arg1: i32) -> (i32, i32) {
    %c0_i32 = arith.constant 0 : i32
    %c0_i32_0 = arith.constant 0 : i32
    %c0_i32_1 = arith.constant 0 : i32
    return %c0_i32, %c0_i32_0 : i32, i32
  }
  func.func @transform_3(%arg0: i32, %arg1: i32) -> (i32, i32) {
    %c0_i32 = arith.constant 0 : i32
    %c0_i32_0 = arith.constant 0 : i32
    %c0_i32_1 = arith.constant 0 : i32
    return %c0_i32, %c0_i32_0 : i32, i32
  }
  func.func @transform_4(%arg0: i32, %arg1: i32) -> (i32, i32, i32, i32) {
    %c0_i32 = arith.constant 0 : i32
    %c0_i32_0 = arith.constant 0 : i32
    %c0_i32_1 = arith.constant 0 : i32
    return %arg0, %arg1, %c0_i32, %c0_i32_0 : i32, i32, i32, i32
  }
  func.func @transform_5(%arg0: i32, %arg1: i32) -> (i32, i32, i32, i32) {
    %c0_i32 = arith.constant 0 : i32
    %c0_i32_0 = arith.constant 0 : i32
    %c0_i32_1 = arith.constant 0 : i32
    return %arg0, %arg1, %c0_i32, %c0_i32_0 : i32, i32, i32, i32
  }
}

module attributes {stable_mosaic.version = 11 : i64} {
  func.func @bn_residual_relu_kernel(%arg0: i32, %arg1: memref<1x16x64xbf16, #tpu.memory_space<vmem>>, %arg2: memref<1x16x64xf32, #tpu.memory_space<vmem>>, %arg3: memref<1x64xf32, #tpu.memory_space<vmem>>, %arg4: memref<1x64xf32, #tpu.memory_space<vmem>>, %arg5: memref<1x16x64xf32, #tpu.memory_space<vmem>>) attributes {dimension_semantics = [#tpu.dimension_semantics<parallel>], iteration_bounds = array<i64: 2>, scalar_prefetch = 0 : i64, scratch_operands = 0 : i64, tpu.core_type = #tpu.core_type<tc>, window_params = [{transform_indices = @transform_0, window_bounds = array<i64: 1, 16, 64>}, {transform_indices = @transform_1, window_bounds = array<i64: 1, 16, 64>}, {pipeline_mode = #tpu.pipeline_mode<synchronous>, transform_indices = @transform_2, window_bounds = array<i64: 1, 64>}, {pipeline_mode = #tpu.pipeline_mode<synchronous>, transform_indices = @transform_3, window_bounds = array<i64: 1, 64>}, {transform_indices = @transform_4, window_bounds = array<i64: 1, 16, 64>}]} {
    %c0 = arith.constant 0 : index
    %c0_0 = arith.constant 0 : index
    %0 = vector.load %arg3[%c0, %c0_0] : memref<1x64xf32, #tpu.memory_space<vmem>>, vector<1x64xf32>
    %1 = vector.shape_cast %0 : vector<1x64xf32> to vector<1x1x64xf32>
    %c0_1 = arith.constant 0 : index
    %c0_2 = arith.constant 0 : index
    %2 = vector.load %arg4[%c0_1, %c0_2] : memref<1x64xf32, #tpu.memory_space<vmem>>, vector<1x64xf32>
    %3 = vector.shape_cast %2 : vector<1x64xf32> to vector<1x1x64xf32>
    %c0_3 = arith.constant 0 : index
    %c0_4 = arith.constant 0 : index
    %c0_5 = arith.constant 0 : index
    %4 = vector.load %arg1[%c0_3, %c0_4, %c0_5] : memref<1x16x64xbf16, #tpu.memory_space<vmem>>, vector<1x16x64xbf16>
    %5 = arith.extf %4 : vector<1x16x64xbf16> to vector<1x16x64xf32>
    %6 = vector.broadcast %1 : vector<1x1x64xf32> to vector<1x16x64xf32>
    %7 = arith.mulf %5, %6 : vector<1x16x64xf32>
    %8 = vector.broadcast %3 : vector<1x1x64xf32> to vector<1x16x64xf32>
    %9 = arith.addf %7, %8 : vector<1x16x64xf32>
    %c0_6 = arith.constant 0 : index
    %c0_7 = arith.constant 0 : index
    %c0_8 = arith.constant 0 : index
    %10 = vector.load %arg2[%c0_6, %c0_7, %c0_8] : memref<1x16x64xf32, #tpu.memory_space<vmem>>, vector<1x16x64xf32>
    %11 = arith.addf %9, %10 : vector<1x16x64xf32>
    %cst = arith.constant 0.000000e+00 : f32
    %12 = vector.broadcast %cst : f32 to vector<1x16x64xf32>
    %13 = arith.maximumf %11, %12 : vector<1x16x64xf32>
    %c0_9 = arith.constant 0 : index
    %c0_10 = arith.constant 0 : index
    %c0_11 = arith.constant 0 : index
    %14 = vector.load %arg5[%c0_9, %c0_10, %c0_11] : memref<1x16x64xf32, #tpu.memory_space<vmem>>, vector<1x16x64xf32>
    tpu.vector_store %arg5[%c0_9, %c0_10, %c0_11], %13 {strides = array<i32>} : memref<1x16x64xf32, #tpu.memory_space<vmem>>, vector<1x16x64xf32>,
    return
  }
  func.func @transform_0(%arg0: i32) -> (i32, i32, i32) {
    %c0_i32 = arith.constant 0 : i32
    %c0_i32_0 = arith.constant 0 : i32
    %c0_i32_1 = arith.constant 0 : i32
    return %arg0, %c0_i32, %c0_i32_0 : i32, i32, i32
  }
  func.func @transform_1(%arg0: i32) -> (i32, i32, i32) {
    %c0_i32 = arith.constant 0 : i32
    %c0_i32_0 = arith.constant 0 : i32
    %c0_i32_1 = arith.constant 0 : i32
    return %arg0, %c0_i32, %c0_i32_0 : i32, i32, i32
  }
  func.func @transform_2(%arg0: i32) -> (i32, i32) {
    %c0_i32 = arith.constant 0 : i32
    %c0_i32_0 = arith.constant 0 : i32
    %c0_i32_1 = arith.constant 0 : i32
    return %c0_i32, %c0_i32_0 : i32, i32
  }
  func.func @transform_3(%arg0: i32) -> (i32, i32) {
    %c0_i32 = arith.constant 0 : i32
    %c0_i32_0 = arith.constant 0 : i32
    %c0_i32_1 = arith.constant 0 : i32
    return %c0_i32, %c0_i32_0 : i32, i32
  }
  func.func @transform_4(%arg0: i32) -> (i32, i32, i32) {
    %c0_i32 = arith.constant 0 : i32
    %c0_i32_0 = arith.constant 0 : i32
    %c0_i32_1 = arith.constant 0 : i32
    return %arg0, %c0_i32, %c0_i32_0 : i32, i32, i32
  }
}

</mosaic_0001>

<bundles_post_ra>
// kernel: basic_block_forward.5
= control target key start
LH: loop header
LB: loop body
LE: loop exit
PB: predicated region body
PF: predicated region fallthrough
CT: control target
= control target key end

     0   :  { %s379_s15 = smov 0   ;;  %s405_s0 = inlined_call_operand.vmem [shape: bf16[2,16,64], index: 0, kind: input, shape index: {}]   ;;  %s406_s1 = inlined_call_operand.vmem [shape: f32[2,16,64], index: 1, kind: input, shape index: {}]   ;;  %s407_s2 = inlined_call_operand.vmem [shape: f32[1,64], index: 2, kind: input, shape index: {}]   ;;  %s408_s3 = inlined_call_operand.vmem [shape: f32[1,64], index: 3, kind: input, shape index: {}]   ;;  %s409_s4 = inlined_call_operand.vmem [shape: f32[2,16,64], index: 4, kind: output, shape index: {}]  }
   0x1 LB: > { %s316_s16 = sadd.s32 4294967295, %s352_s15   ;;  %p320_p0 = scmp.ge.s32.totalorder %s352_s15, 1  ;;  %s352_s15 = sphi %s379_s15, %s14_s15  }
   0x2   : > { %p172_p1 = scmp.lt.s32.totalorder %s352_s15, 3 }
   0x4   : > { %p173_p2 = pnand %p320_p0, %p172_p1 }
   0x5   : > { %p203_p3 = scmp.lt.s32.totalorder (!%p173_p2), %s316_s16, 1  ;;  %v327_v0 = vld [vmem:[%s407_s2] ss:$0 sm:$0xff] (!%p173_p2)  ;;  %vm246_vm0 = vcmask (!%p173_p2), 523264  }
   0x6   : > { %176 = sbr.rel (%p173_p2) target bundleno = 28 (0x1c), region = 36  ;;  %v328_v4 = vld [vmem:[%s408_s3] ss:$0 sm:$0xff] (!%p173_p2) }
   0xd   : > { %s411_s16 = smov (!%p203_p3, %s316_s16), 1 }
   0xe   : > { %s331_s17 = sshll.u32 %s411_s16, 3  ;;  %s332_s18 = sshll.u32 %s411_s16, 4 }
   0xf   : > { %s207_s21 = scalar_lea.vmem %s405_s0, %s331_s17  ;;  %s212_s26 = scalar_lea.vmem %s406_s1, %s332_s18 }
  0x10   : > { %v335_v1 = vld [vmem:[%s207_s21] sm:$0xff]   ;;  %v241_v8 = vld [vmem:[%s212_s26 + $0x8] sm:$0xff]  ;;  %s217_s5 = scalar_lea.vmem %s409_s4, %s332_s18 }
  0x11   : > { %v336_v2 = vunpack.c.l.bf16 %v335_v1  ;;  %v337_v3 = vunpack.c.h.bf16 %v335_v1  ;;  %v240_v7 = vld [vmem:[%s212_s26] sm:$0xff] }
  0x13   : > { %v230_v5 = vmul.f32 %v336_v2, %v327_v0  ;;  %v231_v6 = vmul.f32 %v337_v3, %v327_v0 }
  0x15   : > { %v238_v9 = vadd.f32 %v328_v4, %v230_v5  ;;  %v239_v10 = vadd.f32 %v328_v4, %v231_v6 }
  0x17   : > { %v242_v11 = vadd.f32 %v240_v7, %v238_v9  ;;  %v243_v12 = vadd.f32 %v241_v8, %v239_v10 }
  0x19   : > { %v244_v13 = vmax.f32 %v242_v11, 0.0  ;;  %v245_v14 = vmax.f32 %v243_v12, 0.0 }
  0x1b   : > { %247 = vst.msk [vmem:[%s217_s5] sm:$0xff] %vm246_vm0, %v244_v13  ;;  %248 = vst.msk [vmem:[%s217_s5 + $0x8] sm:$0xff] %vm246_vm0, %v245_v14 }
  0x1c PF: > { %s14_s15 = sadd.s32 1, %s352_s15  }
  0x1d   : > { %p11_p4 = scmp.ge.s32.totalorder %s14_s15, 4  }
  0x1f   :  { %13 = sbr.rel (!%p11_p4) target bundleno = 1 (0x1), region = 69 }

// kernel: basic_block_forward.3
= control target key start
LH: loop header
LB: loop body
LE: loop exit
PB: predicated region body
PF: predicated region fallthrough
CT: control target
= control target key end

     0   :  { %s2862_s12 = smov 0   ;;  %s2864_s13 = smov 0   ;;  %s3723_s0 = inlined_call_operand.vmem [shape: f32[2,16,16,4], index: 0, kind: input, shape index: {}]   ;;  %s3724_s1 = inlined_call_operand.vmem [shape: bf16[36,4], index: 1, kind: input, shape index: {}]   ;;  %s3725_s2 = inlined_call_operand.vmem [shape: bf16[2,16,16,4], index: 2, kind: output, shape index: {0}]   ;;  %s3726_s3 = inlined_call_operand.vmem [shape: f32[2,1,2,4], index: 3, kind: output, shape index: {1}]  }
   0x1   :  { %s2866_s14 = smov 0  }
   0x2 LB: > { %s26_s15 = sadd.s32 1, %s2825_s13  ;;  %p2573_p0 = scmp.ge.s32.totalorder %s2829_s14, 1  ;;  %s2829_s14 = sphi %s2866_s14, %s14_s14   ;;  %s2825_s13 = sphi %s2864_s13, %s3736_s13   ;;  %s2821_s12 = sphi %s2862_s12, %s3735_s12  }
   0x3   : > { %p28_p1 = scmp.ge.s32.totalorder %s26_s15, 2  ;;  %p156_p2 = scmp.lt.s32.totalorder %s2829_s14, 3 }
   0x5   : > { %s3738_s15 = smov (%p28_p1, %s26_s15), 0  ;;  %p157_p3 = pnand %p2573_p0, %p156_p2 }
   0x6   : > { %p192_p4 = scmp.lt.s32.totalorder (!%p157_p3), %s2821_s12, 1  ;;  %v504_v0 = vlaneseq (!%p157_p3)  ;;  %vm2831_vm0 = vmmov (!%p157_p3), 1   ;;  %vm2832_vm2 = vmmov (!%p157_p3), 0   ;;  %v2833_v3 = vmov (!%p157_p3), 0   ;;  %s2834_s20 = smov (!%p157_p3), 12  }
   0x7   : > { %160 = sbr.rel (%p157_p3) target bundleno = 636 (0x27c), region = 28  ;;  %vm788_vm1 = vmpackc.low (!%p157_p3), %vm2831_vm0, %vm2831_vm0  ;;  %vm447_vm7 = vcmask (!%p157_p3), 1040384   ;;  %vm448_vm8 = vsmask.f32 (!%p157_p3), 256  ;;  %vm1311_vm14 = vcmask (!%p157_p3), 1046528   ;;  %s2835_s21 = smov (!%p157_p3), 24  }
   0x8   : > { %v505_v1 = vshrl.u32 (!%p157_p3), %v504_v0, 7  ;;  %vm784_vm3 = vmpackc.low (!%p157_p3), %vm2832_vm2, %vm2832_vm2  ;;  %v842_v8 = vsel (!%p157_p3), %vm788_vm1, 65537, %v2833_v3  ;;  %vm1054_vm15 = vsmask.f32 (!%p157_p3), 7424  ;;  %s2836_s24 = smov (!%p157_p3), 8   ;;  %s2837_s25 = smov (!%p157_p3), 20  }
   0x9   : > { %v838_v4 = vsel (!%p157_p3), %vm784_vm3, 65537, %v2833_v3  ;;  %vm2896_vm10 = vmand (!%p157_p3), %vm447_vm7, %vm448_vm8  ;;  %s2838_s28 = smov (!%p157_p3), 4   ;;  %s2839_s29 = smov (!%p157_p3), 16   ;;  %vm1935_vm0 = vcmask (!%p157_p3), 1041408   ;;  %vm1618_vm1 = vcmask (!%p157_p3), 31744   ;;  %vm1651_vm2 = vcmask (!%p157_p3), 64512  }
   0xa   : > { %vm562_vm4 = vcmp.ge.s32.totalorder (!%p157_p3), %v505_v1, 1  ;;  %v507_v2 = vadd.s32 (!%p157_p3), 16, %v505_v1  ;;  %v2581_v16 = vcombine.low (!%p157_p3), %v838_v4, %v838_v4  ;;  %s2840_s30 = smov (!%p157_p3), 28   ;;  %s2841_s4 = smov (!%p157_p3), 32   ;;  %vm1684_vm3 = vcmask (!%p157_p3), 97280  }
   0xb   : > { %vm787_vm5 = vmpackc.low (!%p157_p3), %vm562_vm4, %vm562_vm4  ;;  %vm1717_vm4 = vcmask (!%p157_p3), 130048   ;;  %vm1816_vm8 = vcmask (!%p157_p3), 228352  }
   0xc   : > { %v841_v7 = vsel (!%p157_p3), %vm787_vm5, 65537, %v2833_v3  ;;  %vm621_vm6 = vcmp.le.s32.totalorder (!%p157_p3), %v507_v2, 16  ;;  %vm2902_vm11 = vcmp.ne.s16.totalorder (!%p157_p3), %v2581_v16, 0  ;;  %vm1750_vm5 = vcmask (!%p157_p3), 162816  }
   0xd   : > { %vm789_vm9 = vmpackc.low (!%p157_p3), %vm621_vm6, %vm621_vm6  ;;  %v2583_v19 = vcombine.low (!%p157_p3), %v841_v7, %v842_v8  ;;  %vm1783_vm6 = vcmask (!%p157_p3), 195584  }
   0xe   : > { %s3740_s12 = smov (!%p192_p4, %s2821_s12), 1  ;;  %v843_v20 = vsel %vm789_vm9, 65537, %v2833_v3  ;;  %vm1849_vm9 = vcmask 261120  }
   0xf   : > { %s2670_s16 = sshll.u32 %s3740_s12, 8  ;;  %v2584_v26 = vcombine.low %v843_v20, %v843_v20  ;;  %vm2906_vm12 = vcmp.ne.s16.totalorder %v2583_v19, 0  ;;  %s2671_s7 = sshll.u32 %s3740_s12, 7 }
  0x10   : > { %s2886_s19 = scalar_lea.vmem %s3723_s0, %s2670_s16  ;;  %s3565_s10 = scalar_lea.vmem %s3725_s2, %s2671_s7 }
  0x11   : > { %v230_v5 = vld [vmem:[%s2886_s19 + $0x10] sm:$0xff]  ;;  %v231_v6 = vld [vmem:[%s2886_s19 + $0x18] sm:$0xff]  ;;  %v228_v9 = vld [vmem:[%s2886_s19] sm:$0xff]  ;;  %vm2910_vm13 = vcmp.ne.s16.totalorder %v2584_v26, 0  ;;  %s2578_s11 = sshll.u32 %s3740_s12, 1 }
  0x12   : > { %v269_v10 = vpack.c.bf16 %v231_v6, %v230_v5  ;;  %v229_v11 = vld [vmem:[%s2886_s19 + $0x8] sm:$0xff]  ;;  %v232_v12 = vld [vmem:[%s2886_s19 + $0x20] sm:$0xff]  ;;  %v234_v57 = vld [vmem:[%s2886_s19 + $0x30] sm:$0xff]  ;;  %s214_s18 = scalar_lea.vmem %s3726_s3, %s2578_s11 }
  0x13   : > { %v233_v13 = vld [vmem:[%s2886_s19 + $0x28] sm:$0xff]  ;;  %v268_v14 = vpack.c.bf16 %v229_v11, %v228_v9  ;;  %v235_v58 = vld [vmem:[%s2886_s19 + $0x38] sm:$0xff]  ;;  %v2804_v5 = vld [vmem:[%s3724_s1] sm:$0xff]  }
  0x14   : > { %v270_v15 = vpack.c.bf16 %v233_v13, %v232_v12  ;;  %v300_v17 = vshrl.u32 %v269_v10, 16  ;;  %v303_v18 = vshll.u32 %v269_v10, 16  ;;  %v271_v4 = vpack.c.bf16 %v235_v58, %v234_v57  ;;  %2723 = vmatprep.subr.bf16.mxu0 %v2804_v5  ;;  %2761 = vmatprep.subr.bf16.mxu1 %v2804_v5 }
  0x15   : > { %v293_v21 = vshrl.u32 %v268_v14, 16  ;;  %v296_v22 = vshll.u32 %v268_v14, 16  ;;  %2724 = vmatpush3.bf16.msra.mxu0 %v2804_v5  ;;  %2764 = vmatpush3.bf16.msra.mxu1 %v2804_v5 }
  0x16   : > { %v307_v23 = vshrl.u32 %v270_v15, 16  ;;  %v310_v24 = vshll.u32 %v270_v15, 16  ;;  %v302_v25 = vrot.slane %v300_v17, 7  ;;  %v314_v16 = vshrl.u32 %v271_v4, 16  ;;  %v2805_v17 = vld [vmem:[%s3724_s1 + $0x8] sm:$0xff]  }
  0x17   : > { %v295_v28 = vrot.slane %v293_v21, 7  ;;  %2725 = vmatprep.subr.bf16.mxu0 %v2805_v17  ;;  %2762 = vmatprep.subr.bf16.mxu1 %v2805_v17  ;;  %v317_v26 = vshll.u32 %v271_v4, 16 }
  0x18   : > { %v2900_v29 = vrot.slane %v307_v23, 7  ;;  %v305_v31 = vor.u32 %v303_v18, %v302_v25  ;;  %v470_v43 = vsel %vm2896_vm10, %v302_v25, 0  ;;  %v316_v25 = vrot.slane %v314_v16, 7  ;;  %v240_v16 = vld [vmem:[%s2886_s19 + $0x60] sm:$0xff] }
  0x19   : > { %v298_v34 = vor.u32 %v296_v22, %v295_v28  ;;  %v469_v36 = vsel %vm2896_vm10, %v295_v28, 0  ;;  %v1023_v56 = vsel %vm2910_vm13, %v470_v43, 0  ;;  %2726 = vmatpush3.bf16.msra.mxu0 %v2805_v17  ;;  %2765 = vmatpush3.bf16.msra.mxu1 %v2805_v17  ;;  %v236_v28 = vld [vmem:[%s2886_s19 + $0x40] sm:$0xff]  ;;  %v241_v17 = vld [vmem:[%s2886_s19 + $0x68] sm:$0xff] }
  0x1a   : > { %v312_v35 = vor.u32 %v310_v24, %v2900_v29  ;;  %v452_v37 = vsel %vm2896_vm10, 0, %v305_v31  ;;  %v1021_v38 = vsel %vm2910_vm13, %v469_v36, 0  ;;  %v1019_v39 = vsel %vm2902_vm11, %v469_v36, 0 }
  0x1b   : > { %v2925_v40 = vsel %vm2906_vm12, %v452_v37, 0  ;;  %v451_v41 = vsel %vm2896_vm10, 0, %v298_v34  ;;  %v1316_v46 = vrot.slane %v1021_v38, 1  ;;  %v1313_v50 = vrot.slane %v1019_v39, 1 }
  0x1c   : > { %v453_v42 = vsel %vm2896_vm10, 0, %v312_v35  ;;  %1395 = vrot.lane.b32.xlu1 %v2925_v40, %s2834_s20  ;;  %v2937_v44 = vsel %vm2906_vm12, %v451_v41, 0  ;;  %v2945_v47 = vsel %vm2902_vm11, %v451_v41, 0  ;;  %v1063_v53 = vshll.u32 %v1019_v39, 16 }
  0x1d   : > { %v2941_v45 = vsel %vm2906_vm12, %v453_v42, 0  ;;  %1393 = vrot.lane.b32.xlu0 %v2937_v44, %s2834_s20  ;;  %v1315_v48 = vrot.slane %v2937_v44, 1  ;;  %v1312_v49 = vrot.slane %v2945_v47, 1  ;;  %v1058_v51 = vshll.u32 %v2945_v47, 16 }
  0x1e   : > { %v1056_v52 = vshrl.u32 %v2945_v47, 16  ;;  %v1070_v54 = vshll.u32 %v2937_v44, 16  ;;  %v1068_v61 = vshrl.u32 %v2937_v44, 16  ;;  %v1082_v62 = vshll.u32 %v2925_v40, 16 }
  0x1f   : > { %v1060_v55 = vrot.slane %v1058_v51, 1  ;;  %v1317_v59 = vsel %vm1311_vm14, %v1315_v48, %v1316_v46  ;;  %v1314_v60 = vsel %vm1311_vm14, %v1312_v49, %v1313_v50  ;;  %v1065_v0 = vrot.slane %v1063_v53, 1 }
  0x20   : > { %1508 = vrot.lane.b32.xlu1 %v2941_v45, %s2835_s21  ;;  %v1072_v1 = vrot.slane %v1070_v54, 1  ;;  %v1075_v2 = vshll.u32 %v1021_v38, 16  ;;  %v471_v3 = vsel %vm2896_vm10, %v2900_v29, 0  ;;  %v1318_v6 = vrot.slane %v2925_v40, 1  ;;  %v237_v29 = vld [vmem:[%s2886_s19 + $0x48] sm:$0xff] }
  0x21   : > { %1506 = vrot.lane.b32.xlu0 %v2925_v40, %s2835_s21  ;;  %v1061_v63 = vor.u32 %v1060_v55, %v1056_v52  ;;  %v1319_v7 = vrot.slane %v1023_v56, 1  ;;  %v1080_v8 = vshrl.u32 %v2925_v40, 16  ;;  %v1084_v9 = vrot.slane %v1082_v62, 1 }
  0x22   : > { %v1087_v10 = vshll.u32 %v1023_v56, 16  ;;  %v1094_v11 = vshll.u32 %v2941_v45, 16  ;;  %v1073_v13 = vor.u32 %v1072_v1, %v1068_v61  ;;  %v1077_v14 = vrot.slane %v1075_v2, 1  ;;  %v2806_v61 = vld [vmem:[%s3724_s1 + $0x10] ss:$0 sps:$4 sm:$0x33]  }
  0x23   : > { %v1066_v12 = vsel %vm1054_vm15, %v1061_v63, %v1065_v0  ;;  %v1025_v15 = vsel %vm2910_vm13, %v471_v3, 0  ;;  %v1320_v18 = vsel %vm1311_vm14, %v1318_v6, %v1319_v7  ;;  %v1092_v19 = vshrl.u32 %v2941_v45, 16  ;;  %2767 = vmatprep.subr.msk.bf16.mxu0 %vm1935_vm0, %v2806_v61  ;;  %2768 = vmatprep.subr.msk.bf16.mxu1 %vm1935_vm0, %v2806_v61 }
  0x24   : > { %1360 = vrot.lane.b32.xlu1 %v1314_v60, %s2836_s24  ;;  %v1085_v20 = vor.u32 %v1084_v9, %v1080_v8  ;;  %v1089_v21 = vrot.slane %v1087_v10, 1  ;;  %v1096_v22 = vrot.slane %v1094_v11, 1  ;;  %v1099_v23 = vshll.u32 %v1025_v15, 16  ;;  %v239_v60 = vld [vmem:[%s2886_s19 + $0x58] sm:$0xff] }
  0x25   : > { %1473 = vrot.lane.b32.xlu0 %v1317_v59, %s2837_s25  ;;  %v1078_v24 = vsel %vm1054_vm15, %v1073_v13, %v1077_v14  ;;  %v319_v36 = vor.u32 %v317_v26, %v316_v25  ;;  %v272_v37 = vpack.c.bf16 %v237_v29, %v236_v28  ;;  %v1321_v42 = vrot.slane %v2941_v45, 1 }
  0x26   : > { %v1090_v31 = vsel %vm1054_vm15, %v1085_v20, %v1089_v21  ;;  %v1097_v34 = vor.u32 %v1096_v22, %v1092_v19  ;;  %v1101_v35 = vrot.slane %v1099_v23, 1  ;;  %v1322_v43 = vrot.slane %v1025_v15, 1 }
  0x27   : > { %v454_v39 = vsel %vm2896_vm10, 0, %v319_v36  ;;  %v321_v41 = vshrl.u32 %v272_v37, 16  ;;  %v472_v48 = vsel %vm2896_vm10, %v316_v25, 0  ;;  %v324_v50 = vshll.u32 %v272_v37, 16 }
  0x28   : > { %1362 = vrot.lane.b32.xlu1 %v1317_v59, %s2836_s24  ;;  %v1102_v38 = vsel %vm1054_vm15, %v1097_v34, %v1101_v35  ;;  %v3003_v46 = vsel %vm2906_vm12, %v454_v39, 0  ;;  %v1323_v52 = vsel %vm1311_vm14, %v1321_v42, %v1322_v43  ;;  %v1027_v53 = vsel %vm2910_vm13, %v472_v48, 0  ;;  %v238_v59 = vld [vmem:[%s2886_s19 + $0x50] sm:$0xff] }
  0x29   : > { %1247 = vrot.lane.b32.xlu0 %v1066_v12, %s2838_s28  ;;  %v323_v49 = vrot.slane %v321_v41, 7  ;;  %v1106_v51 = vshll.u32 %v3003_v46, 16  ;;  %v1104_v55 = vshrl.u32 %v3003_v46, 16  ;;  %v1111_v57 = vshll.u32 %v1027_v53, 16  ;;  %v242_v48 = vld [vmem:[%s2886_s19 + $0x70] sm:$0xff] }
  0x2a   : > { %v273_v2 = vpack.c.bf16 %v239_v60, %v238_v59  ;;  %v1325_v3 = vrot.slane %v1027_v53, 1  ;;  %v1324_v5 = vrot.slane %v3003_v46, 1  ;;  %v1937_v7 = vsel %vm1935_vm0, %v2806_v61, 0 }
  0x2b   : > { %v326_v54 = vor.u32 %v324_v50, %v323_v49  ;;  %v1108_v56 = vrot.slane %v1106_v51, 1  ;;  %v1113_v63 = vrot.slane %v1111_v57, 1  ;;  %v473_v1 = vsel %vm2896_vm10, %v323_v49, 0  ;;  %2728 = vmatpush3.bf16.msra.mxu0 %v1937_v7  ;;  %2766 = vmatpush3.bf16.msra.mxu1 %v1937_v7  ;;  %v243_v49 = vld [vmem:[%s2886_s19 + $0x78] sm:$0xff] }
  0x2c   : > { %1475 = vrot.lane.b32.xlu1 %v1320_v18, %s2837_s25  ;;  %v1029_v8 = vsel %vm2910_vm13, %v473_v1, 0  ;;  %v328_v9 = vshrl.u32 %v273_v2, 16  ;;  %v1326_v10 = vsel %vm1311_vm14, %v1324_v5, %v1325_v3  ;;  %v331_v15 = vshll.u32 %v273_v2, 16  ;;  %v245_v5 = vld [vmem:[%s2886_s19 + $0x88] sm:$0xff] }
  0x2d   : > { %1249 = vrot.lane.b32.xlu0 %v1078_v24, %s2838_s28  ;;  %v455_v58 = vsel %vm2896_vm10, 0, %v326_v54  ;;  %v1109_v62 = vor.u32 %v1108_v56, %v1104_v55  ;;  %v1123_v13 = vshll.u32 %v1029_v8, 16  ;;  %v274_v21 = vpack.c.bf16 %v241_v17, %v240_v16 }
  0x2e   : > { %v3027_v0 = vsel %vm2906_vm12, %v455_v58, 0  ;;  %v330_v14 = vrot.slane %v328_v9, 7  ;;  %v1328_v26 = vrot.slane %v1029_v8, 1  ;;  %v275_v54 = vpack.c.bf16 %v243_v49, %v242_v48 }
  0x2f   : > { %v1114_v4 = vsel %vm1054_vm15, %v1109_v62, %v1113_v63  ;;  %v1118_v6 = vshll.u32 %v3027_v0, 16  ;;  %v1116_v11 = vshrl.u32 %v3027_v0, 16  ;;  %v1125_v19 = vrot.slane %v1123_v13, 1 }
  0x30   : > { %1439 = vrot.lane.b32.xlu1 %v1090_v31, %s2839_s29  ;;  %v333_v20 = vor.u32 %v331_v15, %v330_v14  ;;  %v1327_v25 = vrot.slane %v3027_v0, 1  ;;  %v474_v29 = vsel %vm2896_vm10, %v330_v14, 0  ;;  %v338_v34 = vshll.u32 %v274_v21, 16 }
  0x31   : > { %1437 = vrot.lane.b32.xlu0 %v1078_v24, %s2839_s29  ;;  %v1120_v12 = vrot.slane %v1118_v6, 1  ;;  %v335_v24 = vshrl.u32 %v274_v21, 16  ;;  %v1031_v37 = vsel %vm2910_vm13, %v474_v29, 0  ;;  %v342_v60 = vshrl.u32 %v275_v54, 16  ;;  %v246_v29 = vld [vmem:[%s2886_s19 + $0x90] sm:$0xff] }
  0x32   : > { %v456_v23 = vsel %vm2896_vm10, 0, %v333_v20  ;;  %v1329_v36 = vsel %vm1311_vm14, %v1327_v25, %v1328_v26  ;;  %v1135_v42 = vshll.u32 %v1031_v37, 16  ;;  %v1331_v57 = vrot.slane %v1031_v37, 1 }
  0x33   : > { %v3060_v28 = vsel %vm2906_vm12, %v456_v23, 0  ;;  %v344_v2 = vrot.slane %v342_v60, 7  ;;  %v345_v3 = vshll.u32 %v275_v54, 16  ;;  %vm1902_vm0 = vcmask 293888  }
  0x34   : > { %1552 = vrot.lane.b32.xlu1 %v1102_v38, %s2840_s30  ;;  %v1130_v35 = vshll.u32 %v3060_v28, 16  ;;  %v1128_v39 = vshrl.u32 %v3060_v28, 16  ;;  %v1137_v51 = vrot.slane %v1135_v42, 1  ;;  %v1330_v56 = vrot.slane %v3060_v28, 1 }
  0x35   : > { %1550 = vrot.lane.b32.xlu0 %v1090_v31, %s2840_s30  ;;  %v347_v8 = vor.u32 %v345_v3, %v344_v2  ;;  %v476_v16 = vsel %vm2896_vm10, %v344_v2, 0 }
  0x36   : > { %v1132_v41 = vrot.slane %v1130_v35, 1  ;;  %v1332_v61 = vsel %vm1311_vm14, %v1330_v56, %v1331_v57  ;;  %v1035_v21 = vsel %vm2910_vm13, %v476_v16, 0  ;;  %v248_v57 = vld [vmem:[%s2886_s19 + $0xa0] sm:$0xff] }
  0x37   : > { %v1159_v25 = vshll.u32 %v1035_v21, 16  ;;  %v1337_v42 = vrot.slane %v1035_v21, 1 }
  0x38   : > { %1251 = vrot.lane.b32.xlu1 %v1090_v31, %s2838_s28  ;;  %v337_v31 = vrot.slane %v335_v24, 7  ;;  %v1133_v50 = vor.u32 %v1132_v41, %v1128_v39 }
  0x39   : > { %1586 = vrot.lane.b32.xlu0 %v1320_v18, %s2841_s4  ;;  %v1161_v35 = vrot.slane %v1159_v25, 1 }
  0x3a   : > { %v475_v53 = vsel %vm2896_vm10, %v337_v31, 0  ;;  %v1138_v55 = vsel %vm1054_vm15, %v1133_v50, %v1137_v51 }
  0x3b   : > { %v1033_v59 = vsel %vm2910_vm13, %v475_v53, 0 }
  0x3c   : > { %1253 = vrot.lane.b32.xlu1 %v1102_v38, %s2838_s28  ;;  %v1147_v1 = vshll.u32 %v1033_v59, 16  ;;  %v1334_v14 = vrot.slane %v1033_v59, 1 }
  0x3d   : > { %1588 = vrot.lane.b32.xlu0 %v1323_v52, %s2841_s4 }
  0x3e   : > { %v1149_v7 = vrot.slane %v1147_v1, 1 }
  0x40   : > { %1366 = vrot.lane.b32.xlu1 %v1323_v52, %s2836_s24 }
  0x41   : > { %1364 = vrot.lane.b32.xlu0 %v1320_v18, %s2836_s24  ;;  %v1121_v18 = vor.u32 %v1120_v12, %v1116_v11  ;;  %v458_v11 = vsel %vm2896_vm10, 0, %v347_v8 }
  0x42   : > { %v3114_v15 = vsel %vm2906_vm12, %v458_v11, 0 }
  0x43   : > { %v1126_v22 = vsel %vm1054_vm15, %v1121_v18, %v1125_v19  ;;  %v1154_v19 = vshll.u32 %v3114_v15, 16  ;;  %v1152_v23 = vshrl.u32 %v3114_v15, 16  ;;  %v1336_v41 = vrot.slane %v3114_v15, 1 }
  0x44   : > { %1399 = vrot.lane.b32.xlu1 %v3003_v46, %s2834_s20 }
  0x45   : > { %1397 = vrot.lane.b32.xlu0 %v2941_v45, %s2834_s20  ;;  %v1156_v24 = vrot.slane %v1154_v19, 1  ;;  %v1338_v50 = vsel %vm1311_vm14, %v1336_v41, %v1337_v42 }
  0x48   : > { %1443 = vrot.lane.b32.xlu1 %v1114_v4, %s2839_s29 }
  0x49   : > { %1441 = vrot.lane.b32.xlu0 %v1102_v38, %s2839_s29  ;;  %v340_v38 = vor.u32 %v338_v34, %v337_v31  ;;  %v247_v31 = vld [vmem:[%s2886_s19 + $0x98] sm:$0xff]  ;;  %v1157_v34 = vor.u32 %v1156_v24, %v1152_v23 }
  0x4b   : > { %v457_v43 = vsel %vm2896_vm10, 0, %v340_v38  ;;  %v277_v38 = vpack.c.bf16 %v247_v31, %v246_v29  ;;  %v1162_v39 = vsel %vm1054_vm15, %v1157_v34, %v1161_v35 }
  0x4c   : > { %1479 = vrot.lane.b32.xlu1 %v1326_v10, %s2837_s25 }
  0x4d   : > { %1477 = vrot.lane.b32.xlu0 %v1323_v52, %s2837_s25  ;;  %v3081_v52 = vsel %vm2906_vm12, %v457_v43, 0  ;;  %v356_v49 = vshrl.u32 %v277_v38, 16  ;;  %v359_v56 = vshll.u32 %v277_v38, 16 }
  0x4e   : > { %v1142_v58 = vshll.u32 %v3081_v52, 16  ;;  %v1140_v62 = vshrl.u32 %v3081_v52, 16  ;;  %v1333_v13 = vrot.slane %v3081_v52, 1 }
  0x50   : > { %1512 = vrot.lane.b32.xlu1 %v3027_v0, %s2835_s21  ;;  %v1144_v63 = vrot.slane %v1142_v58, 1  ;;  %v1335_v20 = vsel %vm1311_vm14, %v1333_v13, %v1334_v14  ;;  %v249_v58 = vld [vmem:[%s2886_s19 + $0xa8] sm:$0xff] }
  0x51   : > { %1510 = vrot.lane.b32.xlu0 %v3003_v46, %s2835_s21  ;;  %v278_v1 = vpack.c.bf16 %v249_v58, %v248_v57 }
  0x52   : > { %v1145_v6 = vor.u32 %v1144_v63, %v1140_v62 }
  0x53   : > { %v366_v14 = vshll.u32 %v278_v1, 16 }
  0x54   : > { %1556 = vrot.lane.b32.xlu1 %v1126_v22, %s2840_s30 }
  0x55   : > { %1554 = vrot.lane.b32.xlu0 %v1114_v4, %s2840_s30 }
  0x58   : > { %1255 = vrot.lane.b32.xlu1 %v1114_v4, %s2838_s28  ;;  %v244_v4 = vld [vmem:[%s2886_s19 + $0x80] sm:$0xff] }
  0x59   : > { %1590 = vrot.lane.b32.xlu0 %v1326_v10, %s2841_s4  ;;  %v276_v9 = vpack.c.bf16 %v245_v5, %v244_v4 }
  0x5b   : > { %v349_v12 = vshrl.u32 %v276_v9, 16  ;;  %v352_v18 = vshll.u32 %v276_v9, 16 }
  0x5c   : > { %1257 = vrot.lane.b32.xlu1 %v1126_v22, %s2838_s28 }
  0x5d   : > { %1592 = vrot.lane.b32.xlu0 %v1329_v36, %s2841_s4  ;;  %v351_v17 = vrot.slane %v349_v12, 7 }
  0x5f   : > { %v477_v37 = vsel %vm2896_vm10, %v351_v17, 0 }
  0x60   : > { %1370 = vrot.lane.b32.xlu1 %v1329_v36, %s2836_s24  ;;  %v1037_v48 = vsel %vm2910_vm13, %v477_v37, 0  ;;  %v251_v37 = vld [vmem:[%s2886_s19 + $0xb8] sm:$0xff] }
  0x61   : > { %1368 = vrot.lane.b32.xlu0 %v1326_v10, %s2836_s24  ;;  %v1150_v10 = vsel %vm1054_vm15, %v1145_v6, %v1149_v7  ;;  %v1171_v54 = vshll.u32 %v1037_v48, 16  ;;  %v363_v6 = vshrl.u32 %v278_v1, 16  ;;  %v1340_v9 = vrot.slane %v1037_v48, 1 }
  0x63   : > { %v1173_v60 = vrot.slane %v1171_v54, 1  ;;  %v365_v13 = vrot.slane %v363_v6, 7 }
  0x64   : > { %1403 = vrot.lane.b32.xlu1 %v3060_v28, %s2834_s20 }
  0x65   : > { %1401 = vrot.lane.b32.xlu0 %v3027_v0, %s2834_s20  ;;  %v368_v21 = vor.u32 %v366_v14, %v365_v13 }
  0x67   : > { %v461_v31 = vsel %vm2896_vm10, 0, %v368_v21 }
  0x68   : > { %1447 = vrot.lane.b32.xlu1 %v1138_v55, %s2839_s29 }
  0x69   : > { %1445 = vrot.lane.b32.xlu0 %v1126_v22, %s2839_s29  ;;  %v354_v22 = vor.u32 %v352_v18, %v351_v17 }
  0x6b   : > { %v459_v26 = vsel %vm2896_vm10, 0, %v354_v22 }
  0x6c   : > { %1483 = vrot.lane.b32.xlu1 %v1332_v61, %s2837_s25 }
  0x6d   : > { %1481 = vrot.lane.b32.xlu0 %v1329_v36, %s2837_s25  ;;  %v3135_v36 = vsel %vm2906_vm12, %v459_v26, 0 }
  0x6e   : > { %v1166_v43 = vshll.u32 %v3135_v36, 16  ;;  %v1164_v51 = vshrl.u32 %v3135_v36, 16  ;;  %v1339_v8 = vrot.slane %v3135_v36, 1 }
  0x70   : > { %1516 = vrot.lane.b32.xlu1 %v3081_v52, %s2835_s21  ;;  %v1168_v53 = vrot.slane %v1166_v43, 1  ;;  %v3183_v18 = vsel %vm1311_vm14, %v1339_v8, %v1340_v9  ;;  %v3207_v43 = vsel %vm2906_vm12, %v461_v31, 0 }
  0x71   : > { %1514 = vrot.lane.b32.xlu0 %v3060_v28, %s2835_s21  ;;  %v1190_v58 = vshll.u32 %v3207_v43, 16 }
  0x72   : > { %v1169_v59 = vor.u32 %v1168_v53, %v1164_v51  ;;  %v479_v51 = vsel %vm2896_vm10, %v365_v13, 0 }
  0x73   : > { %v1192_v8 = vrot.slane %v1190_v58, 1 }
  0x74   : > { %1560 = vrot.lane.b32.xlu1 %v1150_v10, %s2840_s30  ;;  %v3161_v2 = vsel %vm1054_vm15, %v1169_v59, %v1173_v60 }
  0x75   : > { %1558 = vrot.lane.b32.xlu0 %v1138_v55, %s2840_s30 }
  0x78   : > { %1259 = vrot.lane.b32.xlu1 %v1138_v55, %s2838_s28  ;;  %v358_v55 = vrot.slane %v356_v49, 7 }
  0x79   : > { %1594 = vrot.lane.b32.xlu0 %v1332_v61, %s2841_s4 }
  0x7a   : > { %v361_v63 = vor.u32 %v359_v56, %v358_v55  ;;  %v478_v12 = vsel %vm2896_vm10, %v358_v55, 0 }
  0x7b   : > { %v1039_v19 = vsel %vm2910_vm13, %v478_v12, 0 }
  0x7c   : > { %1261 = vrot.lane.b32.xlu1 %v1150_v10, %s2838_s28  ;;  %v460_v5 = vsel %vm2896_vm10, 0, %v361_v63  ;;  %v1183_v25 = vshll.u32 %v1039_v19, 16  ;;  %v1343_v55 = vrot.slane %v1039_v19, 1  ;;  %v253_v19 = vld [vmem:[%s2886_s19 + $0xc8] sm:$0xff] }
  0x7d   : > { %1596 = vrot.lane.b32.xlu0 %v1335_v20, %s2841_s4 }
  0x7e   : > { %v1185_v41 = vrot.slane %v1183_v25, 1 }
  0x80   : > { %1374 = vrot.lane.b32.xlu1 %v1335_v20, %s2836_s24 }
  0x81   : > { %1372 = vrot.lane.b32.xlu0 %v1332_v61, %s2836_s24 }
  0x84   : > { %1407 = vrot.lane.b32.xlu1 %v3114_v15, %s2834_s20 }
  0x85   : > { %1405 = vrot.lane.b32.xlu0 %v3081_v52, %s2834_s20 }
  0x88   : > { %1451 = vrot.lane.b32.xlu1 %v1162_v39, %s2839_s29 }
  0x89   : > { %1449 = vrot.lane.b32.xlu0 %v1150_v10, %s2839_s29  ;;  %v3175_v10 = vsel %vm2906_vm12, %v460_v5, 0 }
  0x8a   : > { %v1178_v16 = vshll.u32 %v3175_v10, 16  ;;  %v1176_v23 = vshrl.u32 %v3175_v10, 16  ;;  %v1342_v54 = vrot.slane %v3175_v10, 1 }
  0x8c   : > { %1487 = vrot.lane.b32.xlu1 %v1338_v50, %s2837_s25  ;;  %v1180_v24 = vrot.slane %v1178_v16, 1  ;;  %v3229_v5 = vsel %vm1311_vm14, %v1342_v54, %v1343_v55 }
  0x8d   : > { %1485 = vrot.lane.b32.xlu0 %v1335_v20, %s2837_s25 }
  0x8e   : > { %v1396_v61 = vpop.permute.xlu1 %1395 }
  0x8f   : > { %v1394_v62 = vpop.permute.xlu0 %1393 }
  0x90   : > { %1520 = vrot.lane.b32.xlu1 %v3135_v36, %s2835_s21 }
  0x91   : > { %1518 = vrot.lane.b32.xlu0 %v3114_v15, %s2835_s21 }
  0x92   : > { %v3163_v3 = vpop.permute.xlu1 %1508 }
  0x93   : > { %v3165_v4 = vpop.permute.xlu0 %1506 }
  0x94   : > { %1564 = vrot.lane.b32.xlu1 %v3161_v2, %s2840_s30 }
  0x95   : > { %1562 = vrot.lane.b32.xlu0 %v1162_v39, %s2840_s30 }
  0x96   : > { %v1361_v7 = vpop.permute.xlu1 %1360 }
  0x97   : > { %v1474_v11 = vpop.permute.xlu0 %1473 }
  0x98   : > { %1263 = vrot.lane.b32.xlu1 %v1162_v39, %s2838_s28  ;;  %v1181_v39 = vor.u32 %v1180_v24, %v1176_v23 }
  0x99   : > { %1598 = vrot.lane.b32.xlu0 %v1338_v50, %s2841_s4 }
  0x9a   : > { %v1363_v17 = vpop.permute.xlu1 %1362  ;;  %v1186_v57 = vsel %vm1054_vm15, %v1181_v39, %v1185_v41 }
  0x9b   : > { %v1248_v20 = vpop.permute.xlu0 %1247 }
  0x9c   : > { %1265 = vrot.lane.b32.xlu1 %v3161_v2, %s2838_s28  ;;  %v1620_v22 = vsel %vm1618_vm1, %v2945_v47, %v1248_v20  ;;  %v250_v47 = vld [vmem:[%s2886_s19 + $0xb0] sm:$0xff] }
  0x9d   : > { %1600 = vrot.lane.b32.xlu0 %v3183_v18, %s2841_s4  ;;  %v1653_v34 = vsel %vm1651_vm2, %v1620_v22, %v1361_v7  ;;  %v279_v53 = vpack.c.bf16 %v251_v37, %v250_v47  ;;  %v1188_v7 = vshrl.u32 %v3207_v43, 16  ;;  %v1345_v37 = vrot.slane %v3207_v43, 1 }
  0x9e   : > { %v1476_v26 = vpop.permute.xlu1 %1475  ;;  %v1686_v48 = vsel %vm1684_vm3, %v1653_v34, %v1394_v62 }
  0x9f   : > { %v1250_v29 = vpop.permute.xlu0 %1249  ;;  %v370_v63 = vshrl.u32 %v279_v53, 16  ;;  %v373_v14 = vshll.u32 %v279_v53, 16  ;;  %v1193_v20 = vor.u32 %v1192_v8, %v1188_v7 }
  0xa0   : > { %v1622_v35 = vsel %vm1618_vm1, %v2937_v44, %v1250_v29  ;;  %1378 = vrot.lane.b32.xlu1 %v3183_v18, %s2836_s24 }
  0xa1   : > { %v1655_v38 = vsel %vm1651_vm2, %v1622_v35, %v1363_v17  ;;  %1376 = vrot.lane.b32.xlu0 %v1338_v50, %s2836_s24  ;;  %v372_v13 = vrot.slane %v370_v63, 7  ;;  %v252_v17 = vld [vmem:[%s2886_s19 + $0xc0] sm:$0xff]  ;;  %v255_v63 = vld [vmem:[%s2886_s19 + $0xd8] sm:$0xff] }
  0xa2   : > { %v1440_v42 = vpop.permute.xlu1 %1439  ;;  %v1688_v44 = vsel %vm1684_vm3, %v1655_v38, %v1396_v61  ;;  %v1041_v61 = vsel %vm2910_vm13, %v479_v51, 0  ;;  %v280_v25 = vpack.c.bf16 %v253_v19, %v252_v17 }
  0xa3   : > { %v1438_v49 = vpop.permute.xlu0 %1437  ;;  %v1721_v59 = vsel %vm1717_vm4, %v1688_v44, %v1440_v42  ;;  %v1195_v9 = vshll.u32 %v1041_v61, 16  ;;  %v1346_v38 = vrot.slane %v1041_v61, 1  ;;  %v480_v42 = vsel %vm2896_vm10, %v372_v13, 0 }
  0xa4   : > { %v1719_v50 = vsel %vm1717_vm4, %v1686_v48, %v1438_v49  ;;  %1411 = vrot.lane.b32.xlu1 %v3175_v10, %s2834_s20  ;;  %v1754_v6 = vsel %vm1750_vm5, %v1721_v59, %v1476_v26  ;;  %v377_v35 = vshrl.u32 %v280_v25, 16  ;;  %v380_v48 = vshll.u32 %v280_v25, 16 }
  0xa5   : > { %v1752_v56 = vsel %vm1750_vm5, %v1719_v50, %v1474_v11  ;;  %1409 = vrot.lane.b32.xlu0 %v3135_v36, %s2834_s20  ;;  %v1787_v16 = vsel %vm1783_vm6, %v1754_v6, %v3163_v3  ;;  %v1197_v21 = vrot.slane %v1195_v9, 1  ;;  %v375_v3 = vor.u32 %v373_v14, %v372_v13 }
  0xa6   : > { %v1553_v60 = vpop.permute.xlu1 %1552  ;;  %v1785_v1 = vsel %vm1783_vm6, %v1752_v56, %v3165_v4  ;;  %v379_v44 = vrot.slane %v377_v35, 7  ;;  %v1347_v53 = vsel %vm1311_vm14, %v1345_v37, %v1346_v38  ;;  %v1043_v50 = vsel %vm2910_vm13, %v480_v42, 0 }
  0xa7   : > { %v1551_v62 = vpop.permute.xlu0 %1550  ;;  %v1820_v23 = vsel %vm1816_vm8, %v1787_v16, %v1553_v60  ;;  %v462_v34 = vsel %vm2896_vm10, 0, %v375_v3  ;;  %v1207_v58 = vshll.u32 %v1043_v50, 16  ;;  %v1349_v14 = vrot.slane %v1043_v50, 1 }
  0xa8   : > { %1455 = vrot.lane.b32.xlu1 %v1186_v57, %s2839_s29  ;;  %v1818_v4 = vsel %vm1816_vm8, %v1785_v1, %v1551_v62  ;;  %v3267_v39 = vsel %vm2906_vm12, %v462_v34, 0  ;;  %v382_v55 = vor.u32 %v380_v48, %v379_v44  ;;  %v254_v62 = vld [vmem:[%s2886_s19 + $0xd0] sm:$0xff]  ;;  %v481_v9 = vsel %vm2896_vm10, %v379_v44, 0 }
  0xa9   : > { %1453 = vrot.lane.b32.xlu0 %v3161_v2, %s2839_s29  ;;  %v1202_v49 = vshll.u32 %v3267_v39, 16  ;;  %v1200_v56 = vshrl.u32 %v3267_v39, 16  ;;  %v1209_v6 = vrot.slane %v1207_v58, 1  ;;  %v1348_v13 = vrot.slane %v3267_v39, 1 }
  0xaa   : > { %v3235_v11 = vpop.permute.xlu1 %1251  ;;  %v463_v61 = vsel %vm2896_vm10, 0, %v382_v55 }
  0xab   : > { %v1587_v12 = vpop.permute.xlu0 %1586  ;;  %v3290_v8 = vsel %vm2906_vm12, %v463_v61, 0 }
  0xac   : > { %1491 = vrot.lane.b32.xlu1 %v3229_v5, %s2837_s25  ;;  %v1851_v2 = vsel %vm1849_vm9, %v1818_v4, %v1587_v12  ;;  %v281_v12 = vpack.c.bf16 %v255_v63, %v254_v62  ;;  %v1214_v17 = vshll.u32 %v3290_v8, 16 }
  0xad   : > { %1489 = vrot.lane.b32.xlu0 %v3183_v18, %s2837_s25  ;;  %2729 = vmatprep.mubr.msk.bf16.mxu0 %vm1902_vm0, %v1851_v2  ;;  %v1198_v18 = vsel %vm1054_vm15, %v1193_v20, %v1197_v21  ;;  %v3305_v2 = vsel %vm2910_vm13, %v481_v9, 0 }
  0xae   : > { %v3248_v22 = vpop.permute.xlu1 %1253  ;;  %v1219_v3 = vshll.u32 %v3305_v2, 16  ;;  %v1216_v34 = vrot.slane %v1214_v17, 1  ;;  %v387_v44 = vshll.u32 %v281_v12, 16  ;;  %v1352_v9 = vrot.slane %v3305_v2, 1 }
  0xaf   : > { %v1589_v24 = vpop.permute.xlu0 %1588  ;;  %v1626_v25 = vsel %vm1618_vm1, %v2941_v45, %v3248_v22 }
  0xb0   : > { %v1853_v26 = vsel %vm1849_vm9, %v1820_v23, %v1589_v24  ;;  %1524 = vrot.lane.b32.xlu1 %v3207_v43, %s2835_s21  ;;  %v384_v24 = vshrl.u32 %v281_v12, 16 }
  0xb1   : > { %1522 = vrot.lane.b32.xlu0 %v3175_v10, %s2835_s21  ;;  %2730 = vmatmul.mubr.msk.bf16.vlgmr.msra.gmra.mrb[0].mxu0 %vm1902_vm0, %v1853_v26 }
  0xb2   : > { %v3258_v29 = vpop.permute.xlu1 %1366  ;;  %v386_v42 = vrot.slane %v384_v24, 7 }
  0xb3   : > { %v1365_v31 = vpop.permute.xlu0 %1364  ;;  %v1659_v35 = vsel %vm1651_vm2, %v1626_v25, %v3258_v29  ;;  %v257_v29 = vld [vmem:[%s2886_s19 + $0xe8] sm:$0xff] }
  0xb4   : > { %1568 = vrot.lane.b32.xlu1 %v1198_v18, %s2840_s30  ;;  %v389_v58 = vor.u32 %v387_v44, %v386_v42 }
  0xb5   : > { %1566 = vrot.lane.b32.xlu0 %v1186_v57, %s2840_s30 }
  0xb6   : > { %v1400_v47 = vpop.permute.xlu1 %1399  ;;  %v464_v63 = vsel %vm2896_vm10, 0, %v389_v58 }
  0xb7   : > { %v1398_v41 = vpop.permute.xlu0 %1397 }
  0xb8   : > { %1267 = vrot.lane.b32.xlu1 %v1186_v57, %s2838_s28  ;;  %v1204_v57 = vrot.slane %v1202_v49, 1  ;;  %v256_v49 = vld [vmem:[%s2886_s19 + $0xe0] sm:$0xff] }
  0xb9   : > { %1602 = vrot.lane.b32.xlu0 %v3229_v5, %s2841_s4 }
  0xba   : > { %v1444_v51 = vpop.permute.xlu1 %1443  ;;  %v1205_v1 = vor.u32 %v1204_v57, %v1200_v56 }
  0xbb   : > { %v1442_v54 = vpop.permute.xlu0 %1441 }
  0xbc   : > { %1269 = vrot.lane.b32.xlu1 %v1198_v18, %s2838_s28  ;;  %v1210_v16 = vsel %vm1054_vm15, %v1205_v1, %v1209_v6 }
  0xbd   : > { %1604 = vrot.lane.b32.xlu0 %v1347_v53, %s2841_s4 }
  0xbe   : > { %v1480_v59 = vpop.permute.xlu1 %1479 }
  0xbf   : > { %v1478_v60 = vpop.permute.xlu0 %1477 }
  0xc0   : > { %1382 = vrot.lane.b32.xlu1 %v1347_v53, %s2836_s24 }
  0xc1   : > { %1380 = vrot.lane.b32.xlu0 %v3229_v5, %s2836_s24  ;;  %v1624_v5 = vsel %vm1618_vm1, %v2925_v40, %v3235_v11  ;;  %v3313_v11 = vsel %vm1311_vm14, %v1348_v13, %v1349_v14  ;;  %v482_v13 = vsel %vm2896_vm10, %v386_v42, 0 }
  0xc2   : > { %v1513_v7 = vpop.permute.xlu1 %1512  ;;  %v1657_v19 = vsel %vm1651_vm2, %v1624_v5, %v1365_v31  ;;  %v1212_v31 = vshrl.u32 %v3290_v8, 16 }
  0xc3   : > { %v1511_v4 = vpop.permute.xlu0 %1510  ;;  %v1690_v21 = vsel %vm1684_vm3, %v1657_v19, %v1398_v41  ;;  %v1692_v41 = vsel %vm1684_vm3, %v1659_v35, %v1400_v47 }
  0xc4   : > { %1415 = vrot.lane.b32.xlu1 %v3267_v39, %s2834_s20  ;;  %v1723_v40 = vsel %vm1717_vm4, %v1690_v21, %v1442_v54  ;;  %v1725_v48 = vsel %vm1717_vm4, %v1692_v41, %v1444_v51  ;;  %v1217_v47 = vor.u32 %v1216_v34, %v1212_v31  ;;  %v1221_v54 = vrot.slane %v1219_v3, 1  ;;  %v258_v31 = vld [vmem:[%s2886_s19 + $0xf0] sm:$0xff]  ;;  %v259_v34 = vld [vmem:[%s2886_s19 + $0xf8] sm:$0xff] }
  0xc5   : > { %1413 = vrot.lane.b32.xlu0 %v3207_v43, %s2834_s20  ;;  %v1756_v26 = vsel %vm1750_vm5, %v1723_v40, %v1478_v60  ;;  %v1758_v50 = vsel %vm1750_vm5, %v1725_v48, %v1480_v59  ;;  %v282_v60 = vpack.c.bf16 %v257_v29, %v256_v49  ;;  %v283_v44 = vpack.c.bf16 %v259_v34, %v258_v31 }
  0xc6   : > { %v1557_v20 = vpop.permute.xlu1 %1556  ;;  %v1789_v37 = vsel %vm1783_vm6, %v1756_v26, %v1511_v4  ;;  %v1791_v55 = vsel %vm1783_vm6, %v1758_v50, %v1513_v7  ;;  %v1351_v7 = vrot.slane %v3290_v8, 1  ;;  %v3359_v4 = vsel %vm2906_vm12, %v464_v63, 0 }
  0xc7   : > { %v1555_v23 = vpop.permute.xlu0 %1554  ;;  %v1824_v51 = vsel %vm1816_vm8, %v1791_v55, %v1557_v20  ;;  %v391_v1 = vshrl.u32 %v282_v60, 16  ;;  %v394_v5 = vshll.u32 %v282_v60, 16  ;;  %v1226_v17 = vshll.u32 %v3359_v4, 16 }
  0xc8   : > { %1459 = vrot.lane.b32.xlu1 %v1210_v16, %s2839_s29  ;;  %v1822_v45 = vsel %vm1816_vm8, %v1789_v37, %v1555_v23  ;;  %v1353_v19 = vsel %vm1311_vm14, %v1351_v7, %v1352_v9  ;;  %v1047_v20 = vsel %vm2910_vm13, %v482_v13, 0  ;;  %v1354_v48 = vrot.slane %v3359_v4, 1 }
  0xc9   : > { %1457 = vrot.lane.b32.xlu0 %v1198_v18, %s2839_s29  ;;  %v393_v14 = vrot.slane %v391_v1, 7  ;;  %v1228_v24 = vrot.slane %v1226_v17, 1  ;;  %v1231_v40 = vshll.u32 %v1047_v20, 16  ;;  %v401_v17 = vshll.u32 %v283_v44, 16 }
  0xca   : > { %v3325_v38 = vpop.permute.xlu1 %1255 }
  0xcb   : > { %v1591_v22 = vpop.permute.xlu0 %1590  ;;  %v396_v23 = vor.u32 %v394_v5, %v393_v14  ;;  %v1233_v37 = vrot.slane %v1231_v40, 1  ;;  %v483_v42 = vsel %vm2896_vm10, %v393_v14, 0 }
  0xcc   : > { %v1855_v18 = vsel %vm1849_vm9, %v1822_v45, %v1591_v22  ;;  %1495 = vrot.lane.b32.xlu1 %v3313_v11, %s2837_s25 }
  0xcd   : > { %1493 = vrot.lane.b32.xlu0 %v1347_v53, %s2837_s25  ;;  %2733 = vmatprep.mubr.msk.bf16.mxu0 %vm1902_vm0, %v1855_v18  ;;  %v1222_v53 = vsel %vm1054_vm15, %v1217_v47, %v1221_v54  ;;  %v465_v26 = vsel %vm2896_vm10, 0, %v396_v23  ;;  %v1355_v18 = vrot.slane %v1047_v20, 1  ;;  %v1049_v54 = vsel %vm2910_vm13, %v483_v42, 0 }
  0xce   : > { %v3339_v56 = vpop.permute.xlu1 %1257  ;;  %v3382_v45 = vsel %vm2906_vm12, %v465_v26, 0  ;;  %v1243_v63 = vshll.u32 %v1049_v54, 16  ;;  %v1358_v34 = vrot.slane %v1049_v54, 1 }
  0xcf   : > { %v1593_v57 = vpop.permute.xlu0 %1592  ;;  %v1238_v29 = vshll.u32 %v3382_v45, 16  ;;  %v1630_v60 = vsel %vm1618_vm1, %v3027_v0, %v3339_v56  ;;  %v1357_v31 = vrot.slane %v3382_v45, 1 }
  0xd0   : > { %v1857_v61 = vsel %vm1849_vm9, %v1824_v51, %v1593_v57  ;;  %1528 = vrot.lane.b32.xlu1 %v3290_v8, %s2835_s21  ;;  %v398_v57 = vshrl.u32 %v283_v44, 16  ;;  %v1245_v20 = vrot.slane %v1243_v63, 1 }
  0xd1   : > { %1526 = vrot.lane.b32.xlu0 %v3267_v39, %s2835_s21  ;;  %2734 = vmatmul.mubr.msk.bf16.gmra.mrb[4].mxu0 %vm1902_vm0, %v1857_v61  ;;  %v1359_v44 = vsel %vm1311_vm14, %v1357_v31, %v1358_v34 }
  0xd2   : > { %v3349_v59 = vpop.permute.xlu1 %1370  ;;  %v400_v5 = vrot.slane %v398_v57, 7 }
  0xd3   : > { %v1369_v62 = vpop.permute.xlu0 %1368  ;;  %v1663_v1 = vsel %vm1651_vm2, %v1630_v60, %v3349_v59 }
  0xd4   : > { %1572 = vrot.lane.b32.xlu1 %v1222_v53, %s2840_s30 }
  0xd5   : > { %1570 = vrot.lane.b32.xlu0 %v1210_v16, %s2840_s30 }
  0xd6   : > { %v1404_v6 = vpop.permute.xlu1 %1403 }
  0xd7   : > { %v1402_v12 = vpop.permute.xlu0 %1401 }
  0xd8   : > { %1271 = vrot.lane.b32.xlu1 %v1210_v16, %s2838_s28  ;;  %v1224_v16 = vshrl.u32 %v3359_v4, 16 }
  0xd9   : > { %1606 = vrot.lane.b32.xlu0 %v3313_v11, %s2841_s4 }
  0xda   : > { %v1448_v2 = vpop.permute.xlu1 %1447  ;;  %v1229_v35 = vor.u32 %v1228_v24, %v1224_v16  ;;  %v403_v24 = vor.u32 %v401_v17, %v400_v5 }
  0xdb   : > { %v1446_v21 = vpop.permute.xlu0 %1445 }
  0xdc   : > { %1273 = vrot.lane.b32.xlu1 %v1222_v53, %s2838_s28  ;;  %v1234_v49 = vsel %vm1054_vm15, %v1229_v35, %v1233_v37 }
  0xdd   : > { %1608 = vrot.lane.b32.xlu0 %v1353_v19, %s2841_s4 }
  0xde   : > { %v1484_v3 = vpop.permute.xlu1 %1483 }
  0xdf   : > { %v1482_v25 = vpop.permute.xlu0 %1481 }
  0xe0   : > { %1386 = vrot.lane.b32.xlu1 %v1353_v19, %s2836_s24 }
  0xe1   : > { %1384 = vrot.lane.b32.xlu0 %v3313_v11, %s2836_s24  ;;  %v1628_v11 = vsel %vm1618_vm1, %v3003_v46, %v3325_v38  ;;  %v1356_v46 = vsel %vm1311_vm14, %v1354_v48, %v1355_v18  ;;  %v1236_v38 = vshrl.u32 %v3382_v45, 16 }
  0xe2   : > { %v1517_v41 = vpop.permute.xlu1 %1516  ;;  %v1661_v50 = vsel %vm1651_vm2, %v1628_v11, %v1369_v62  ;;  %v1240_v62 = vrot.slane %v1238_v29, 1 }
  0xe3   : > { %v1515_v22 = vpop.permute.xlu0 %1514  ;;  %v1694_v55 = vsel %vm1684_vm3, %v1661_v50, %v1402_v12  ;;  %v1696_v12 = vsel %vm1684_vm3, %v1663_v1, %v1404_v6 }
  0xe4   : > { %1419 = vrot.lane.b32.xlu1 %v3359_v4, %s2834_s20  ;;  %v1727_v58 = vsel %vm1717_vm4, %v1694_v55, %v1446_v21  ;;  %v1729_v0 = vsel %vm1717_vm4, %v1696_v12, %v1448_v2  ;;  %v1241_v59 = vor.u32 %v1240_v62, %v1236_v38 }
  0xe5   : > { %1417 = vrot.lane.b32.xlu0 %v3290_v8, %s2834_s20  ;;  %v1760_v61 = vsel %vm1750_vm5, %v1727_v58, %v1482_v25  ;;  %v466_v25 = vsel %vm2896_vm10, 0, %v403_v24 }
  0xe6   : > { %v1561_v47 = vpop.permute.xlu1 %1560  ;;  %v1793_v7 = vsel %vm1783_vm6, %v1760_v61, %v1515_v22  ;;  %v3436_v35 = vsel %vm2906_vm12, %v466_v25, 0  ;;  %v1052_v33 = vsel %vm2902_vm11, %v466_v25, 0 }
  0xe7   : > { %v1559_v51 = vpop.permute.xlu0 %1558  ;;  %v1428_v22 = vshll.u32 %v3436_v35, 16  ;;  %v1426_v27 = vshrl.u32 %v3436_v35, 16  ;;  %v1541_v38 = vshll.u32 %v1052_v33, 16 }
  0xe8   : > { %1463 = vrot.lane.b32.xlu1 %v1234_v49, %s2839_s29  ;;  %v1826_v13 = vsel %vm1816_vm8, %v1793_v7, %v1559_v51  ;;  %v1470_v51 = vrot.slane %v3436_v35, 1 }
  0xe9   : > { %1461 = vrot.lane.b32.xlu0 %v1222_v53, %s2839_s29  ;;  %v1762_v53 = vsel %vm1750_vm5, %v1729_v0, %v1484_v3  ;;  %v1430_v32 = vrot.slane %v1428_v22, 1 }
  0xea   : > { %v1260_v9 = vpop.permute.xlu1 %1259  ;;  %v1795_v6 = vsel %vm1783_vm6, %v1762_v53, %v1517_v41  ;;  %v484_v41 = vsel %vm2896_vm10, %v400_v5, 0  ;;  %vm2228_vm10 = vcmask 27648  }
  0xeb   : > { %v1595_v14 = vpop.permute.xlu0 %1594  ;;  %v1828_v23 = vsel %vm1816_vm8, %v1795_v6, %v1561_v47  ;;  %v1051_v48 = vsel %vm2910_vm13, %v484_v41, 0  ;;  %v1431_v50 = vor.u32 %v1430_v32, %v1426_v27  ;;  %v1632_v58 = vsel %vm1618_vm1, %v3060_v28, %v1260_v9 }
  0xec   : > { %v1859_v56 = vsel %vm1849_vm9, %v1826_v13, %v1595_v14  ;;  %1499 = vrot.lane.b32.xlu1 %v1356_v46, %s2837_s25  ;;  %v1433_v11 = vshll.u32 %v1051_v48, 16  ;;  %v1471_v57 = vrot.slane %v1051_v48, 1  ;;  %v1053_v62 = vsel %vm2902_vm11, %v484_v41, 0 }
  0xed   : > { %1497 = vrot.lane.b32.xlu0 %v1353_v19, %s2837_s25  ;;  %2737 = vmatprep.mubr.msk.bf16.mxu0 %vm1902_vm0, %v1859_v56  ;;  %v1246_v19 = vsel %vm1054_vm15, %v1241_v59, %v1245_v20  ;;  %v1539_v9 = vshrl.u32 %v1052_v33, 16  ;;  %v1543_v14 = vrot.slane %v1541_v38, 1  ;;  %v1546_v30 = vshll.u32 %v1053_v62, 16 }
  0xee   : > { %v1262_v21 = vpop.permute.xlu1 %1261  ;;  %v1435_v47 = vrot.slane %v1433_v11, 1  ;;  %v1472_v28 = vsel %vm1311_vm14, %v1470_v51, %v1471_v57  ;;  %vm2433_vm11 = vcmask 25600  }
  0xef   : > { %v1597_v16 = vpop.permute.xlu0 %1596  ;;  %v1634_v12 = vsel %vm1618_vm1, %v3081_v52, %v1262_v21  ;;  %v1544_v21 = vor.u32 %v1543_v14, %v1539_v9 }
  0xf0   : > { %v1861_v2 = vsel %vm1849_vm9, %v1828_v23, %v1597_v16  ;;  %1532 = vrot.lane.b32.xlu1 %v3382_v45, %s2835_s21  ;;  %v1548_v23 = vrot.slane %v1546_v30, 1 }
  0xf1   : > { %1530 = vrot.lane.b32.xlu0 %v3359_v4, %s2835_s21  ;;  %2738 = vmatmul.mubr.msk.bf16.gmra.mrb[8].mxu0 %vm1902_vm0, %v1861_v2 }
  0xf2   : > { %v1375_v40 = vpop.permute.xlu1 %1374  ;;  %v1549_v25 = vsel %vm1054_vm15, %v1544_v21, %v1548_v23 }
  0xf3   : > { %v1373_v3 = vpop.permute.xlu0 %1372  ;;  %v1667_v5 = vsel %vm1651_vm2, %v1634_v12, %v1375_v40 }
  0xf4   : > { %1576 = vrot.lane.b32.xlu1 %v1246_v19, %s2840_s30  ;;  %v1665_v60 = vsel %vm1651_vm2, %v1632_v58, %v1373_v3  ;;  %v1583_v3 = vrot.slane %v1052_v33, 1 }
  0xf5   : > { %1574 = vrot.lane.b32.xlu0 %v1234_v49, %s2840_s30 }
  0xf6   : > { %v1408_v26 = vpop.permute.xlu1 %1407 }
  0xf7   : > { %v1406_v37 = vpop.permute.xlu0 %1405  ;;  %v1700_v56 = vsel %vm1684_vm3, %v1667_v5, %v1408_v26  ;;  %v1584_v26 = vrot.slane %v1053_v62, 1 }
  0xf8   : > { %1275 = vrot.lane.b32.xlu1 %v1234_v49, %s2838_s28  ;;  %v1698_v63 = vsel %vm1684_vm3, %v1665_v60, %v1406_v37 }
  0xf9   : > { %1610 = vrot.lane.b32.xlu0 %v1356_v46, %s2841_s4  ;;  %v1585_v37 = vsel %vm1311_vm14, %v1583_v3, %v1584_v26 }
  0xfa   : > { %v1452_v42 = vpop.permute.xlu1 %1451 }
  0xfb   : > { %v1450_v18 = vpop.permute.xlu0 %1449  ;;  %v1733_v20 = vsel %vm1717_vm4, %v1700_v56, %v1452_v42 }
  0xfc   : > { %1277 = vrot.lane.b32.xlu1 %v1246_v19, %s2838_s28  ;;  %v1731_v7 = vsel %vm1717_vm4, %v1698_v63, %v1450_v18 }
  0xfd   : > { %1612 = vrot.lane.b32.xlu0 %v1359_v44, %s2841_s4 }
  0xfe   : > { %v1488_v49 = vpop.permute.xlu1 %1487 }
  0xff   : > { %v1486_v29 = vpop.permute.xlu0 %1485  ;;  %v1766_v6 = vsel %vm1750_vm5, %v1733_v20, %v1488_v49 }
 0x100   : > { %1390 = vrot.lane.b32.xlu1 %v1359_v44, %s2836_s24  ;;  %v1764_v13 = vsel %vm1750_vm5, %v1731_v7, %v1486_v29 }
 0x101   : > { %1388 = vrot.lane.b32.xlu0 %v1356_v46, %s2836_s24  ;;  %v1436_v46 = vsel %vm1054_vm15, %v1431_v50, %v1435_v47 }
 0x102   : > { %v1521_v54 = vpop.permute.xlu1 %1520 }
 0x103   : > { %v1519_v55 = vpop.permute.xlu0 %1518  ;;  %v1799_v16 = vsel %vm1783_vm6, %v1766_v6, %v1521_v54 }
 0x104   : > { %1423 = vrot.lane.b32.xlu1 %v3436_v35, %s2834_s20  ;;  %v1797_v17 = vsel %vm1783_vm6, %v1764_v13, %v1519_v55 }
 0x105   : > { %1421 = vrot.lane.b32.xlu0 %v3382_v45, %s2834_s20 }
 0x106   : > { %v1565_v61 = vpop.permute.xlu1 %1564 }
 0x107   : > { %v1563_v1 = vpop.permute.xlu0 %1562  ;;  %v1832_v2 = vsel %vm1816_vm8, %v1799_v16, %v1565_v61 }
 0x108   : > { %1467 = vrot.lane.b32.xlu1 %v1436_v46, %s2839_s29  ;;  %v1830_v53 = vsel %vm1816_vm8, %v1797_v17, %v1563_v1 }
 0x109   : > { %1465 = vrot.lane.b32.xlu0 %v1246_v19, %s2839_s29 }
 0x10a   : > { %v1264_v0 = vpop.permute.xlu1 %1263 }
 0x10b   : > { %v1599_v59 = vpop.permute.xlu0 %1598  ;;  %v1636_v32 = vsel %vm1618_vm1, %v3114_v15, %v1264_v0 }
 0x10c   : > { %v1863_v52 = vsel %vm1849_vm9, %v1830_v53, %v1599_v59  ;;  %1503 = vrot.lane.b32.xlu1 %v1472_v28, %s2837_s25 }
 0x10d   : > { %1501 = vrot.lane.b32.xlu0 %v1359_v44, %s2837_s25  ;;  %2741 = vmatprep.mubr.msk.bf16.mxu0 %vm1902_vm0, %v1863_v52 }
 0x10e   : > { %v1266_v24 = vpop.permute.xlu1 %1265 }
 0x10f   : > { %v1601_v19 = vpop.permute.xlu0 %1600  ;;  %v1638_v54 = vsel %vm1618_vm1, %v3135_v36, %v1266_v24 }
 0x110   : > { %v1865_v40 = vsel %vm1849_vm9, %v1832_v2, %v1601_v19  ;;  %1536 = vrot.lane.b32.xlu1 %v1052_v33, %s2835_s21 }
 0x111   : > { %1534 = vrot.lane.b32.xlu0 %v3436_v35, %s2835_s21  ;;  %2742 = vmatmul.mubr.msk.bf16.gmra.mrb[12].mxu0 %vm1902_vm0, %v1865_v40 }
 0x112   : > { %v1379_v31 = vpop.permute.xlu1 %1378 }
 0x113   : > { %v1377_v34 = vpop.permute.xlu0 %1376  ;;  %v1671_v55 = vsel %vm1651_vm2, %v1638_v54, %v1379_v31 }
 0x114   : > { %1580 = vrot.lane.b32.xlu1 %v1549_v25, %s2840_s30  ;;  %v1669_v11 = vsel %vm1651_vm2, %v1636_v32, %v1377_v34 }
 0x115   : > { %1578 = vrot.lane.b32.xlu0 %v1436_v46, %s2840_s30 }
 0x116   : > { %v1412_v41 = vpop.permute.xlu1 %1411 }
 0x117   : > { %v1410_v22 = vpop.permute.xlu0 %1409  ;;  %v1704_v15 = vsel %vm1684_vm3, %v1671_v55, %v1412_v41 }
 0x118   : > { %1616 = vrot.lane.b32.xlu1 %v1585_v37, %s2841_s4  ;;  %v1702_v29 = vsel %vm1684_vm3, %v1669_v11, %v1410_v22 }
 0x119   : > { %1614 = vrot.lane.b32.xlu0 %v1472_v28, %s2841_s4 }
 0x11a   : > { %v1456_v35 = vpop.permute.xlu1 %1455 }
 0x11b   : > { %v1454_v42 = vpop.permute.xlu0 %1453  ;;  %v1737_v38 = vsel %vm1717_vm4, %v1704_v15, %v1456_v35 }
 0x11c   : > { %v1735_v47 = vsel %vm1717_vm4, %v1702_v29, %v1454_v42 }
 0x11e   : > { %v1492_v44 = vpop.permute.xlu1 %1491 }
 0x11f   : > { %v1490_v48 = vpop.permute.xlu0 %1489  ;;  %v1770_v61 = vsel %vm1750_vm5, %v1737_v38, %v1492_v44 }
 0x120   : > { %v1768_v33 = vsel %vm1750_vm5, %v1735_v47, %v1490_v48 }
 0x122   : > { %v1525_v18 = vpop.permute.xlu1 %1524 }
 0x123   : > { %v1523_v27 = vpop.permute.xlu0 %1522  ;;  %v1803_v36 = vsel %vm1783_vm6, %v1770_v61, %v1525_v18 }
 0x124   : > { %v1801_v51 = vsel %vm1783_vm6, %v1768_v33, %v1523_v27 }
 0x126   : > { %v1569_v49 = vpop.permute.xlu1 %1568 }
 0x127   : > { %v1567_v50 = vpop.permute.xlu0 %1566  ;;  %v1836_v63 = vsel %vm1816_vm8, %v1803_v36, %v1569_v49 }
 0x128   : > { %v1834_v58 = vsel %vm1816_vm8, %v1801_v51, %v1567_v50 }
 0x12a   : > { %v1268_v57 = vpop.permute.xlu1 %1267 }
 0x12b   : > { %v1603_v46 = vpop.permute.xlu0 %1602  ;;  %v1640_v53 = vsel %vm1618_vm1, %v3175_v10, %v1268_v57 }
 0x12c   : > { %v1867_v60 = vsel %vm1849_vm9, %v1834_v58, %v1603_v46 }
 0x12d   : > { %2745 = vmatprep.mubr.msk.bf16.mxu1 %vm1902_vm0, %v1867_v60 }
 0x12e   : > { %v1270_v62 = vpop.permute.xlu1 %1269 }
 0x12f   : > { %v1605_v1 = vpop.permute.xlu0 %1604  ;;  %v1642_v23 = vsel %vm1618_vm1, %v3207_v43, %v1270_v62 }
 0x130   : > { %v1869_v7 = vsel %vm1849_vm9, %v1836_v63, %v1605_v1 }
 0x131   : > { %2746 = vmatmul.mubr.msk.bf16.vlgmr.msra.gmra.mrb[0].mxu1 %vm1902_vm0, %v1869_v7 }
 0x132   : > { %v1383_v28 = vpop.permute.xlu1 %1382 }
 0x133   : > { %v1381_v9 = vpop.permute.xlu0 %1380  ;;  %v1675_v24 = vsel %vm1651_vm2, %v1642_v23, %v1383_v28 }
 0x134   : > { %v1673_v59 = vsel %vm1651_vm2, %v1640_v53, %v1381_v9 }
 0x136   : > { %v1416_v12 = vpop.permute.xlu1 %1415 }
 0x137   : > { %v1414_v13 = vpop.permute.xlu0 %1413  ;;  %v1708_v10 = vsel %vm1684_vm3, %v1675_v24, %v1416_v12 }
 0x138   : > { %v1706_v52 = vsel %vm1684_vm3, %v1673_v59, %v1414_v13 }
 0x13a   : > { %v1460_v14 = vpop.permute.xlu1 %1459 }
 0x13b   : > { %v1458_v30 = vpop.permute.xlu0 %1457  ;;  %v1741_v25 = vsel %vm1717_vm4, %v1708_v10, %v1460_v14 }
 0x13c   : > { %v1739_v21 = vsel %vm1717_vm4, %v1706_v52, %v1458_v30 }
 0x13e   : > { %v1496_v5 = vpop.permute.xlu1 %1495 }
 0x13f   : > { %v1494_v17 = vpop.permute.xlu0 %1493  ;;  %v1774_v31 = vsel %vm1750_vm5, %v1741_v25, %v1496_v5 }
 0x140   : > { %v1772_v16 = vsel %vm1750_vm5, %v1739_v21, %v1494_v17 }
 0x142   : > { %v1529_v0 = vpop.permute.xlu1 %1528 }
 0x143   : > { %v1527_v56 = vpop.permute.xlu0 %1526  ;;  %v1807_v43 = vsel %vm1783_vm6, %v1774_v31, %v1529_v0 }
 0x144   : > { %v1805_v2 = vsel %vm1783_vm6, %v1772_v16, %v1527_v56 }
 0x146   : > { %v1573_v20 = vpop.permute.xlu1 %1572 }
 0x147   : > { %v1571_v6 = vpop.permute.xlu0 %1570  ;;  %v1840_v37 = vsel %vm1816_vm8, %v1807_v43, %v1573_v20 }
 0x148   : > { %v1838_v40 = vsel %vm1816_vm8, %v1805_v2, %v1571_v6 }
 0x14a   : > { %v1272_v19 = vpop.permute.xlu1 %1271 }
 0x14b   : > { %v1607_v3 = vpop.permute.xlu0 %1606  ;;  %v1644_v50 = vsel %vm1618_vm1, %v3267_v39, %v1272_v19 }
 0x14c   : > { %v1871_v26 = vsel %vm1849_vm9, %v1838_v40, %v1607_v3 }
 0x14d   : > { %2749 = vmatprep.mubr.msk.bf16.mxu1 %vm1902_vm0, %v1871_v26 }
 0x14e   : > { %v1274_v34 = vpop.permute.xlu1 %1273 }
 0x14f   : > { %v1609_v41 = vpop.permute.xlu0 %1608  ;;  %v1646_v57 = vsel %vm1618_vm1, %v3290_v8, %v1274_v34 }
 0x150   : > { %v1873_v22 = vsel %vm1849_vm9, %v1840_v37, %v1609_v41 }
 0x151   : > { %2750 = vmatmul.mubr.msk.bf16.gmra.mrb[4].mxu1 %vm1902_vm0, %v1873_v22 }
 0x152   : > { %v1387_v35 = vpop.permute.xlu1 %1386 }
 0x153   : > { %v1385_v42 = vpop.permute.xlu0 %1384  ;;  %v1679_v58 = vsel %vm1651_vm2, %v1646_v57, %v1387_v35 }
 0x154   : > { %v1677_v47 = vsel %vm1651_vm2, %v1644_v50, %v1385_v42 }
 0x156   : > { %v1420_v44 = vpop.permute.xlu1 %1419 }
 0x157   : > { %v1418_v48 = vpop.permute.xlu0 %1417  ;;  %v1712_v39 = vsel %vm1684_vm3, %v1679_v58, %v1420_v44 }
 0x158   : > { %v1710_v33 = vsel %vm1684_vm3, %v1677_v47, %v1418_v48 }
 0x15a   : > { %v1464_v18 = vpop.permute.xlu1 %1463 }
 0x15b   : > { %v1462_v27 = vpop.permute.xlu0 %1461  ;;  %v1745_v36 = vsel %vm1717_vm4, %v1712_v39, %v1464_v18 }
 0x15c   : > { %v1743_v51 = vsel %vm1717_vm4, %v1710_v33, %v1462_v27 }
 0x15e   : > { %v1500_v32 = vpop.permute.xlu1 %1499 }
 0x15f   : > { %v1498_v11 = vpop.permute.xlu0 %1497  ;;  %v1778_v63 = vsel %vm1750_vm5, %v1745_v36, %v1500_v32 }
 0x160   : > { %v1776_v15 = vsel %vm1750_vm5, %v1743_v51, %v1498_v11 }
 0x162   : > { %v1533_v49 = vpop.permute.xlu1 %1532 }
 0x163   : > { %v1531_v29 = vpop.permute.xlu0 %1530  ;;  %v1811_v8 = vsel %vm1783_vm6, %v1778_v63, %v1533_v49 }
 0x164   : > { %v1809_v46 = vsel %vm1783_vm6, %v1776_v15, %v1531_v29 }
 0x166   : > { %v1577_v54 = vpop.permute.xlu1 %1576 }
 0x167   : > { %v1575_v55 = vpop.permute.xlu0 %1574  ;;  %v1844_v7 = vsel %vm1816_vm8, %v1811_v8, %v1577_v54 }
 0x168   : > { %v1842_v60 = vsel %vm1816_vm8, %v1809_v46, %v1575_v55 }
 0x16a   : > { %v1276_v38 = vpop.permute.xlu1 %1275 }
 0x16b   : > { %v1611_v61 = vpop.permute.xlu0 %1610  ;;  %v1648_v59 = vsel %vm1618_vm1, %v3359_v4, %v1276_v38 }
 0x16c   : > { %v1875_v62 = vsel %vm1849_vm9, %v1842_v60, %v1611_v61 }
 0x16d   : > { %2753 = vmatprep.mubr.msk.bf16.mxu1 %vm1902_vm0, %v1875_v62 }
 0x16e   : > { %v1278_v1 = vpop.permute.xlu1 %1277 }
 0x16f   : > { %v1613_v28 = vpop.permute.xlu0 %1612  ;;  %v1650_v20 = vsel %vm1618_vm1, %v3382_v45, %v1278_v1 }
 0x170   : > { %v1877_v9 = vsel %vm1849_vm9, %v1844_v7, %v1613_v28 }
 0x171   : > { %2754 = vmatmul.mubr.msk.bf16.gmra.mrb[8].mxu1 %vm1902_vm0, %v1877_v9 }
 0x172   : > { %v1391_v12 = vpop.permute.xlu1 %1390 }
 0x173   : > { %v1389_v13 = vpop.permute.xlu0 %1388  ;;  %v1683_v6 = vsel %vm1651_vm2, %v1650_v20, %v1391_v12 }
 0x174   : > { %v1681_v21 = vsel %vm1651_vm2, %v1648_v59, %v1389_v13 }
 0x176   : > { %v1424_v14 = vpop.permute.xlu1 %1423 }
 0x177   : > { %v1422_v30 = vpop.permute.xlu0 %1421  ;;  %v1716_v16 = vsel %vm1684_vm3, %v1683_v6, %v1424_v14 }
 0x178   : > { %v1714_v4 = vsel %vm1684_vm3, %v1681_v21, %v1422_v30 }
 0x17a   : > { %v1468_v5 = vpop.permute.xlu1 %1467 }
 0x17b   : > { %v1466_v17 = vpop.permute.xlu0 %1465  ;;  %v1749_v2 = vsel %vm1717_vm4, %v1716_v16, %v1468_v5 }
 0x17c   : > { %v1747_v19 = vsel %vm1717_vm4, %v1714_v4, %v1466_v17 }
 0x17e   : > { %v1504_v0 = vpop.permute.xlu1 %1503 }
 0x17f   : > { %v1502_v56 = vpop.permute.xlu0 %1501  ;;  %v1782_v26 = vsel %vm1750_vm5, %v1749_v2, %v1504_v0 }
 0x180   : > { %v1780_v31 = vsel %vm1750_vm5, %v1747_v19, %v1502_v56 }
 0x182   : > { %v1537_v53 = vpop.permute.xlu1 %1536 }
 0x183   : > { %v1535_v52 = vpop.permute.xlu0 %1534  ;;  %v1815_v41 = vsel %vm1783_vm6, %v1782_v26, %v1537_v53 }
 0x184   : > { %v2731_v23 = vpop.f32.mrb[0].mxu0  ;;  %v1813_v44 = vsel %vm1783_vm6, %v1780_v31, %v1535_v52 }
 0x185   : > { %v2674_v24 = vpack.c.bf16 %v2731_v23, %v2731_v23  ;;  %v1973_v45 = vpop.f32.mrb[1].mxu0  ;;  %v2332_v48 = vmul.f32 %v2731_v23, %v2731_v23  ;;  %v2264_v32 = vsel %vm1618_vm1, %v2731_v23, 0.0 }
 0x186   : > { %v2672_v10 = vpack.c.bf16 %v1973_v45, %v1973_v45  ;;  %v2330_v40 = vmul.f32 %v1973_v45, %v1973_v45  ;;  %v2732_v3 = vpop.f32.mrb[2].mxu0  ;;  %v1581_v25 = vpop.permute.xlu1 %1580  ;;  %v2261_v22 = vsel %vm1618_vm1, %v1973_v45, 0.0 }
 0x187   : > { %2231 = vst.msk [vmem:[%s3565_s10 + $0x8] sm:$0xf] %vm2228_vm10, %v2674_v24  ;;  %v2675_v43 = vpack.c.bf16 %v2732_v3, %v2732_v3  ;;  %v1976_v34 = vpop.f32.mrb[3].mxu0  ;;  %v1579_v37 = vpop.permute.xlu0 %1578  ;;  %v2333_v49 = vmul.f32 %v2732_v3, %v2732_v3  ;;  %v1848_v29 = vsel %vm1816_vm8, %v1815_v41, %v1581_v25  ;;  %v2266_v57 = vsel %vm1618_vm1, %v2732_v3, 0.0 }
 0x188   : > { %2229 = vst.msk [vmem:[%s3565_s10] sm:$0xf] %vm2228_vm10, %v2672_v10  ;;  %v2673_v35 = vpack.c.bf16 %v1976_v34, %v1976_v34  ;;  %v2262_v42 = vsel %vm1618_vm1, %v1976_v34, 0.0  ;;  %v2331_v27 = vmul.f32 %v1976_v34, %v1976_v34  ;;  %v2362_v11 = vsel %vm1618_vm1, %v2330_v40, 0.0 }
 0x189   : > { %2232 = vst.msk [vmem:[%s3565_s10 + $0xc] sm:$0xf] %vm2228_vm10, %v2675_v43  ;;  %v2263_v18 = vadd.f32 %v2262_v42, %v2261_v22  ;;  %v1846_v33 = vsel %vm1816_vm8, %v1813_v44, %v1579_v37  ;;  %v2365_v46 = vsel %vm1618_vm1, %v2332_v48, 0.0  ;;  %v2367_v60 = vsel %vm1618_vm1, %v2333_v49, 0.0 }
 0x18a   : > { %2230 = vst.msk [vmem:[%s3565_s10 + $0x4] sm:$0xf] %vm2228_vm10, %v2673_v35  ;;  %v1617_v50 = vpop.permute.xlu1 %1616  ;;  %v2363_v54 = vsel %vm1618_vm1, %v2331_v27, 0.0 }
 0x18b   : > { %v2265_v47 = vadd.f32 %v2264_v32, %v2263_v18  ;;  %v1881_v55 = vsel %vm1849_vm9, %v1848_v29, %v1617_v50  ;;  %v1615_v51 = vpop.permute.xlu0 %1614  ;;  %v2364_v15 = vadd.f32 %v2363_v54, %v2362_v11 }
 0x18c   : > { %v1879_v58 = vsel %vm1849_vm9, %v1846_v33, %v1615_v51 }
 0x18d   : > { %2757 = vmatprep.mubr.msk.bf16.mxu1 %vm1902_vm0, %v1879_v58  ;;  %v2267_v38 = vadd.f32 %v2266_v57, %v2265_v47  ;;  %v2366_v39 = vadd.f32 %v2365_v46, %v2364_v15 }
 0x18e   : > { %2758 = vmatmul.mubr.msk.bf16.gmra.mrb[12].mxu1 %vm1902_vm0, %v1881_v55 }
 0x18f   : > { %v2368_v61 = vadd.f32 %v2367_v60, %v2366_v39 }
 0x1a4   : > { %v2735_v36 = vpop.f32.mrb[4].mxu0 }
 0x1a5   : > { %v2678_v62 = vpack.c.bf16 %v2735_v36, %v2735_v36  ;;  %v1989_v63 = vpop.f32.mrb[5].mxu0  ;;  %v2336_v17 = vmul.f32 %v2735_v36, %v2735_v36  ;;  %v2272_v59 = vsel %vm1618_vm1, %v2735_v36, 0.0 }
 0x1a6   : > { %v2676_v8 = vpack.c.bf16 %v1989_v63, %v1989_v63  ;;  %v2268_v1 = vsel %vm1618_vm1, %v1989_v63, 0.0  ;;  %v2334_v7 = vmul.f32 %v1989_v63, %v1989_v63  ;;  %v2736_v28 = vpop.f32.mrb[6].mxu0 }
 0x1a7   : > { %2235 = vst.msk [vmem:[%s3565_s10 + $0x18] sm:$0xf] %vm2228_vm10, %v2678_v62  ;;  %v2269_v9 = vadd.f32 %v2268_v1, %v2267_v38  ;;  %v2679_v12 = vpack.c.bf16 %v2736_v28, %v2736_v28  ;;  %v1992_v13 = vpop.f32.mrb[7].mxu0  ;;  %v2337_v20 = vmul.f32 %v2736_v28, %v2736_v28  ;;  %v2274_v21 = vsel %vm1618_vm1, %v2736_v28, 0.0 }
 0x1a8   : > { %2233 = vst.msk [vmem:[%s3565_s10 + $0x10] sm:$0xf] %vm2228_vm10, %v2676_v8  ;;  %v2369_v14 = vsel %vm1618_vm1, %v2334_v7, 0.0  ;;  %v2677_v30 = vpack.c.bf16 %v1992_v13, %v1992_v13  ;;  %v2270_v5 = vsel %vm1618_vm1, %v1992_v13, 0.0  ;;  %v2335_v53 = vmul.f32 %v1992_v13, %v1992_v13 }
 0x1a9   : > { %v2370_v0 = vadd.f32 %v2369_v14, %v2368_v61  ;;  %2236 = vst.msk [vmem:[%s3565_s10 + $0x1c] sm:$0xf] %vm2228_vm10, %v2679_v12  ;;  %v2271_v56 = vadd.f32 %v2270_v5, %v2269_v9  ;;  %v2373_v16 = vsel %vm1618_vm1, %v2336_v17, 0.0  ;;  %v2375_v45 = vsel %vm1618_vm1, %v2337_v20, 0.0 }
 0x1aa   : > { %2234 = vst.msk [vmem:[%s3565_s10 + $0x14] sm:$0xf] %vm2228_vm10, %v2677_v30  ;;  %v2371_v6 = vsel %vm1618_vm1, %v2335_v53, 0.0 }
 0x1ab   : > { %v2273_v52 = vadd.f32 %v2272_v59, %v2271_v56  ;;  %v2372_v23 = vadd.f32 %v2371_v6, %v2370_v0 }
 0x1ad   : > { %v2275_v4 = vadd.f32 %v2274_v21, %v2273_v52  ;;  %v2374_v24 = vadd.f32 %v2373_v16, %v2372_v23 }
 0x1af   : > { %v2376_v2 = vadd.f32 %v2375_v45, %v2374_v24 }
 0x1c4   : > { %v2739_v19 = vpop.f32.mrb[8].mxu0 }
 0x1c5   : > { %v2682_v10 = vpack.c.bf16 %v2739_v19, %v2739_v19  ;;  %v2005_v40 = vpop.f32.mrb[9].mxu0  ;;  %v2340_v42 = vmul.f32 %v2739_v19, %v2739_v19  ;;  %v2280_v27 = vsel %vm1618_vm1, %v2739_v19, 0.0 }
 0x1c6   : > { %v2680_v3 = vpack.c.bf16 %v2005_v40, %v2005_v40  ;;  %v2276_v25 = vsel %vm1618_vm1, %v2005_v40, 0.0  ;;  %v2338_v26 = vmul.f32 %v2005_v40, %v2005_v40  ;;  %v2740_v31 = vpop.f32.mrb[10].mxu0 }
 0x1c7   : > { %2239 = vst.msk [vmem:[%s3565_s10 + $0x28] sm:$0xf] %vm2228_vm10, %v2682_v10  ;;  %v2277_v43 = vadd.f32 %v2276_v25, %v2275_v4  ;;  %v2683_v34 = vpack.c.bf16 %v2740_v31, %v2740_v31  ;;  %v2008_v37 = vpop.f32.mrb[11].mxu0  ;;  %v2341_v32 = vmul.f32 %v2740_v31, %v2740_v31  ;;  %v2282_v29 = vsel %vm1618_vm1, %v2740_v31, 0.0 }
 0x1c8   : > { %2237 = vst.msk [vmem:[%s3565_s10 + $0x20] sm:$0xf] %vm2228_vm10, %v2680_v3  ;;  %v2377_v41 = vsel %vm1618_vm1, %v2338_v26, 0.0  ;;  %v2681_v22 = vpack.c.bf16 %v2008_v37, %v2008_v37  ;;  %v2278_v35 = vsel %vm1618_vm1, %v2008_v37, 0.0  ;;  %v2339_v18 = vmul.f32 %v2008_v37, %v2008_v37 }
 0x1c9   : > { %v2378_v44 = vadd.f32 %v2377_v41, %v2376_v2  ;;  %2240 = vst.msk [vmem:[%s3565_s10 + $0x2c] sm:$0xf] %vm2228_vm10, %v2683_v34  ;;  %v2279_v48 = vadd.f32 %v2278_v35, %v2277_v43  ;;  %v2381_v47 = vsel %vm1618_vm1, %v2340_v42, 0.0  ;;  %v2383_v55 = vsel %vm1618_vm1, %v2341_v32, 0.0 }
 0x1ca   : > { %2238 = vst.msk [vmem:[%s3565_s10 + $0x24] sm:$0xf] %vm2228_vm10, %v2681_v22  ;;  %v2379_v49 = vsel %vm1618_vm1, %v2339_v18, 0.0 }
 0x1cb   : > { %v2281_v11 = vadd.f32 %v2280_v27, %v2279_v48  ;;  %v2380_v50 = vadd.f32 %v2379_v49, %v2378_v44 }
 0x1cd   : > { %v2283_v54 = vadd.f32 %v2282_v29, %v2281_v11  ;;  %v2382_v33 = vadd.f32 %v2381_v47, %v2380_v50 }
 0x1cf   : > { %v2384_v51 = vadd.f32 %v2383_v55, %v2382_v33 }
 0x1e4   : > { %v2743_v57 = vpop.f32.mrb[12].mxu0 }
 0x1e5   : > { %v2686_v15 = vpack.c.bf16 %v2743_v57, %v2743_v57  ;;  %v2021_v58 = vpop.f32.mrb[13].mxu0  ;;  %v2344_v7 = vmul.f32 %v2743_v57, %v2743_v57  ;;  %v2288_v13 = vsel %vm1618_vm1, %v2743_v57, 0.0 }
 0x1e6   : > { %v2684_v46 = vpack.c.bf16 %v2021_v58, %v2021_v58  ;;  %v2284_v38 = vsel %vm1618_vm1, %v2021_v58, 0.0  ;;  %v2342_v39 = vmul.f32 %v2021_v58, %v2021_v58  ;;  %v2744_v60 = vpop.f32.mrb[14].mxu0 }
 0x1e7   : > { %2243 = vst.msk [vmem:[%s3565_s10 + $0x38] sm:$0xf] %vm2228_vm10, %v2686_v15  ;;  %v2285_v61 = vadd.f32 %v2284_v38, %v2283_v54  ;;  %v2687_v36 = vpack.c.bf16 %v2744_v60, %v2744_v60  ;;  %v2024_v62 = vpop.f32.mrb[15].mxu0  ;;  %v2345_v14 = vmul.f32 %v2744_v60, %v2744_v60  ;;  %v2290_v17 = vsel %vm1618_vm1, %v2744_v60, 0.0 }
 0x1e8   : > { %2241 = vst.msk [vmem:[%s3565_s10 + $0x30] sm:$0xf] %vm2228_vm10, %v2684_v46  ;;  %v2385_v63 = vsel %vm1618_vm1, %v2342_v39, 0.0  ;;  %v2685_v8 = vpack.c.bf16 %v2024_v62, %v2024_v62  ;;  %v2286_v1 = vsel %vm1618_vm1, %v2024_v62, 0.0  ;;  %v2343_v12 = vmul.f32 %v2024_v62, %v2024_v62 }
 0x1e9   : > { %v2386_v28 = vadd.f32 %v2385_v63, %v2384_v51  ;;  %2244 = vst.msk [vmem:[%s3565_s10 + $0x3c] sm:$0xf] %vm2228_vm10, %v2687_v36  ;;  %v2287_v9 = vadd.f32 %v2286_v1, %v2285_v61  ;;  %v2389_v56 = vsel %vm1618_vm1, %v2344_v7, 0.0  ;;  %v2391_v20 = vsel %vm1618_vm1, %v2345_v14, 0.0 }
 0x1ea   : > { %2242 = vst.msk [vmem:[%s3565_s10 + $0x34] sm:$0xf] %vm2228_vm10, %v2685_v8  ;;  %v2387_v5 = vsel %vm1618_vm1, %v2343_v12, 0.0 }
 0x1eb   : > { %v2289_v30 = vadd.f32 %v2288_v13, %v2287_v9  ;;  %v2388_v0 = vadd.f32 %v2387_v5, %v2386_v28 }
 0x1ed   : > { %v2291_v53 = vadd.f32 %v2290_v17, %v2289_v30  ;;  %v2390_v59 = vadd.f32 %v2389_v56, %v2388_v0 }
 0x1ef   : > { %v2392_v52 = vadd.f32 %v2391_v20, %v2390_v59 }
 0x204   : > { %v2747_v6 = vpop.f32.mrb[0].mxu1 }
 0x205   : > { %v2690_v21 = vpack.c.bf16 %v2747_v6, %v2747_v6  ;;  %v2037_v23 = vpop.f32.mrb[1].mxu1  ;;  %v2348_v26 = vmul.f32 %v2747_v6, %v2747_v6  ;;  %v2296_v37 = vsel %vm1618_vm1, %v2747_v6, 0.0 }
 0x206   : > { %v2688_v16 = vpack.c.bf16 %v2037_v23, %v2037_v23  ;;  %v2292_v4 = vsel %vm1618_vm1, %v2037_v23, 0.0  ;;  %v2346_v24 = vmul.f32 %v2037_v23, %v2037_v23  ;;  %v2748_v45 = vpop.f32.mrb[2].mxu1 }
 0x207   : > { %2247 = vst.msk [vmem:[%s3565_s10 + $0x48] sm:$0xf] %vm2228_vm10, %v2690_v21  ;;  %v2293_v2 = vadd.f32 %v2292_v4, %v2291_v53  ;;  %v2691_v19 = vpack.c.bf16 %v2748_v45, %v2748_v45  ;;  %v2040_v10 = vpop.f32.mrb[3].mxu1  ;;  %v2349_v41 = vmul.f32 %v2748_v45, %v2748_v45  ;;  %v2298_v42 = vsel %vm1618_vm1, %v2748_v45, 0.0 }
 0x208   : > { %2245 = vst.msk [vmem:[%s3565_s10 + $0x40] sm:$0xf] %vm2228_vm10, %v2688_v16  ;;  %v2393_v40 = vsel %vm1618_vm1, %v2346_v24, 0.0  ;;  %v2689_v3 = vpack.c.bf16 %v2040_v10, %v2040_v10  ;;  %v2294_v25 = vsel %vm1618_vm1, %v2040_v10, 0.0  ;;  %v2347_v34 = vmul.f32 %v2040_v10, %v2040_v10 }
 0x209   : > { %v2394_v31 = vadd.f32 %v2393_v40, %v2392_v52  ;;  %2248 = vst.msk [vmem:[%s3565_s10 + $0x4c] sm:$0xf] %vm2228_vm10, %v2691_v19  ;;  %v2295_v43 = vadd.f32 %v2294_v25, %v2293_v2  ;;  %v2397_v48 = vsel %vm1618_vm1, %v2348_v26, 0.0  ;;  %v2399_v32 = vsel %vm1618_vm1, %v2349_v41, 0.0 }
 0x20a   : > { %2246 = vst.msk [vmem:[%s3565_s10 + $0x44] sm:$0xf] %vm2228_vm10, %v2689_v3  ;;  %v2395_v35 = vsel %vm1618_vm1, %v2347_v34, 0.0 }
 0x20b   : > { %v2297_v22 = vadd.f32 %v2296_v37, %v2295_v43  ;;  %v2396_v44 = vadd.f32 %v2395_v35, %v2394_v31 }
 0x20d   : > { %v2299_v18 = vadd.f32 %v2298_v42, %v2297_v22  ;;  %v2398_v27 = vadd.f32 %v2397_v48, %v2396_v44 }
 0x20f   : > { %v2400_v11 = vadd.f32 %v2399_v32, %v2398_v27 }
 0x224   : > { %v2751_v49 = vpop.f32.mrb[4].mxu1 }
 0x225   : > { %v2694_v29 = vpack.c.bf16 %v2751_v49, %v2751_v49  ;;  %v2053_v50 = vpop.f32.mrb[5].mxu1  ;;  %v2352_v39 = vmul.f32 %v2751_v49, %v2751_v49  ;;  %v2304_v62 = vsel %vm1618_vm1, %v2751_v49, 0.0 }
 0x226   : > { %v2692_v47 = vpack.c.bf16 %v2053_v50, %v2053_v50  ;;  %v2300_v54 = vsel %vm1618_vm1, %v2053_v50, 0.0  ;;  %v2350_v33 = vmul.f32 %v2053_v50, %v2053_v50  ;;  %v2752_v55 = vpop.f32.mrb[6].mxu1 }
 0x227   : > { %2251 = vst.msk [vmem:[%s3565_s10 + $0x58] sm:$0xf] %vm2228_vm10, %v2694_v29  ;;  %v2301_v51 = vadd.f32 %v2300_v54, %v2299_v18  ;;  %v2695_v57 = vpack.c.bf16 %v2752_v55, %v2752_v55  ;;  %v2056_v15 = vpop.f32.mrb[7].mxu1  ;;  %v2353_v63 = vmul.f32 %v2752_v55, %v2752_v55  ;;  %v2306_v7 = vsel %vm1618_vm1, %v2752_v55, 0.0 }
 0x228   : > { %2249 = vst.msk [vmem:[%s3565_s10 + $0x50] sm:$0xf] %vm2228_vm10, %v2692_v47  ;;  %v2401_v58 = vsel %vm1618_vm1, %v2350_v33, 0.0  ;;  %v2693_v46 = vpack.c.bf16 %v2056_v15, %v2056_v15  ;;  %v2302_v38 = vsel %vm1618_vm1, %v2056_v15, 0.0  ;;  %v2351_v36 = vmul.f32 %v2056_v15, %v2056_v15 }
 0x229   : > { %v2402_v60 = vadd.f32 %v2401_v58, %v2400_v11  ;;  %2252 = vst.msk [vmem:[%s3565_s10 + $0x5c] sm:$0xf] %vm2228_vm10, %v2695_v57  ;;  %v2303_v61 = vadd.f32 %v2302_v38, %v2301_v51  ;;  %v2405_v9 = vsel %vm1618_vm1, %v2352_v39, 0.0  ;;  %v2407_v14 = vsel %vm1618_vm1, %v2353_v63, 0.0 }
 0x22a   : > { %2250 = vst.msk [vmem:[%s3565_s10 + $0x54] sm:$0xf] %vm2228_vm10, %v2693_v46  ;;  %v2403_v1 = vsel %vm1618_vm1, %v2351_v36, 0.0 }
 0x22b   : > { %v2305_v8 = vadd.f32 %v2304_v62, %v2303_v61  ;;  %v2404_v28 = vadd.f32 %v2403_v1, %v2402_v60 }
 0x22d   : > { %v2307_v12 = vadd.f32 %v2306_v7, %v2305_v8  ;;  %v2406_v13 = vadd.f32 %v2405_v9, %v2404_v28 }
 0x22f   : > { %v2408_v30 = vadd.f32 %v2407_v14, %v2406_v13 }
 0x244   : > { %v2755_v5 = vpop.f32.mrb[8].mxu1 }
 0x245   : > { %v2698_v17 = vpack.c.bf16 %v2755_v5, %v2755_v5  ;;  %v2069_v0 = vpop.f32.mrb[9].mxu1  ;;  %v2356_v24 = vmul.f32 %v2755_v5, %v2755_v5  ;;  %v2312_v10 = vsel %vm1618_vm1, %v2755_v5, 0.0 }
 0x246   : > { %v2696_v56 = vpack.c.bf16 %v2069_v0, %v2069_v0  ;;  %v2308_v53 = vsel %vm1618_vm1, %v2069_v0, 0.0  ;;  %v2354_v59 = vmul.f32 %v2069_v0, %v2069_v0  ;;  %v2756_v20 = vpop.f32.mrb[10].mxu1 }
 0x247   : > { %2255 = vst.msk [vmem:[%s3565_s10 + $0x68] sm:$0xf] %vm2228_vm10, %v2698_v17  ;;  %v2309_v52 = vadd.f32 %v2308_v53, %v2307_v12  ;;  %v2699_v6 = vpack.c.bf16 %v2756_v20, %v2756_v20  ;;  %v2072_v21 = vpop.f32.mrb[11].mxu1  ;;  %v2357_v40 = vmul.f32 %v2756_v20, %v2756_v20  ;;  %v2314_v26 = vsel %vm1618_vm1, %v2756_v20, 0.0 }
 0x248   : > { %2253 = vst.msk [vmem:[%s3565_s10 + $0x60] sm:$0xf] %vm2228_vm10, %v2696_v56  ;;  %v2409_v23 = vsel %vm1618_vm1, %v2354_v59, 0.0  ;;  %v2697_v16 = vpack.c.bf16 %v2072_v21, %v2072_v21  ;;  %v2310_v4 = vsel %vm1618_vm1, %v2072_v21, 0.0  ;;  %v2355_v19 = vmul.f32 %v2072_v21, %v2072_v21 }
 0x249   : > { %v2410_v45 = vadd.f32 %v2409_v23, %v2408_v30  ;;  %2256 = vst.msk [vmem:[%s3565_s10 + $0x6c] sm:$0xf] %vm2228_vm10, %v2699_v6  ;;  %v2311_v2 = vadd.f32 %v2310_v4, %v2309_v52  ;;  %v2413_v43 = vsel %vm1618_vm1, %v2356_v24, 0.0  ;;  %v2415_v41 = vsel %vm1618_vm1, %v2357_v40, 0.0 }
 0x24a   : > { %2254 = vst.msk [vmem:[%s3565_s10 + $0x64] sm:$0xf] %vm2228_vm10, %v2697_v16  ;;  %v2411_v25 = vsel %vm1618_vm1, %v2355_v19, 0.0 }
 0x24b   : > { %v2313_v3 = vadd.f32 %v2312_v10, %v2311_v2  ;;  %v2412_v31 = vadd.f32 %v2411_v25, %v2410_v45 }
 0x24d   : > { %v2315_v34 = vadd.f32 %v2314_v26, %v2313_v3  ;;  %v2414_v37 = vadd.f32 %v2413_v43, %v2412_v31 }
 0x24f   : > { %v2416_v22 = vadd.f32 %v2415_v41, %v2414_v37 }
 0x261   : > { %v2759_v35 = vpop.f32.mrb[12].mxu1 }
 0x262   : > { %v2702_v42 = vpack.c.bf16 %v2759_v35, %v2759_v35  ;;  %v2085_v44 = vpop.f32.mrb[13].mxu1  ;;  %v2360_v33 = vmul.f32 %v2759_v35, %v2759_v35  ;;  %v2320_v15 = vsel %vm1618_vm1, %v2759_v35, 0.0 }
 0x263   : > { %v2700_v48 = vpack.c.bf16 %v2085_v44, %v2085_v44  ;;  %v2316_v18 = vsel %vm1618_vm1, %v2085_v44, 0.0  ;;  %v2358_v27 = vmul.f32 %v2085_v44, %v2085_v44  ;;  %v2760_v32 = vpop.f32.mrb[14].mxu1 }
 0x264   : > { %2259 = vst.msk [vmem:[%s3565_s10 + $0x78] sm:$0xf] %vm2228_vm10, %v2702_v42  ;;  %v2317_v11 = vadd.f32 %v2316_v18, %v2315_v34  ;;  %v2703_v49 = vpack.c.bf16 %v2760_v32, %v2760_v32  ;;  %v2088_v29 = vpop.f32.mrb[15].mxu1  ;;  %v2361_v58 = vmul.f32 %v2760_v32, %v2760_v32  ;;  %v2322_v39 = vsel %vm1618_vm1, %v2760_v32, 0.0 }
 0x265   : > { %2257 = vst.msk [vmem:[%s3565_s10 + $0x70] sm:$0xf] %vm2228_vm10, %v2700_v48  ;;  %v2417_v50 = vsel %vm1618_vm1, %v2358_v27, 0.0  ;;  %v2701_v47 = vpack.c.bf16 %v2088_v29, %v2088_v29  ;;  %v2318_v54 = vsel %vm1618_vm1, %v2088_v29, 0.0  ;;  %v2359_v57 = vmul.f32 %v2088_v29, %v2088_v29 }
 0x266   : > { %v2418_v55 = vadd.f32 %v2417_v50, %v2416_v22  ;;  %2260 = vst.msk [vmem:[%s3565_s10 + $0x7c] sm:$0xf] %vm2228_vm10, %v2703_v49  ;;  %v2319_v51 = vadd.f32 %v2318_v54, %v2317_v11  ;;  %v2421_v61 = vsel %vm1618_vm1, %v2360_v33, 0.0  ;;  %v2423_v63 = vsel %vm1618_vm1, %v2361_v58, 0.0 }
 0x267   : > { %2258 = vst.msk [vmem:[%s3565_s10 + $0x74] sm:$0xf] %vm2228_vm10, %v2701_v47  ;;  %v2419_v38 = vsel %vm1618_vm1, %v2359_v57, 0.0 }
 0x268   : > { %v2321_v46 = vadd.f32 %v2320_v15, %v2319_v51  ;;  %v2420_v60 = vadd.f32 %v2419_v38, %v2418_v55 }
 0x26a   : > { %v2323_v36 = vadd.f32 %v2322_v39, %v2321_v46  ;;  %v2422_v62 = vadd.f32 %v2421_v61, %v2420_v60 }
 0x26c   : > { %v2324_v8 = vrot.slane %v2323_v36, 4  ;;  %v2424_v1 = vadd.f32 %v2423_v63, %v2422_v62 }
 0x26e   : > { %v2325_v7 = vadd.f32 %v2324_v8, %v2323_v36  ;;  %v2425_v28 = vrot.slane %v2424_v1, 4 }
 0x270   : > { %v2326_v9 = vrot.slane %v2325_v7, 2  ;;  %v2426_v12 = vadd.f32 %v2425_v28, %v2424_v1 }
 0x272   : > { %v2327_v13 = vadd.f32 %v2326_v9, %v2325_v7  ;;  %v2427_v14 = vrot.slane %v2426_v12, 2 }
 0x274   : > { %v2328_v30 = vrot.slane %v2327_v13, 1  ;;  %v2428_v5 = vadd.f32 %v2427_v14, %v2426_v12 }
 0x276   : > { %v2429_v17 = vrot.slane %v2428_v5, 1  ;;  %v2329_v0 = vadd.f32 %v2328_v30, %v2327_v13 }
 0x278   : > { %v2430_v56 = vadd.f32 %v2429_v17, %v2428_v5 }
 0x27a   : > { %v2432_v53 = vsel %vm447_vm7, %v2329_v0, %v2430_v56 }
 0x27b   : > { %2434 = vst.msk [vmem:[%s214_s18] sm:$0x3] %vm2433_vm11, %v2432_v53 }
 0x27c PF: > { %s14_s14 = sadd.s32 1, %s2829_s14   ;;  %s3735_s12 = smov %s2825_s13 }
 0x27d   : > { %p11_p5 = scmp.ge.s32.totalorder %s14_s14, 4   ;;  %s3736_s13 = smov %s3738_s15 }
 0x27f   :  { %13 = sbr.rel (!%p11_p5) target bundleno = 2 (0x2), region = 73 }

// kernel: basic_block_forward.4
= control target key start
LH: loop header
LB: loop body
LE: loop exit
PB: predicated region body
PF: predicated region fallthrough
CT: control target
= control target key end

     0   :  { %s3179_s18 = smov 0   ;;  %s3181_s19 = smov 0   ;;  %s4182_s0 = inlined_call_operand.vmem [shape: bf16[2,16,16,4], index: 0, kind: input, shape index: {}]   ;;  %s4183_s1 = inlined_call_operand.vmem [shape: bf16[36,4], index: 1, kind: input, shape index: {}]   ;;  %s4184_s2 = inlined_call_operand.vmem [shape: f32[1,4], index: 2, kind: input, shape index: {}]   ;;  %s4185_s3 = inlined_call_operand.vmem [shape: f32[1,4], index: 3, kind: input, shape index: {}]   ;;  %s4186_s4 = inlined_call_operand.vmem [shape: bf16[2,16,16,4], index: 4, kind: output, shape index: {0}]   ;;  %s4187_s5 = inlined_call_operand.vmem [shape: f32[2,1,2,4], index: 5, kind: output, shape index: {1}]  }
   0x1   :  { %s3183_s20 = smov 0  }
   0x2 LB: > { %s28_s21 = sadd.s32 1, %s3132_s19  ;;  %p2788_p0 = scmp.ge.s32.totalorder %s3136_s20, 1  ;;  %s3136_s20 = sphi %s3183_s20, %s16_s20   ;;  %s3132_s19 = sphi %s3181_s19, %s4197_s19   ;;  %s3128_s18 = sphi %s3179_s18, %s4196_s18  }
   0x3   : > { %p30_p1 = scmp.ge.s32.totalorder %s28_s21, 2  ;;  %p206_p2 = scmp.lt.s32.totalorder %s3136_s20, 3 }
   0x5   : > { %s4199_s21 = smov (%p30_p1, %s28_s21), 0  ;;  %p207_p3 = pnand %p2788_p0, %p206_p2 }
   0x6   : > { %p246_p4 = scmp.lt.s32.totalorder (!%p207_p3), %s3128_s18, 1  ;;  %v719_v0 = vlaneseq (!%p207_p3)  ;;  %v3203_v2 = vld [vmem:[%s4184_s2] ss:$0 sm:$0xff] (!%p207_p3)  ;;  %vm3138_vm1 = vmmov (!%p207_p3), 1   ;;  %vm3139_vm4 = vmmov (!%p207_p3), 0   ;;  %v3140_v17 = vmov (!%p207_p3), 0  }
   0x7   : > { %210 = sbr.rel (%p207_p3) target bundleno = 644 (0x284), region = 36  ;;  %vm1003_vm2 = vmpackc.low (!%p207_p3), %vm3138_vm1, %vm3138_vm1  ;;  %v3218_v10 = vld [vmem:[%s4185_s3] ss:$0 sm:$0xff] (!%p207_p3)  ;;  %vm662_vm8 = vcmask (!%p207_p3), 1040384   ;;  %vm663_vm9 = vsmask.f32 (!%p207_p3), 256 }
   0x8   : > { %v720_v1 = vshrl.u32 (!%p207_p3), %v719_v0, 7  ;;  %vm999_vm5 = vmpackc.low (!%p207_p3), %vm3139_vm4, %vm3139_vm4  ;;  %v1057_v18 = vsel (!%p207_p3), %vm1003_vm2, 65537, %v3140_v17  ;;  %s3141_s30 = smov (!%p207_p3), 12   ;;  %vm1526_vm14 = vcmask (!%p207_p3), 1046528   ;;  %s3142_s6 = smov (!%p207_p3), 24   ;;  %vm1833_vm1 = vcmask (!%p207_p3), 31744  }
   0x9   : > { %v1053_v25 = vsel (!%p207_p3), %vm999_vm5, 65537, %v3140_v17  ;;  %vm3239_vm10 = vmand (!%p207_p3), %vm662_vm8, %vm663_vm9  ;;  %s3143_s7 = smov (!%p207_p3), 8   ;;  %s3144_s8 = smov (!%p207_p3), 20   ;;  %vm1269_vm15 = vsmask.f32 (!%p207_p3), 7424  ;;  %vm1866_vm2 = vcmask (!%p207_p3), 64512  }
   0xa   : > { %v722_v3 = vadd.s32 (!%p207_p3), 16, %v720_v1  ;;  %vm777_vm0 = vcmp.ge.s32.totalorder (!%p207_p3), %v720_v1, 1  ;;  %v2798_v39 = vcombine.low (!%p207_p3), %v1053_v25, %v1053_v25  ;;  %s3145_s11 = smov (!%p207_p3), 32   ;;  %s3146_s14 = smov (!%p207_p3), 16   ;;  %vm1932_vm4 = vcmask (!%p207_p3), 130048  }
   0xb   : > { %vm1002_vm6 = vmpackc.low (!%p207_p3), %vm777_vm0, %vm777_vm0  ;;  %s3147_s15 = smov (!%p207_p3), 4   ;;  %s3148_s16 = smov (!%p207_p3), 28   ;;  %vm2150_vm0 = vcmask (!%p207_p3), 1041408   ;;  %vm1965_vm5 = vcmask (!%p207_p3), 162816   ;;  %vm2064_vm9 = vcmask (!%p207_p3), 261120  }
   0xc   : > { %vm836_vm3 = vcmp.le.s32.totalorder (!%p207_p3), %v722_v3, 16  ;;  %v1056_v26 = vsel (!%p207_p3), %vm1002_vm6, 65537, %v3140_v17  ;;  %vm3243_vm11 = vcmp.ne.s16.totalorder (!%p207_p3), %v2798_v39, 0  ;;  %vm1998_vm6 = vcmask (!%p207_p3), 195584  }
   0xd   : > { %vm1004_vm7 = vmpackc.low (!%p207_p3), %vm836_vm3, %vm836_vm3  ;;  %v2800_v40 = vcombine.low (!%p207_p3), %v1056_v26, %v1057_v18  ;;  %vm1899_vm3 = vcmask (!%p207_p3), 97280  }
   0xe   : > { %s4201_s18 = smov (!%p246_p4, %s3128_s18), 1  ;;  %v1058_v33 = vsel %vm1004_vm7, 65537, %v3140_v17  ;;  %vm2031_vm7 = vcmask 228352  }
   0xf   : > { %s2887_s22 = sshll.u32 %s4201_s18, 7  ;;  %v2801_v43 = vcombine.low %v1058_v33, %v1058_v33  ;;  %vm3247_vm12 = vcmp.ne.s16.totalorder %v2800_v40, 0 }
  0x10   : > { %s3210_s27 = scalar_lea.vmem %s4182_s0, %s2887_s22 }
  0x11   : > { %v2993_v4 = vld [vmem:[%s3210_s27 + $0x8] sm:$0xff]   ;;  %v2926_v5 = vld [vmem:[%s3210_s27] sm:$0xff]   ;;  %v2994_v6 = vld [vmem:[%s3210_s27 + $0x10] sm:$0xff]   ;;  %vm3251_vm13 = vcmp.ne.s16.totalorder %v2801_v43, 0 }
  0x12   : > { %v2931_v7 = vunpack.c.l.bf16 %v2993_v4  ;;  %v2932_v8 = vunpack.c.h.bf16 %v2993_v4  ;;  %v2927_v9 = vunpack.c.l.bf16 %v2926_v5  ;;  %v2928_v11 = vunpack.c.h.bf16 %v2926_v5  ;;  %v2995_v37 = vld [vmem:[%s3210_s27 + $0x18] sm:$0xff]   ;;  %v3109_v43 = vld [vmem:[%s4183_s1] sm:$0xff]  }
  0x13   : > { %v2935_v12 = vunpack.c.l.bf16 %v2994_v6  ;;  %v2936_v13 = vunpack.c.h.bf16 %v2994_v6  ;;  %v2939_v46 = vunpack.c.l.bf16 %v2995_v37  ;;  %v2940_v47 = vunpack.c.h.bf16 %v2995_v37  ;;  %3028 = vmatprep.subr.bf16.mxu0 %v3109_v43  ;;  %3066 = vmatprep.subr.bf16.mxu1 %v3109_v43 }
  0x14   : > { %v372_v14 = vmul.f32 %v2931_v7, %v3203_v2  ;;  %v373_v15 = vmul.f32 %v2932_v8, %v3203_v2  ;;  %v370_v16 = vmul.f32 %v2927_v9, %v3203_v2  ;;  %v371_v19 = vmul.f32 %v2928_v11, %v3203_v2  ;;  %3029 = vmatpush3.bf16.msra.mxu0 %v3109_v43 }
  0x15   : > { %v374_v20 = vmul.f32 %v2935_v12, %v3203_v2  ;;  %v375_v21 = vmul.f32 %v2936_v13, %v3203_v2  ;;  %v376_v60 = vmul.f32 %v2939_v46, %v3203_v2  ;;  %v377_v0 = vmul.f32 %v2940_v47, %v3203_v2  ;;  %v2996_v13 = vld [vmem:[%s3210_s27 + $0x20] sm:$0xff]   ;;  %3069 = vmatpush3.bf16.msra.mxu1 %v3109_v43 }
  0x16   : > { %v414_v22 = vadd.f32 %v3218_v10, %v372_v14  ;;  %v415_v23 = vadd.f32 %v3218_v10, %v373_v15  ;;  %v412_v24 = vadd.f32 %v3218_v10, %v370_v16  ;;  %v413_v27 = vadd.f32 %v3218_v10, %v371_v19 }
  0x17   : > { %v416_v28 = vadd.f32 %v3218_v10, %v374_v20  ;;  %v417_v29 = vadd.f32 %v3218_v10, %v375_v21  ;;  %v418_v12 = vadd.f32 %v3218_v10, %v376_v60  ;;  %v419_v17 = vadd.f32 %v3218_v10, %v377_v0 }
  0x18   : > { %v450_v30 = vmax.f32 %v414_v22, 0.0  ;;  %v451_v31 = vmax.f32 %v415_v23, 0.0  ;;  %v448_v32 = vmax.f32 %v412_v24, 0.0  ;;  %v449_v34 = vmax.f32 %v413_v27, 0.0 }
  0x19   : > { %v452_v35 = vmax.f32 %v416_v28, 0.0  ;;  %v453_v36 = vmax.f32 %v417_v29, 0.0  ;;  %v2943_v22 = vunpack.c.l.bf16 %v2996_v13  ;;  %v2944_v23 = vunpack.c.h.bf16 %v2996_v13 }
  0x1a   : > { %v484_v38 = vpack.c.bf16 %v451_v31, %v450_v30  ;;  %v483_v41 = vpack.c.bf16 %v449_v34, %v448_v32  ;;  %v454_v27 = vmax.f32 %v418_v12, 0.0  ;;  %v455_v28 = vmax.f32 %v419_v17, 0.0 }
  0x1b   : > { %v485_v42 = vpack.c.bf16 %v453_v36, %v452_v35  ;;  %v378_v33 = vmul.f32 %v2943_v22, %v3203_v2  ;;  %v379_v34 = vmul.f32 %v2944_v23, %v3203_v2 }
  0x1c   : > { %v515_v44 = vshrl.u32 %v484_v38, 16  ;;  %v518_v45 = vshll.u32 %v484_v38, 16  ;;  %v508_v48 = vshrl.u32 %v483_v41, 16  ;;  %v511_v49 = vshll.u32 %v483_v41, 16 }
  0x1d   : > { %v522_v50 = vshrl.u32 %v485_v42, 16  ;;  %v525_v51 = vshll.u32 %v485_v42, 16  ;;  %v486_v42 = vpack.c.bf16 %v455_v28, %v454_v27 }
  0x1e   : > { %v517_v52 = vrot.slane %v515_v44, 7  ;;  %v510_v54 = vrot.slane %v508_v48, 7 }
  0x1f   : > { %v524_v55 = vrot.slane %v522_v50, 7  ;;  %v529_v48 = vshrl.u32 %v486_v42, 16  ;;  %v421_v50 = vadd.f32 %v3218_v10, %v379_v34 }
  0x20   : > { %v520_v57 = vor.u32 %v518_v45, %v517_v52  ;;  %v513_v61 = vor.u32 %v511_v49, %v510_v54  ;;  %v684_v63 = vsel %vm3239_vm10, %v510_v54, 0  ;;  %v685_v11 = vsel %vm3239_vm10, %v517_v52, 0 }
  0x21   : > { %v527_v62 = vor.u32 %v525_v51, %v524_v55  ;;  %v3263_v3 = vsel %vm3243_vm11, %v684_v63, 0  ;;  %v3275_v7 = vsel %vm3251_vm13, %v684_v63, 0  ;;  %v686_v20 = vsel %vm3239_vm10, %v524_v55, 0 }
  0x22   : > { %v667_v1 = vsel %vm3239_vm10, 0, %v520_v57  ;;  %v666_v5 = vsel %vm3239_vm10, 0, %v513_v61  ;;  %v1528_v16 = vrot.slane %v3263_v3, 1  ;;  %v1531_v19 = vrot.slane %v3275_v7, 1 }
  0x23   : > { %v3267_v4 = vsel %vm3247_vm12, %v667_v1, 0  ;;  %v668_v6 = vsel %vm3239_vm10, 0, %v527_v62  ;;  %v3281_v8 = vsel %vm3247_vm12, %v666_v5, 0  ;;  %v3285_v9 = vsel %vm3243_vm11, %v666_v5, 0  ;;  %v3110_v62 = vld [vmem:[%s4183_s1 + $0x8] sm:$0xff]  }
  0x24   : > { %1610 = vrot.lane.b32.xlu1 %v3267_v4, %s3141_s30  ;;  %1608 = vrot.lane.b32.xlu0 %v3281_v8, %s3141_s30  ;;  %v3295_v14 = vsel %vm3247_vm12, %v668_v6, 0  ;;  %v1527_v15 = vrot.slane %v3285_v9, 1  ;;  %v1530_v18 = vrot.slane %v3281_v8, 1  ;;  %v1238_v21 = vsel %vm3251_vm13, %v685_v11, 0 }
  0x25   : > { %v1297_v24 = vshll.u32 %v3267_v4, 16  ;;  %v1240_v26 = vsel %vm3251_vm13, %v686_v20, 0  ;;  %v1533_v30 = vrot.slane %v3267_v4, 1  ;;  %v1534_v31 = vrot.slane %v1238_v21, 1  ;;  %3030 = vmatprep.subr.bf16.mxu0 %v3110_v62  ;;  %3067 = vmatprep.subr.bf16.mxu1 %v3110_v62 }
  0x26   : > { %v1529_v25 = vsel %vm1526_vm14, %v1527_v15, %v1528_v16  ;;  %v1532_v29 = vsel %vm1526_vm14, %v1530_v18, %v1531_v19  ;;  %v1273_v32 = vshll.u32 %v3285_v9, 16  ;;  %v1536_v35 = vrot.slane %v3295_v14, 1  ;;  %3031 = vmatpush3.bf16.msra.mxu0 %v3110_v62  ;;  %3070 = vmatpush3.bf16.msra.mxu1 %v3110_v62 }
  0x27   : > { %v1537_v36 = vrot.slane %v1240_v26, 1  ;;  %v1295_v37 = vshrl.u32 %v3267_v4, 16  ;;  %v1299_v38 = vrot.slane %v1297_v24, 1  ;;  %v1302_v39 = vshll.u32 %v1238_v21, 16  ;;  %v2997_v21 = vld [vmem:[%s3210_s27 + $0x28] sm:$0xff]  }
  0x28   : > { %1723 = vrot.lane.b32.xlu1 %v3295_v14, %s3142_s6  ;;  %1721 = vrot.lane.b32.xlu0 %v3267_v4, %s3142_s6  ;;  %v1278_v40 = vshll.u32 %v3263_v3, 16  ;;  %v1309_v41 = vshll.u32 %v3295_v14, 16  ;;  %v3329_v44 = vsel %vm1526_vm14, %v1533_v30, %v1534_v31  ;;  %v1271_v45 = vshrl.u32 %v3285_v9, 16 }
  0x29   : > { %v1275_v46 = vrot.slane %v1273_v32, 1  ;;  %v1285_v47 = vshll.u32 %v3281_v8, 16  ;;  %v420_v49 = vadd.f32 %v3218_v10, %v378_v33  ;;  %v3337_v51 = vsel %vm1526_vm14, %v1536_v35, %v1537_v36 }
  0x2a   : > { %v1300_v52 = vor.u32 %v1299_v38, %v1295_v37  ;;  %v1307_v54 = vshrl.u32 %v3295_v14, 16  ;;  %v1304_v55 = vrot.slane %v1302_v39, 1  ;;  %v1280_v57 = vrot.slane %v1278_v40, 1  ;;  %v2998_v39 = vld [vmem:[%s3210_s27 + $0x30] sm:$0xff]  }
  0x2b   : > { %v1311_v60 = vrot.slane %v1309_v41, 1  ;;  %v1314_v61 = vshll.u32 %v1240_v26, 16  ;;  %v1276_v63 = vor.u32 %v1275_v46, %v1271_v45  ;;  %v1283_v0 = vshrl.u32 %v3281_v8, 16 }
  0x2c   : > { %1575 = vrot.lane.b32.xlu1 %v1529_v25, %s3143_s7  ;;  %1688 = vrot.lane.b32.xlu0 %v1532_v29, %s3144_s8  ;;  %v1287_v1 = vrot.slane %v1285_v47, 1  ;;  %v1290_v3 = vshll.u32 %v3275_v7, 16  ;;  %v531_v5 = vrot.slane %v529_v48, 7  ;;  %v532_v6 = vshll.u32 %v486_v42, 16 }
  0x2d   : > { %v456_v11 = vmax.f32 %v420_v49, 0.0  ;;  %v457_v12 = vmax.f32 %v421_v50, 0.0  ;;  %v1305_v13 = vsel %vm1269_vm15, %v1300_v52, %v1304_v55  ;;  %v1312_v15 = vor.u32 %v1311_v60, %v1307_v54 }
  0x2e   : > { %v1316_v16 = vrot.slane %v1314_v61, 1  ;;  %v1281_v7 = vsel %vm1269_vm15, %v1276_v63, %v1280_v57  ;;  %v1288_v17 = vor.u32 %v1287_v1, %v1283_v0  ;;  %v1292_v18 = vrot.slane %v1290_v3, 1 }
  0x2f   : > { %v534_v19 = vor.u32 %v532_v6, %v531_v5  ;;  %v487_v20 = vpack.c.bf16 %v457_v12, %v456_v11  ;;  %v2947_v24 = vunpack.c.l.bf16 %v2997_v21  ;;  %v2948_v27 = vunpack.c.h.bf16 %v2997_v21  ;;  %v3111_v6 = vld [vmem:[%s4183_s1 + $0x10] ss:$0 sps:$4 sm:$0x33]  }
  0x30   : > { %1577 = vrot.lane.b32.xlu1 %v1532_v29, %s3143_s7  ;;  %1801 = vrot.lane.b32.xlu0 %v3329_v44, %s3145_s11  ;;  %v1317_v22 = vsel %vm1269_vm15, %v1312_v15, %v1316_v16  ;;  %v1293_v23 = vsel %vm1269_vm15, %v1288_v17, %v1292_v18  ;;  %v687_v30 = vsel %vm3239_vm10, %v531_v5, 0  ;;  %v2951_v43 = vunpack.c.l.bf16 %v2998_v39 }
  0x31   : > { %v669_v25 = vsel %vm3239_vm10, 0, %v534_v19  ;;  %v536_v26 = vshrl.u32 %v487_v20, 16  ;;  %v380_v29 = vmul.f32 %v2947_v24, %v3203_v2  ;;  %v539_v32 = vshll.u32 %v487_v20, 16  ;;  %3072 = vmatprep.subr.msk.bf16.mxu0 %vm2150_vm0, %v3111_v6  ;;  %3073 = vmatprep.subr.msk.bf16.mxu1 %vm2150_vm0, %v3111_v6 }
  0x32   : > { %v3364_v28 = vsel %vm3247_vm12, %v669_v25, 0  ;;  %v381_v33 = vmul.f32 %v2948_v27, %v3203_v2  ;;  %v1242_v35 = vsel %vm3251_vm13, %v687_v30, 0  ;;  %v2952_v48 = vunpack.c.h.bf16 %v2998_v39 }
  0x33   : > { %v538_v31 = vrot.slane %v536_v26, 7  ;;  %v1321_v34 = vshll.u32 %v3364_v28, 16  ;;  %v422_v37 = vadd.f32 %v3218_v10, %v380_v29  ;;  %v1319_v40 = vshrl.u32 %v3364_v28, 16 }
  0x34   : > { %1690 = vrot.lane.b32.xlu1 %v3329_v44, %s3144_s8  ;;  %1803 = vrot.lane.b32.xlu0 %v3337_v51, %s3145_s11  ;;  %v423_v38 = vadd.f32 %v3218_v10, %v381_v33  ;;  %v1326_v42 = vshll.u32 %v1242_v35, 16  ;;  %v382_v57 = vmul.f32 %v2951_v43, %v3203_v2  ;;  %v383_v60 = vmul.f32 %v2952_v48, %v3203_v2 }
  0x35   : > { %v541_v36 = vor.u32 %v539_v32, %v538_v31  ;;  %v1323_v41 = vrot.slane %v1321_v34, 1  ;;  %v458_v46 = vmax.f32 %v422_v37, 0.0  ;;  %v688_v54 = vsel %vm3239_vm10, %v538_v31, 0 }
  0x36   : > { %v459_v47 = vmax.f32 %v423_v38, 0.0  ;;  %v1328_v50 = vrot.slane %v1326_v42, 1  ;;  %v1539_v61 = vrot.slane %v3364_v28, 1  ;;  %v1540_v62 = vrot.slane %v1242_v35, 1 }
  0x37   : > { %v670_v45 = vsel %vm3239_vm10, 0, %v541_v36  ;;  %v1324_v49 = vor.u32 %v1323_v41, %v1319_v40  ;;  %v1244_v0 = vsel %vm3251_vm13, %v688_v54, 0  ;;  %v424_v3 = vadd.f32 %v3218_v10, %v382_v57 }
  0x38   : > { %1654 = vrot.lane.b32.xlu1 %v1305_v13, %s3146_s14  ;;  %1462 = vrot.lane.b32.xlu0 %v1281_v7, %s3147_s15  ;;  %v3389_v52 = vsel %vm3247_vm12, %v670_v45, 0  ;;  %v488_v55 = vpack.c.bf16 %v459_v47, %v458_v46  ;;  %v425_v5 = vadd.f32 %v3218_v10, %v383_v60  ;;  %v1541_v11 = vsel %vm1526_vm14, %v1539_v61, %v1540_v62  ;;  %v3000_v45 = vld [vmem:[%s3210_s27 + $0x40] sm:$0xff]  }
  0x39   : > { %v1333_v63 = vshll.u32 %v3389_v52, 16  ;;  %v1331_v12 = vshrl.u32 %v3389_v52, 16  ;;  %v1338_v15 = vshll.u32 %v1244_v0, 16  ;;  %v460_v17 = vmax.f32 %v424_v3, 0.0 }
  0x3a   : > { %v543_v1 = vshrl.u32 %v488_v55, 16  ;;  %v546_v16 = vshll.u32 %v488_v55, 16  ;;  %v461_v18 = vmax.f32 %v425_v5, 0.0  ;;  %v2152_v24 = vsel %vm2150_vm0, %v3111_v6, 0 }
  0x3b   : > { %v1340_v20 = vrot.slane %v1338_v15, 1  ;;  %3033 = vmatpush3.bf16.msra.mxu0 %v2152_v24  ;;  %3071 = vmatpush3.bf16.msra.mxu1 %v2152_v24  ;;  %v1542_v30 = vrot.slane %v3389_v52, 1  ;;  %v1543_v31 = vrot.slane %v1244_v0, 1  ;;  %v2959_v55 = vunpack.c.l.bf16 %v3000_v45 }
  0x3c   : > { %1767 = vrot.lane.b32.xlu1 %v1317_v22, %s3148_s16  ;;  %1464 = vrot.lane.b32.xlu0 %v1293_v23, %s3147_s15  ;;  %v545_v7 = vrot.slane %v543_v1, 7  ;;  %v2960_v57 = vunpack.c.h.bf16 %v3000_v45  ;;  %vm2117_vm0 = vcmask 293888  }
  0x3d   : > { %v1544_v39 = vsel %vm1526_vm14, %v1542_v30, %v1543_v31  ;;  %v386_v0 = vmul.f32 %v2959_v55, %v3203_v2 }
  0x3e   : > { %v548_v21 = vor.u32 %v546_v16, %v545_v7  ;;  %v689_v34 = vsel %vm3239_vm10, %v545_v7, 0  ;;  %v387_v1 = vmul.f32 %v2960_v57, %v3203_v2 }
  0x3f   : > { %v1246_v40 = vsel %vm3251_vm13, %v689_v34, 0  ;;  %v428_v15 = vadd.f32 %v3218_v10, %v386_v0 }
  0x40   : > { %1466 = vrot.lane.b32.xlu1 %v1305_v13, %s3147_s15  ;;  %1652 = vrot.lane.b32.xlu0 %v1293_v23, %s3146_s14  ;;  %v2999_v23 = vld [vmem:[%s3210_s27 + $0x38] sm:$0xff]   ;;  %v1350_v48 = vshll.u32 %v1246_v40, 16  ;;  %v1546_v6 = vrot.slane %v1246_v40, 1  ;;  %v429_v16 = vadd.f32 %v3218_v10, %v387_v1 }
  0x41   : > { %v2955_v26 = vunpack.c.l.bf16 %v2999_v23  ;;  %v2956_v29 = vunpack.c.h.bf16 %v2999_v23 }
  0x42   : > { %v465_v23 = vmax.f32 %v429_v16, 0.0 }
  0x43   : > { %v384_v33 = vmul.f32 %v2955_v26, %v3203_v2  ;;  %v385_v37 = vmul.f32 %v2956_v29, %v3203_v2  ;;  %v3001_v29 = vld [vmem:[%s3210_s27 + $0x48] sm:$0xff]  }
  0x44   : > { %1468 = vrot.lane.b32.xlu1 %v1317_v22, %s3147_s15  ;;  %1765 = vrot.lane.b32.xlu0 %v1305_v13, %s3148_s16  ;;  %v1335_v13 = vrot.slane %v1333_v63, 1  ;;  %v2963_v30 = vunpack.c.l.bf16 %v3001_v29  ;;  %v2964_v34 = vunpack.c.h.bf16 %v3001_v29 }
  0x45   : > { %v426_v41 = vadd.f32 %v3218_v10, %v384_v33  ;;  %v427_v43 = vadd.f32 %v3218_v10, %v385_v37 }
  0x46   : > { %v1336_v19 = vor.u32 %v1335_v13, %v1331_v12 }
  0x47   : > { %v463_v54 = vmax.f32 %v427_v43, 0.0 }
  0x48   : > { %1581 = vrot.lane.b32.xlu1 %v3337_v51, %s3143_s7  ;;  %1579 = vrot.lane.b32.xlu0 %v3329_v44, %s3143_s7  ;;  %v1329_v44 = vsel %vm1269_vm15, %v1324_v49, %v1328_v50  ;;  %v1341_v25 = vsel %vm1269_vm15, %v1336_v19, %v1340_v20  ;;  %v462_v49 = vmax.f32 %v426_v41, 0.0 }
  0x4a   : > { %v490_v63 = vpack.c.bf16 %v463_v54, %v462_v49 }
  0x4c   : > { %1614 = vrot.lane.b32.xlu1 %v3364_v28, %s3141_s30  ;;  %1612 = vrot.lane.b32.xlu0 %v3295_v14, %s3141_s30  ;;  %v557_v13 = vshrl.u32 %v490_v63, 16 }
  0x4e   : > { %v559_v20 = vrot.slane %v557_v13, 7 }
  0x50   : > { %1658 = vrot.lane.b32.xlu1 %v1329_v44, %s3146_s14  ;;  %1656 = vrot.lane.b32.xlu0 %v1317_v22, %s3146_s14  ;;  %v489_v22 = vpack.c.bf16 %v461_v18, %v460_v17 }
  0x52   : > { %v550_v27 = vshrl.u32 %v489_v22, 16  ;;  %v553_v36 = vshll.u32 %v489_v22, 16  ;;  %v464_v22 = vmax.f32 %v428_v15, 0.0 }
  0x54   : > { %1694 = vrot.lane.b32.xlu1 %v1541_v11, %s3144_s8  ;;  %1692 = vrot.lane.b32.xlu0 %v3337_v51, %s3144_s8  ;;  %v671_v51 = vsel %vm3239_vm10, 0, %v548_v21  ;;  %v552_v35 = vrot.slane %v550_v27, 7  ;;  %v560_v21 = vshll.u32 %v490_v63, 16  ;;  %v491_v27 = vpack.c.bf16 %v465_v23, %v464_v22 }
  0x55   : > { %v3429_v32 = vsel %vm3247_vm12, %v671_v51, 0 }
  0x56   : > { %v1345_v38 = vshll.u32 %v3429_v32, 16  ;;  %v555_v42 = vor.u32 %v553_v36, %v552_v35  ;;  %v1343_v46 = vshrl.u32 %v3429_v32, 16  ;;  %v690_v62 = vsel %vm3239_vm10, %v552_v35, 0 }
  0x57   : > { %v1545_v5 = vrot.slane %v3429_v32, 1  ;;  %v1248_v12 = vsel %vm3251_vm13, %v690_v62, 0  ;;  %v562_v51 = vor.u32 %v560_v21, %v559_v20  ;;  %v564_v33 = vshrl.u32 %v491_v27, 16 }
  0x58   : > { %1727 = vrot.lane.b32.xlu1 %v3389_v52, %s3142_s6  ;;  %1725 = vrot.lane.b32.xlu0 %v3364_v28, %s3142_s6  ;;  %v1347_v47 = vrot.slane %v1345_v38, 1  ;;  %v672_v50 = vsel %vm3239_vm10, 0, %v555_v42  ;;  %v1362_v19 = vshll.u32 %v1248_v12, 16  ;;  %v1549_v36 = vrot.slane %v1248_v12, 1 }
  0x59   : > { %v3453_v61 = vsel %vm3247_vm12, %v672_v50, 0  ;;  %v1547_v7 = vsel %vm1526_vm14, %v1545_v5, %v1546_v6  ;;  %v673_v31 = vsel %vm3239_vm10, 0, %v562_v51  ;;  %v388_v38 = vmul.f32 %v2963_v30, %v3203_v2  ;;  %v3002_v50 = vld [vmem:[%s3210_s27 + $0x50] sm:$0xff]  }
  0x5a   : > { %v1348_v60 = vor.u32 %v1347_v47, %v1343_v46  ;;  %v1355_v17 = vshrl.u32 %v3453_v61, 16  ;;  %v1364_v26 = vrot.slane %v1362_v19, 1  ;;  %v1548_v35 = vrot.slane %v3453_v61, 1 }
  0x5b   : > { %v3489_v37 = vsel %vm3247_vm12, %v673_v31, 0  ;;  %v566_v40 = vrot.slane %v564_v33, 7  ;;  %v567_v41 = vshll.u32 %v491_v27, 16  ;;  %v389_v42 = vmul.f32 %v2964_v34, %v3203_v2 }
  0x5c   : > { %1771 = vrot.lane.b32.xlu1 %v1341_v25, %s3148_s16  ;;  %1769 = vrot.lane.b32.xlu0 %v1329_v44, %s3148_s16  ;;  %v1369_v43 = vshll.u32 %v3489_v37, 16  ;;  %v1550_v45 = vsel %vm1526_vm14, %v1548_v35, %v1549_v36  ;;  %v430_v47 = vadd.f32 %v3218_v10, %v388_v38  ;;  %v1367_v54 = vshrl.u32 %v3489_v37, 16  ;;  %v3003_v38 = vld [vmem:[%s3210_s27 + $0x58] sm:$0xff]  }
  0x5d   : > { %v431_v49 = vadd.f32 %v3218_v10, %v389_v42  ;;  %v2967_v63 = vunpack.c.l.bf16 %v3002_v50  ;;  %v2968_v0 = vunpack.c.h.bf16 %v3002_v50  ;;  %v692_v6 = vsel %vm3239_vm10, %v566_v40, 0 }
  0x5e   : > { %v1371_v55 = vrot.slane %v1369_v43, 1  ;;  %v1551_v16 = vrot.slane %v3489_v37, 1 }
  0x5f   : > { %v467_v62 = vmax.f32 %v431_v49, 0.0  ;;  %v390_v12 = vmul.f32 %v2967_v63, %v3203_v2  ;;  %v391_v13 = vmul.f32 %v2968_v0, %v3203_v2 }
  0x60   : > { %1470 = vrot.lane.b32.xlu1 %v1329_v44, %s3147_s15  ;;  %1805 = vrot.lane.b32.xlu0 %v1541_v11, %s3145_s11  ;;  %v1352_v44 = vrot.slane %v1350_v48, 1  ;;  %v569_v48 = vor.u32 %v567_v41, %v566_v40  ;;  %v1372_v1 = vor.u32 %v1371_v55, %v1367_v54 }
  0x61   : > { %v433_v21 = vadd.f32 %v3218_v10, %v391_v13 }
  0x62   : > { %v1353_v3 = vsel %vm1269_vm15, %v1348_v60, %v1352_v44  ;;  %v466_v60 = vmax.f32 %v430_v47, 0.0  ;;  %v674_v44 = vsel %vm3239_vm10, 0, %v569_v48 }
  0x63   : > { %v3513_v5 = vsel %vm3247_vm12, %v674_v44, 0  ;;  %v469_v30 = vmax.f32 %v433_v21, 0.0 }
  0x64   : > { %1472 = vrot.lane.b32.xlu1 %v1341_v25, %s3147_s15  ;;  %1807 = vrot.lane.b32.xlu0 %v1544_v39, %s3145_s11  ;;  %v1379_v23 = vshrl.u32 %v3513_v5, 16  ;;  %v1554_v48 = vrot.slane %v3513_v5, 1 }
  0x68   : > { %1585 = vrot.lane.b32.xlu1 %v1544_v39, %s3143_s7  ;;  %1583 = vrot.lane.b32.xlu0 %v1541_v11, %s3143_s7  ;;  %v1357_v11 = vshll.u32 %v3453_v61, 16 }
  0x6a   : > { %v1359_v18 = vrot.slane %v1357_v11, 1  ;;  %v492_v11 = vpack.c.bf16 %v467_v62, %v466_v60 }
  0x6c   : > { %1618 = vrot.lane.b32.xlu1 %v3429_v32, %s3141_s30  ;;  %1616 = vrot.lane.b32.xlu0 %v3389_v52, %s3141_s30  ;;  %v1360_v24 = vor.u32 %v1359_v18, %v1355_v17  ;;  %v1381_v17 = vshll.u32 %v3513_v5, 16  ;;  %v1252_v18 = vsel %vm3251_vm13, %v692_v6, 0  ;;  %v571_v19 = vshrl.u32 %v492_v11, 16 }
  0x6d   : > { %v574_v27 = vshll.u32 %v492_v11, 16  ;;  %v1555_v49 = vrot.slane %v1252_v18, 1 }
  0x6e   : > { %v573_v51 = vrot.slane %v571_v19, 7 }
  0x70   : > { %1662 = vrot.lane.b32.xlu1 %v1353_v3, %s3146_s14  ;;  %1660 = vrot.lane.b32.xlu0 %v1341_v25, %s3146_s14  ;;  %v1365_v25 = vsel %vm1269_vm15, %v1360_v24, %v1364_v26  ;;  %v1383_v24 = vrot.slane %v1381_v17, 1  ;;  %v1386_v26 = vshll.u32 %v1252_v18, 16  ;;  %v576_v35 = vor.u32 %v574_v27, %v573_v51 }
  0x71   : > { %v693_v54 = vsel %vm3239_vm10, %v573_v51, 0 }
  0x72   : > { %v1384_v31 = vor.u32 %v1383_v24, %v1379_v23  ;;  %v1388_v33 = vrot.slane %v1386_v26, 1  ;;  %v675_v42 = vsel %vm3239_vm10, 0, %v576_v35 }
  0x73   : > { %v3560_v50 = vsel %vm3247_vm12, %v675_v42, 0 }
  0x74   : > { %1698 = vrot.lane.b32.xlu1 %v1547_v7, %s3144_s8  ;;  %1696 = vrot.lane.b32.xlu0 %v1544_v39, %s3144_s8  ;;  %v691_v39 = vsel %vm3239_vm10, %v559_v20, 0  ;;  %v432_v20 = vadd.f32 %v3218_v10, %v390_v12  ;;  %v1393_v63 = vshll.u32 %v3560_v50, 16 }
  0x75   : > { %v1250_v46 = vsel %vm3251_vm13, %v691_v39, 0  ;;  %v3546_v39 = vsel %vm1269_vm15, %v1384_v31, %v1388_v33 }
  0x76   : > { %v1374_v57 = vshll.u32 %v1250_v46, 16  ;;  %v468_v29 = vmax.f32 %v432_v20, 0.0 }
  0x78   : > { %1731 = vrot.lane.b32.xlu1 %v3453_v61, %s3142_s6  ;;  %1729 = vrot.lane.b32.xlu0 %v3429_v32, %s3142_s6  ;;  %v493_v36 = vpack.c.bf16 %v469_v30, %v468_v29 }
  0x7a   : > { %v578_v43 = vshrl.u32 %v493_v36, 16  ;;  %v581_v60 = vshll.u32 %v493_v36, 16 }
  0x7c   : > { %1775 = vrot.lane.b32.xlu1 %v1365_v25, %s3148_s16  ;;  %1773 = vrot.lane.b32.xlu0 %v1353_v3, %s3148_s16 }
  0x80   : > { %1474 = vrot.lane.b32.xlu1 %v1353_v3, %s3147_s15  ;;  %1809 = vrot.lane.b32.xlu0 %v1547_v7, %s3145_s11  ;;  %v1376_v3 = vrot.slane %v1374_v57, 1  ;;  %v580_v57 = vrot.slane %v578_v43, 7 }
  0x82   : > { %v1377_v15 = vsel %vm1269_vm15, %v1372_v1, %v1376_v3  ;;  %v3572_v1 = vsel %vm1526_vm14, %v1554_v48, %v1555_v49  ;;  %v1254_v3 = vsel %vm3251_vm13, %v693_v54, 0  ;;  %v583_v11 = vor.u32 %v581_v60, %v580_v57 }
  0x83   : > { %v1398_v17 = vshll.u32 %v1254_v3, 16  ;;  %v694_v36 = vsel %vm3239_vm10, %v580_v57, 0  ;;  %v1558_v42 = vrot.slane %v1254_v3, 1 }
  0x84   : > { %1476 = vrot.lane.b32.xlu1 %v1365_v25, %s3147_s15  ;;  %1811 = vrot.lane.b32.xlu0 %v1550_v45, %s3145_s11  ;;  %v676_v23 = vsel %vm3239_vm10, 0, %v583_v11  ;;  %v3614_v48 = vsel %vm3251_vm13, %v694_v36, 0 }
  0x85   : > { %v1400_v27 = vrot.slane %v1398_v17, 1  ;;  %v3595_v30 = vsel %vm3247_vm12, %v676_v23, 0 }
  0x88   : > { %1589 = vrot.lane.b32.xlu1 %v1550_v45, %s3143_s7  ;;  %1587 = vrot.lane.b32.xlu0 %v1547_v7, %s3143_s7  ;;  %v1552_v7 = vrot.slane %v1250_v46, 1  ;;  %v2972_v46 = vunpack.c.h.bf16 %v3003_v38 }
  0x8a   : > { %v1553_v22 = vsel %vm1526_vm14, %v1551_v16, %v1552_v7  ;;  %v393_v62 = vmul.f32 %v2972_v46, %v3203_v2  ;;  %v3004_v16 = vld [vmem:[%s3210_s27 + $0x60] sm:$0xff]   ;;  %v1395_v7 = vrot.slane %v1393_v63, 1 }
  0x8b   : > { %v2975_v19 = vunpack.c.l.bf16 %v3004_v16  ;;  %v2976_v20 = vunpack.c.h.bf16 %v3004_v16 }
  0x8c   : > { %1622 = vrot.lane.b32.xlu1 %v3489_v37, %s3141_s30  ;;  %1620 = vrot.lane.b32.xlu0 %v3453_v61, %s3141_s30  ;;  %v435_v13 = vadd.f32 %v3218_v10, %v393_v62 }
  0x8d   : > { %v394_v31 = vmul.f32 %v2975_v19, %v3203_v2  ;;  %v395_v33 = vmul.f32 %v2976_v20, %v3203_v2 }
  0x8e   : > { %v471_v26 = vmax.f32 %v435_v13, 0.0 }
  0x8f   : > { %v436_v49 = vadd.f32 %v3218_v10, %v394_v31  ;;  %v437_v54 = vadd.f32 %v3218_v10, %v395_v33 }
  0x90   : > { %1666 = vrot.lane.b32.xlu1 %v1377_v15, %s3146_s14  ;;  %1664 = vrot.lane.b32.xlu0 %v1365_v25, %s3146_s14 }
  0x91   : > { %v473_v13 = vmax.f32 %v437_v54, 0.0 }
  0x94   : > { %1702 = vrot.lane.b32.xlu1 %v1553_v22, %s3144_s8  ;;  %1700 = vrot.lane.b32.xlu0 %v1550_v45, %s3144_s8  ;;  %v2971_v45 = vunpack.c.l.bf16 %v3003_v38 }
  0x96   : > { %v3536_v34 = vpop.permute.xlu1 %1610  ;;  %v3538_v25 = vpop.permute.xlu0 %1608  ;;  %v392_v44 = vmul.f32 %v2971_v45, %v3203_v2  ;;  %v1405_v45 = vshll.u32 %v3595_v30, 16 }
  0x98   : > { %1735 = vrot.lane.b32.xlu1 %v3513_v5, %s3142_s6  ;;  %1733 = vrot.lane.b32.xlu0 %v3489_v37, %s3142_s6  ;;  %v434_v12 = vadd.f32 %v3218_v10, %v392_v44  ;;  %v1403_v10 = vshrl.u32 %v3595_v30, 16  ;;  %v1407_v3 = vrot.slane %v1405_v45, 1  ;;  %v1560_v45 = vrot.slane %v3595_v30, 1 }
  0x9a   : > { %v3548_v40 = vpop.permute.xlu1 %1723  ;;  %v3550_v41 = vpop.permute.xlu0 %1721  ;;  %v470_v24 = vmax.f32 %v434_v12, 0.0  ;;  %v472_v12 = vmax.f32 %v436_v49, 0.0  ;;  %v1408_v20 = vor.u32 %v1407_v3, %v1403_v10 }
  0x9c   : > { %1779 = vrot.lane.b32.xlu1 %v3546_v39, %s3148_s16  ;;  %1777 = vrot.lane.b32.xlu0 %v1377_v15, %s3148_s16  ;;  %v494_v38 = vpack.c.bf16 %v471_v26, %v470_v24 }
  0x9e   : > { %v1576_v47 = vpop.permute.xlu1 %1575  ;;  %v3564_v55 = vpop.permute.xlu0 %1688  ;;  %v585_v57 = vshrl.u32 %v494_v38, 16 }
  0xa0   : > { %1478 = vrot.lane.b32.xlu1 %v1377_v15, %s3147_s15  ;;  %1813 = vrot.lane.b32.xlu0 %v1553_v22, %s3145_s11  ;;  %v1391_v15 = vshrl.u32 %v3560_v50, 16 }
  0xa2   : > { %v1578_v0 = vpop.permute.xlu1 %1577  ;;  %v3576_v6 = vpop.permute.xlu0 %1801  ;;  %v1396_v51 = vor.u32 %v1395_v7, %v1391_v15  ;;  %v587_v15 = vrot.slane %v585_v57, 7  ;;  %v588_v7 = vshll.u32 %v494_v38, 16 }
  0xa4   : > { %1480 = vrot.lane.b32.xlu1 %v3546_v39, %s3147_s15  ;;  %1815 = vrot.lane.b32.xlu0 %v3572_v1, %s3145_s11  ;;  %v3609_v2 = vsel %vm1269_vm15, %v1396_v51, %v1400_v27  ;;  %v3005_v51 = vld [vmem:[%s3210_s27 + $0x68] sm:$0xff]   ;;  %v695_v57 = vsel %vm3239_vm10, %v587_v15, 0 }
  0xa5   : > { %v2979_v31 = vunpack.c.l.bf16 %v3005_v51  ;;  %v2980_v36 = vunpack.c.h.bf16 %v3005_v51  ;;  %v1258_v3 = vsel %vm3251_vm13, %v695_v57, 0 }
  0xa6   : > { %v1691_v18 = vpop.permute.xlu1 %1690  ;;  %v3586_v21 = vpop.permute.xlu0 %1803 }
  0xa8   : > { %1593 = vrot.lane.b32.xlu1 %v3572_v1, %s3143_s7  ;;  %1591 = vrot.lane.b32.xlu0 %v1553_v22, %s3143_s7  ;;  %v1557_v22 = vrot.slane %v3560_v50, 1 }
  0xaa   : > { %v1655_v29 = vpop.permute.xlu1 %1654  ;;  %v1463_v35 = vpop.permute.xlu0 %1462  ;;  %v3624_v62 = vsel %vm1526_vm14, %v1557_v22, %v1558_v42 }
  0xab   : > { %v1835_v43 = vsel %vm1833_vm1, %v3285_v9, %v1463_v35 }
  0xac   : > { %1626 = vrot.lane.b32.xlu1 %v3560_v50, %s3141_s30  ;;  %1624 = vrot.lane.b32.xlu0 %v3513_v5, %s3141_s30  ;;  %v1868_v60 = vsel %vm1866_vm2, %v1835_v43, %v1576_v47  ;;  %v1410_v47 = vshll.u32 %v3614_v48, 16 }
  0xae   : > { %v1768_v46 = vpop.permute.xlu1 %1767  ;;  %v1465_v9 = vpop.permute.xlu0 %1464  ;;  %v1412_v23 = vrot.slane %v1410_v47, 1  ;;  %v3708_v47 = vld [vmem:[%s4185_s3] ss:$0 sm:$0xff] }
  0xaf   : > { %v1837_v44 = vsel %vm1833_vm1, %v3281_v8, %v1465_v9 }
  0xb0   : > { %1670 = vrot.lane.b32.xlu1 %v3609_v2, %s3146_s14  ;;  %v1870_v63 = vsel %vm1866_vm2, %v1837_v44, %v1578_v0  ;;  %1668 = vrot.lane.b32.xlu0 %v3546_v39, %s3146_s14  ;;  %v1901_v0 = vsel %vm1899_vm3, %v1868_v60, %v3538_v25 }
  0xb1   : > { %v1903_v8 = vsel %vm1899_vm3, %v1870_v63, %v3536_v34 }
  0xb2   : > { %v3633_v11 = vpop.permute.xlu1 %1466  ;;  %v1936_v16 = vsel %vm1932_vm4, %v1903_v8, %v1655_v29  ;;  %v1653_v39 = vpop.permute.xlu0 %1652  ;;  %v495_v29 = vpack.c.bf16 %v473_v13, %v472_v12 }
  0xb3   : > { %v1934_v17 = vsel %vm1932_vm4, %v1901_v0, %v1653_v39  ;;  %v1969_v34 = vsel %vm1965_vm5, %v1936_v16, %v1691_v18  ;;  %v3006_v16 = vld [vmem:[%s3210_s27 + $0x70] sm:$0xff]  }
  0xb4   : > { %1706 = vrot.lane.b32.xlu1 %v3624_v62, %s3144_s8  ;;  %v1967_v19 = vsel %vm1965_vm5, %v1934_v17, %v3564_v55  ;;  %1704 = vrot.lane.b32.xlu0 %v3572_v1, %s3144_s8  ;;  %v2002_v25 = vsel %vm1998_vm6, %v1969_v34, %v3548_v40  ;;  %v590_v55 = vor.u32 %v588_v7, %v587_v15  ;;  %v592_v42 = vshrl.u32 %v495_v29, 16 }
  0xb5   : > { %v2000_v26 = vsel %vm1998_vm6, %v1967_v19, %v3550_v41  ;;  %v2035_v18 = vsel %vm2031_vm7, %v2002_v25, %v1768_v46  ;;  %v3662_v41 = vsel %vm1269_vm15, %v1408_v20, %v1412_v23  ;;  %v1561_v46 = vrot.slane %v3614_v48, 1 }
  0xb6   : > { %v3648_v24 = vpop.permute.xlu1 %1468  ;;  %v1766_v27 = vpop.permute.xlu0 %1765  ;;  %v2068_v35 = vsel %vm2064_vm9, %v2035_v18, %v3586_v21  ;;  %v677_v22 = vsel %vm3239_vm10, 0, %v590_v55  ;;  %v594_v60 = vrot.slane %v592_v42, 7  ;;  %v595_v44 = vshll.u32 %v495_v29, 16 }
  0xb7   : > { %v2033_v1 = vsel %vm2031_vm7, %v2000_v26, %v1766_v27  ;;  %v3688_v49 = vsel %vm3247_vm12, %v677_v22, 0  ;;  %v3701_v10 = vsel %vm1526_vm14, %v1560_v45, %v1561_v46  ;;  %v1422_v15 = vshll.u32 %v1258_v3, 16 }
  0xb8   : > { %1739 = vrot.lane.b32.xlu1 %v3595_v30, %s3142_s6  ;;  %1737 = vrot.lane.b32.xlu0 %v3560_v50, %s3142_s6  ;;  %v2066_v40 = vsel %vm2064_vm9, %v2033_v1, %v3576_v6  ;;  %v3679_v6 = vld [vmem:[%s4184_s2] ss:$0 sm:$0xff]  ;;  %v1417_v48 = vshll.u32 %v3688_v49, 16  ;;  %v597_v13 = vor.u32 %v595_v44, %v594_v60  ;;  %v1415_v0 = vshrl.u32 %v3688_v49, 16 }
  0xb9   : > { %3034 = vmatprep.mubr.msk.bf16.mxu0 %vm2117_vm0, %v2066_v40  ;;  %v396_v21 = vmul.f32 %v3679_v6, %v2979_v31  ;;  %v397_v54 = vmul.f32 %v3679_v6, %v2980_v36  ;;  %v2983_v20 = vunpack.c.l.bf16 %v3006_v16  ;;  %v2984_v23 = vunpack.c.h.bf16 %v3006_v16 }
  0xba   : > { %v3665_v33 = vpop.permute.xlu1 %1581  ;;  %3035 = vmatmul.mubr.msk.bf16.vlgmr.msra.gmra.mrb[0].mxu0 %vm2117_vm0, %v2068_v35  ;;  %v1580_v38 = vpop.permute.xlu0 %1579  ;;  %v1419_v39 = vrot.slane %v1417_v48, 1  ;;  %v678_v25 = vsel %vm3239_vm10, 0, %v597_v13  ;;  %v1424_v51 = vrot.slane %v1422_v15, 1  ;;  %v696_v55 = vsel %vm3239_vm10, %v594_v60, 0 }
  0xbb   : > { %v439_v8 = vadd.f32 %v3708_v47, %v397_v54  ;;  %v3726_v18 = vsel %vm3247_vm12, %v678_v25, 0  ;;  %v398_v40 = vmul.f32 %v3679_v6, %v2983_v20  ;;  %v399_v31 = vmul.f32 %v3679_v6, %v2984_v23 }
  0xbc   : > { %1783 = vrot.lane.b32.xlu1 %v3662_v41, %s3148_s16  ;;  %1781 = vrot.lane.b32.xlu0 %v3609_v2, %s3148_s16  ;;  %v1420_v26 = vor.u32 %v1419_v39, %v1415_v0  ;;  %v1564_v35 = vrot.slane %v1258_v3, 1  ;;  %v1839_v36 = vsel %vm1833_vm1, %v3267_v4, %v3633_v11  ;;  %v3745_v42 = vsel %vm3251_vm13, %v696_v55, 0 }
  0xbd   : > { %v475_v34 = vmax.f32 %v439_v8, 0.0  ;;  %v1872_v45 = vsel %vm1866_vm2, %v1839_v36, %v1580_v38  ;;  %v440_v4 = vadd.f32 %v3708_v47, %v398_v40  ;;  %v441_v11 = vadd.f32 %v3708_v47, %v399_v31 }
  0xbe   : > { %v3682_v43 = vpop.permute.xlu1 %1614  ;;  %v1613_v9 = vpop.permute.xlu0 %1612  ;;  %v3741_v22 = vsel %vm1269_vm15, %v1420_v26, %v1424_v51  ;;  %v1434_v3 = vshll.u32 %v3745_v42, 16  ;;  %v1841_v38 = vsel %vm1833_vm1, %v3295_v14, %v3648_v24 }
  0xbf   : > { %v1905_v57 = vsel %vm1899_vm3, %v1872_v45, %v1613_v9  ;;  %v1567_v45 = vrot.slane %v3745_v42, 1 }
  0xc0   : > { %1482 = vrot.lane.b32.xlu1 %v3609_v2, %s3147_s15  ;;  %1817 = vrot.lane.b32.xlu0 %v3624_v62, %s3145_s11  ;;  %v438_v2 = vadd.f32 %v3708_v47, %v396_v21  ;;  %v1429_v21 = vshll.u32 %v3726_v18, 16  ;;  %v1436_v25 = vrot.slane %v1434_v3, 1 }
  0xc2   : > { %v3698_v63 = vpop.permute.xlu1 %1658  ;;  %v1657_v12 = vpop.permute.xlu0 %1656  ;;  %v474_v17 = vmax.f32 %v438_v2, 0.0  ;;  %v1427_v2 = vshrl.u32 %v3726_v18, 16  ;;  %v1431_v8 = vrot.slane %v1429_v21, 1  ;;  %v1566_v21 = vrot.slane %v3726_v18, 1 }
  0xc3   : > { %v1938_v44 = vsel %vm1932_vm4, %v1905_v57, %v1657_v12  ;;  %v1874_v12 = vsel %vm1866_vm2, %v1841_v38, %v3665_v33 }
  0xc4   : > { %1484 = vrot.lane.b32.xlu1 %v3662_v41, %s3147_s15  ;;  %1819 = vrot.lane.b32.xlu0 %v3701_v10, %s3145_s11  ;;  %v496_v29 = vpack.c.bf16 %v475_v34, %v474_v17  ;;  %v1907_v14 = vsel %vm1899_vm3, %v1874_v12, %v3682_v43  ;;  %v476_v17 = vmax.f32 %v440_v4, 0.0  ;;  %v1432_v43 = vor.u32 %v1431_v8, %v1427_v2 }
  0xc5   : > { %v1940_v34 = vsel %vm1932_vm4, %v1907_v14, %v3698_v63  ;;  %v1568_v38 = vsel %vm1526_vm14, %v1566_v21, %v1567_v45 }
  0xc6   : > { %v1695_v7 = vpop.permute.xlu1 %1694  ;;  %v1693_v19 = vpop.permute.xlu0 %1692  ;;  %v599_v54 = vshrl.u32 %v496_v29, 16  ;;  %v602_v39 = vshll.u32 %v496_v29, 16 }
  0xc7   : > { %v1971_v9 = vsel %vm1965_vm5, %v1938_v44, %v1693_v19  ;;  %v1973_v19 = vsel %vm1965_vm5, %v1940_v34, %v1695_v7  ;;  %v3007_v7 = vld [vmem:[%s3210_s27 + $0x78] sm:$0xff]  }
  0xc8   : > { %1597 = vrot.lane.b32.xlu1 %v3701_v10, %s3143_s7  ;;  %1595 = vrot.lane.b32.xlu0 %v3624_v62, %s3143_s7  ;;  %v1563_v62 = vrot.slane %v3688_v49, 1  ;;  %v601_v0 = vrot.slane %v599_v54, 7 }
  0xca   : > { %v1728_v27 = vpop.permute.xlu1 %1727  ;;  %v1726_v1 = vpop.permute.xlu0 %1725  ;;  %v3756_v48 = vsel %vm1526_vm14, %v1563_v62, %v1564_v35  ;;  %v604_v51 = vor.u32 %v602_v39, %v601_v0  ;;  %v2987_v62 = vunpack.c.l.bf16 %v3007_v7  ;;  %v2988_v35 = vunpack.c.h.bf16 %v3007_v7 }
  0xcb   : > { %v2004_v13 = vsel %vm1998_vm6, %v1971_v9, %v1726_v1  ;;  %v2006_v20 = vsel %vm1998_vm6, %v1973_v19, %v1728_v27  ;;  %v697_v54 = vsel %vm3239_vm10, %v601_v0, 0 }
  0xcc   : > { %1630 = vrot.lane.b32.xlu1 %v3688_v49, %s3141_s30  ;;  %1628 = vrot.lane.b32.xlu0 %v3595_v30, %s3141_s30  ;;  %v679_v40 = vsel %vm3239_vm10, 0, %v604_v51  ;;  %v401_v44 = vmul.f32 %v3679_v6, %v2988_v35  ;;  %v1262_v9 = vsel %vm3251_vm13, %v697_v54, 0 }
  0xcd   : > { %v1446_v0 = vshll.u32 %v1262_v9, 16 }
  0xce   : > { %v1772_v46 = vpop.permute.xlu1 %1771  ;;  %v1770_v60 = vpop.permute.xlu0 %1769 }
  0xcf   : > { %v2037_v24 = vsel %vm2031_vm7, %v2004_v13, %v1770_v60  ;;  %v2039_v63 = vsel %vm2031_vm7, %v2006_v20, %v1772_v46  ;;  %v3811_v46 = vsel %vm3247_vm12, %v679_v40, 0 }
  0xd0   : > { %1674 = vrot.lane.b32.xlu1 %v3741_v22, %s3146_s14  ;;  %1672 = vrot.lane.b32.xlu0 %v3662_v41, %s3146_s14  ;;  %v477_v41 = vmax.f32 %v441_v11, 0.0  ;;  %v400_v11 = vmul.f32 %v3679_v6, %v2987_v62  ;;  %v1441_v42 = vshll.u32 %v3811_v46, 16  ;;  %v443_v6 = vadd.f32 %v3708_v47, %v401_v44 }
  0xd1   : > { %v1569_v20 = vrot.slane %v3811_v46, 1 }
  0xd2   : > { %v3769_v16 = vpop.permute.xlu1 %1470  ;;  %v1806_v15 = vpop.permute.xlu0 %1805  ;;  %v497_v55 = vpack.c.bf16 %v477_v41, %v476_v17  ;;  %v442_v12 = vadd.f32 %v3708_v47, %v400_v11  ;;  %v1443_v13 = vrot.slane %v1441_v42, 1  ;;  %v479_v17 = vmax.f32 %v443_v6, 0.0 }
  0xd3   : > { %v2070_v33 = vsel %vm2064_vm9, %v2037_v24, %v1806_v15  ;;  %v1448_v41 = vrot.slane %v1446_v0, 1 }
  0xd4   : > { %1710 = vrot.lane.b32.xlu1 %v3756_v48, %s3144_s8  ;;  %1708 = vrot.lane.b32.xlu0 %v3701_v10, %s3144_s8  ;;  %v3795_v10 = vsel %vm1269_vm15, %v1432_v43, %v1436_v25  ;;  %v606_v31 = vshrl.u32 %v497_v55, 16  ;;  %v609_v4 = vshll.u32 %v497_v55, 16  ;;  %v478_v15 = vmax.f32 %v442_v12, 0.0 }
  0xd5   : > { %3038 = vmatprep.mubr.msk.bf16.mxu0 %vm2117_vm0, %v2070_v33 }
  0xd6   : > { %v3784_v23 = vpop.permute.xlu1 %1472  ;;  %v1808_v26 = vpop.permute.xlu0 %1807  ;;  %v608_v60 = vrot.slane %v606_v31, 7  ;;  %v498_v25 = vpack.c.bf16 %v479_v17, %v478_v15 }
  0xd7   : > { %v2072_v29 = vsel %vm2064_vm9, %v2039_v63, %v1808_v26  ;;  %v1570_v63 = vrot.slane %v1262_v9, 1  ;;  %v1845_v21 = vsel %vm1833_vm1, %v3389_v52, %v3784_v23 }
  0xd8   : > { %1743 = vrot.lane.b32.xlu1 %v3726_v18, %s3142_s6  ;;  %1741 = vrot.lane.b32.xlu0 %v3688_v49, %s3142_s6  ;;  %v611_v8 = vor.u32 %v609_v4, %v608_v60  ;;  %v698_v19 = vsel %vm3239_vm10, %v608_v60, 0  ;;  %v613_v62 = vshrl.u32 %v498_v25, 16  ;;  %v616_v42 = vshll.u32 %v498_v25, 16 }
  0xd9   : > { %3039 = vmatmul.mubr.msk.bf16.gmra.mrb[4].mxu0 %vm2117_vm0, %v2072_v29  ;;  %v1264_v51 = vsel %vm3251_vm13, %v698_v19, 0 }
  0xda   : > { %v3797_v27 = vpop.permute.xlu1 %1585  ;;  %v1584_v1 = vpop.permute.xlu0 %1583  ;;  %v680_v24 = vsel %vm3239_vm10, 0, %v611_v8  ;;  %v615_v23 = vrot.slane %v613_v62, 7  ;;  %v1573_v17 = vrot.slane %v1264_v51, 1 }
  0xdb   : > { %v3838_v33 = vsel %vm3247_vm12, %v680_v24, 0 }
  0xdc   : > { %1787 = vrot.lane.b32.xlu1 %v3795_v10, %s3148_s16  ;;  %1785 = vrot.lane.b32.xlu0 %v3741_v22, %s3148_s16  ;;  %v1453_v55 = vshll.u32 %v3838_v33, 16  ;;  %v1572_v15 = vrot.slane %v3838_v33, 1 }
  0xde   : > { %v3805_v36 = vpop.permute.xlu1 %1618  ;;  %v1617_v57 = vpop.permute.xlu0 %1616  ;;  %v1455_v54 = vrot.slane %v1453_v55, 1  ;;  %v1574_v25 = vsel %vm1526_vm14, %v1572_v15, %v1573_v17 }
  0xe0   : > { %1486 = vrot.lane.b32.xlu1 %v3741_v22, %s3147_s15  ;;  %1821 = vrot.lane.b32.xlu0 %v3756_v48, %s3145_s11  ;;  %v1439_v22 = vshrl.u32 %v3811_v46, 16 }
  0xe2   : > { %v1663_v3 = vpop.permute.xlu1 %1662  ;;  %v1661_v2 = vpop.permute.xlu0 %1660  ;;  %v1444_v47 = vor.u32 %v1443_v13, %v1439_v22  ;;  %v618_v13 = vor.u32 %v616_v42, %v615_v23 }
  0xe4   : > { %1488 = vrot.lane.b32.xlu1 %v3795_v10, %s3147_s15  ;;  %1823 = vrot.lane.b32.xlu0 %v1568_v38, %s3145_s11  ;;  %v1449_v26 = vsel %vm1269_vm15, %v1444_v47, %v1448_v41 }
  0xe6   : > { %v1699_v39 = vpop.permute.xlu1 %1698  ;;  %v1697_v14 = vpop.permute.xlu0 %1696 }
  0xe8   : > { %1601 = vrot.lane.b32.xlu1 %v1568_v38, %s3143_s7  ;;  %1599 = vrot.lane.b32.xlu0 %v3756_v48, %s3143_s7  ;;  %v1843_v48 = vsel %vm1833_vm1, %v3364_v28, %v3769_v16  ;;  %v1571_v28 = vsel %vm1526_vm14, %v1569_v20, %v1570_v63  ;;  %v1458_v16 = vshll.u32 %v1264_v51, 16 }
  0xe9   : > { %v1876_v29 = vsel %vm1866_vm2, %v1843_v48, %v1584_v1  ;;  %v1451_v1 = vshrl.u32 %v3838_v33, 16 }
  0xea   : > { %v1732_v34 = vpop.permute.xlu1 %1731  ;;  %v1730_v43 = vpop.permute.xlu0 %1729  ;;  %v1909_v40 = vsel %vm1899_vm3, %v1876_v29, %v1617_v57  ;;  %v1878_v57 = vsel %vm1866_vm2, %v1845_v21, %v3797_v27  ;;  %v1460_v8 = vrot.slane %v1458_v16, 1 }
  0xeb   : > { %v1942_v35 = vsel %vm1932_vm4, %v1909_v40, %v1661_v2  ;;  %v1911_v11 = vsel %vm1899_vm3, %v1878_v57, %v3805_v36  ;;  %v1456_v27 = vor.u32 %v1455_v54, %v1451_v1 }
  0xec   : > { %1634 = vrot.lane.b32.xlu1 %v3811_v46, %s3141_s30  ;;  %1632 = vrot.lane.b32.xlu0 %v3726_v18, %s3141_s30  ;;  %v1975_v45 = vsel %vm1965_vm5, %v1942_v35, %v1697_v14  ;;  %v1944_v9 = vsel %vm1932_vm4, %v1911_v11, %v1663_v3  ;;  %v681_v14 = vsel %vm3239_vm10, 0, %v618_v13 }
  0xed   : > { %v2008_v60 = vsel %vm1998_vm6, %v1975_v45, %v1730_v43  ;;  %v1977_v2 = vsel %vm1965_vm5, %v1944_v9, %v1699_v39  ;;  %v3894_v47 = vsel %vm3247_vm12, %v681_v14, 0  ;;  %v1267_v59 = vsel %vm3243_vm11, %v681_v14, 0 }
  0xee   : > { %v1776_v7 = vpop.permute.xlu1 %1775  ;;  %v1774_v31 = vpop.permute.xlu0 %1773  ;;  %v2010_v36 = vsel %vm1998_vm6, %v1977_v2, %v1732_v34  ;;  %v699_v34 = vsel %vm3239_vm10, %v615_v23, 0  ;;  %v1643_v19 = vshll.u32 %v3894_v47, 16  ;;  %v1641_v53 = vshrl.u32 %v3894_v47, 16 }
  0xef   : > { %v2041_v44 = vsel %vm2031_vm7, %v2008_v60, %v1774_v31  ;;  %v2043_v6 = vsel %vm2031_vm7, %v2010_v36, %v1776_v7  ;;  %v1266_v20 = vsel %vm3251_vm13, %v699_v34, 0  ;;  %v1685_v31 = vrot.slane %v3894_v47, 1 }
  0xf0   : > { %1678 = vrot.lane.b32.xlu1 %v1449_v26, %s3146_s14  ;;  %1676 = vrot.lane.b32.xlu0 %v3795_v10, %s3146_s14  ;;  %v1645_v58 = vrot.slane %v1643_v19, 1  ;;  %v1648_v48 = vshll.u32 %v1266_v20, 16  ;;  %v1686_v62 = vrot.slane %v1266_v20, 1  ;;  %v1756_v16 = vshll.u32 %v1267_v59, 16 }
  0xf1   : > { %v1268_v1 = vsel %vm3243_vm11, %v699_v34, 0  ;;  %vm2443_vm10 = vcmask 27648   ;;  %vm2648_vm11 = vcmask 25600  }
  0xf2   : > { %v1475_v4 = vpop.permute.xlu1 %1474  ;;  %v1810_v52 = vpop.permute.xlu0 %1809  ;;  %v1646_v55 = vor.u32 %v1645_v58, %v1641_v53  ;;  %v1650_v29 = vrot.slane %v1648_v48, 1  ;;  %v1761_v56 = vshll.u32 %v1268_v1, 16 }
  0xf3   : > { %v2074_v10 = vsel %vm2064_vm9, %v2041_v44, %v1810_v52  ;;  %v1847_v35 = vsel %vm1833_vm1, %v3429_v32, %v1475_v4  ;;  %v1687_v32 = vsel %vm1526_vm14, %v1685_v31, %v1686_v62  ;;  %v1754_v4 = vshrl.u32 %v1267_v59, 16 }
  0xf4   : > { %1714 = vrot.lane.b32.xlu1 %v1571_v28, %s3144_s8  ;;  %1712 = vrot.lane.b32.xlu0 %v1568_v38, %s3144_s8  ;;  %v1461_v38 = vsel %vm1269_vm15, %v1456_v27, %v1460_v8  ;;  %v1758_v52 = vrot.slane %v1756_v16, 1 }
  0xf5   : > { %3042 = vmatprep.mubr.msk.bf16.mxu0 %vm2117_vm0, %v2074_v10 }
  0xf6   : > { %v1477_v12 = vpop.permute.xlu1 %1476  ;;  %v1812_v22 = vpop.permute.xlu0 %1811 }
  0xf7   : > { %v2076_v3 = vsel %vm2064_vm9, %v2043_v6, %v1812_v22  ;;  %v1849_v11 = vsel %vm1833_vm1, %v3453_v61, %v1477_v12  ;;  %v1759_v12 = vor.u32 %v1758_v52, %v1754_v4  ;;  %v1763_v6 = vrot.slane %v1761_v56, 1 }
  0xf8   : > { %1747 = vrot.lane.b32.xlu1 %v3838_v33, %s3142_s6  ;;  %1745 = vrot.lane.b32.xlu0 %v3811_v46, %s3142_s6 }
  0xf9   : > { %3043 = vmatmul.mubr.msk.bf16.gmra.mrb[8].mxu0 %vm2117_vm0, %v2076_v3  ;;  %v1764_v14 = vsel %vm1269_vm15, %v1759_v12, %v1763_v6 }
  0xfa   : > { %v1590_v0 = vpop.permute.xlu1 %1589  ;;  %v1588_v39 = vpop.permute.xlu0 %1587 }
  0xfb   : > { %v1880_v21 = vsel %vm1866_vm2, %v1847_v35, %v1588_v39  ;;  %v1882_v23 = vsel %vm1866_vm2, %v1849_v11, %v1590_v0  ;;  %v1798_v39 = vrot.slane %v1267_v59, 1 }
  0xfc   : > { %1791 = vrot.lane.b32.xlu1 %v1461_v38, %s3148_s16  ;;  %1789 = vrot.lane.b32.xlu0 %v1449_v26, %s3148_s16 }
  0xfe   : > { %v1623_v24 = vpop.permute.xlu1 %1622  ;;  %v1621_v41 = vpop.permute.xlu0 %1620 }
  0xff   : > { %v1913_v54 = vsel %vm1899_vm3, %v1880_v21, %v1621_v41  ;;  %v1915_v10 = vsel %vm1899_vm3, %v1882_v23, %v1623_v24  ;;  %v1799_v24 = vrot.slane %v1268_v1, 1 }
 0x100   : > { %1490 = vrot.lane.b32.xlu1 %v1449_v26, %s3147_s15  ;;  %1825 = vrot.lane.b32.xlu0 %v1571_v28, %s3145_s11 }
 0x101   : > { %v1800_v41 = vsel %vm1526_vm14, %v1798_v39, %v1799_v24 }
 0x102   : > { %v1667_v43 = vpop.permute.xlu1 %1666  ;;  %v1665_v63 = vpop.permute.xlu0 %1664 }
 0x103   : > { %v1946_v60 = vsel %vm1932_vm4, %v1913_v54, %v1665_v63  ;;  %v1948_v8 = vsel %vm1932_vm4, %v1915_v10, %v1667_v43 }
 0x104   : > { %1492 = vrot.lane.b32.xlu1 %v1461_v38, %s3147_s15  ;;  %1827 = vrot.lane.b32.xlu0 %v1574_v25, %s3145_s11 }
 0x106   : > { %v1703_v26 = vpop.permute.xlu1 %1702  ;;  %v1701_v51 = vpop.permute.xlu0 %1700 }
 0x107   : > { %v1979_v44 = vsel %vm1965_vm5, %v1946_v60, %v1701_v51  ;;  %v1981_v36 = vsel %vm1965_vm5, %v1948_v8, %v1703_v26 }
 0x108   : > { %1605 = vrot.lane.b32.xlu1 %v1574_v25, %s3143_s7  ;;  %1603 = vrot.lane.b32.xlu0 %v1571_v28, %s3143_s7  ;;  %v1651_v28 = vsel %vm1269_vm15, %v1646_v55, %v1650_v29 }
 0x10a   : > { %v1736_v7 = vpop.permute.xlu1 %1735  ;;  %v1734_v40 = vpop.permute.xlu0 %1733 }
 0x10b   : > { %v2012_v42 = vsel %vm1998_vm6, %v1979_v44, %v1734_v40  ;;  %v2014_v22 = vsel %vm1998_vm6, %v1981_v36, %v1736_v7 }
 0x10c   : > { %1638 = vrot.lane.b32.xlu1 %v3894_v47, %s3141_s30  ;;  %1636 = vrot.lane.b32.xlu0 %v3838_v33, %s3141_s30  ;;  %s4025_s30 = scalar_lea.vmem %s4186_s4, %s2887_s22  ;;  %s2793_s22 = sshll.u32 %s4201_s18, 1 }
 0x10e   : > { %v1780_v45 = vpop.permute.xlu1 %1779  ;;  %v1778_v57 = vpop.permute.xlu0 %1777 }
 0x10f   : > { %v2045_v2 = vsel %vm2031_vm7, %v2012_v42, %v1778_v57  ;;  %v2047_v3 = vsel %vm2031_vm7, %v2014_v22, %v1780_v45 }
 0x110   : > { %1682 = vrot.lane.b32.xlu1 %v1651_v28, %s3146_s14  ;;  %1680 = vrot.lane.b32.xlu0 %v1461_v38, %s3146_s14 }
 0x112   : > { %v1479_v9 = vpop.permute.xlu1 %1478  ;;  %v1814_v27 = vpop.permute.xlu0 %1813 }
 0x113   : > { %v2078_v61 = vsel %vm2064_vm9, %v2045_v2, %v1814_v27  ;;  %v1851_v58 = vsel %vm1833_vm1, %v3489_v37, %v1479_v9 }
 0x114   : > { %1718 = vrot.lane.b32.xlu1 %v1687_v32, %s3144_s8  ;;  %1716 = vrot.lane.b32.xlu0 %v1574_v25, %s3144_s8  ;;  %s268_s8 = scalar_lea.vmem %s4187_s5, %s2793_s22 }
 0x115   : > { %3046 = vmatprep.mubr.msk.bf16.mxu0 %vm2117_vm0, %v2078_v61 }
 0x116   : > { %v1481_v13 = vpop.permute.xlu1 %1480  ;;  %v1816_v38 = vpop.permute.xlu0 %1815 }
 0x117   : > { %v2080_v0 = vsel %vm2064_vm9, %v2047_v3, %v1816_v38  ;;  %v1853_v7 = vsel %vm1833_vm1, %v3513_v5, %v1481_v13 }
 0x118   : > { %1751 = vrot.lane.b32.xlu1 %v1267_v59, %s3142_s6  ;;  %1749 = vrot.lane.b32.xlu0 %v3894_v47, %s3142_s6 }
 0x119   : > { %3047 = vmatmul.mubr.msk.bf16.gmra.mrb[12].mxu0 %vm2117_vm0, %v2080_v0 }
 0x11a   : > { %v1594_v15 = vpop.permute.xlu1 %1593  ;;  %v1592_v17 = vpop.permute.xlu0 %1591 }
 0x11b   : > { %v1884_v48 = vsel %vm1866_vm2, %v1851_v58, %v1592_v17  ;;  %v1886_v40 = vsel %vm1866_vm2, %v1853_v7, %v1594_v15 }
 0x11c   : > { %1795 = vrot.lane.b32.xlu1 %v1764_v14, %s3148_s16  ;;  %1793 = vrot.lane.b32.xlu0 %v1651_v28, %s3148_s16 }
 0x11e   : > { %v1627_v34 = vpop.permute.xlu1 %1626  ;;  %v1625_v19 = vpop.permute.xlu0 %1624 }
 0x11f   : > { %v1917_v51 = vsel %vm1899_vm3, %v1884_v48, %v1625_v19  ;;  %v1919_v37 = vsel %vm1899_vm3, %v1886_v40, %v1627_v34 }
 0x120   : > { %1831 = vrot.lane.b32.xlu1 %v1800_v41, %s3145_s11  ;;  %1829 = vrot.lane.b32.xlu0 %v1687_v32, %s3145_s11 }
 0x122   : > { %v1671_v47 = vpop.permute.xlu1 %1670  ;;  %v1669_v43 = vpop.permute.xlu0 %1668 }
 0x123   : > { %v1950_v29 = vsel %vm1932_vm4, %v1917_v51, %v1669_v43  ;;  %v1952_v16 = vsel %vm1932_vm4, %v1919_v37, %v1671_v47 }
 0x126   : > { %v1707_v25 = vpop.permute.xlu1 %1706  ;;  %v1705_v20 = vpop.permute.xlu0 %1704 }
 0x127   : > { %v1983_v59 = vsel %vm1965_vm5, %v1950_v29, %v1705_v20  ;;  %v1985_v45 = vsel %vm1965_vm5, %v1952_v16, %v1707_v25 }
 0x12a   : > { %v1740_v63 = vpop.permute.xlu1 %1739  ;;  %v1738_v53 = vpop.permute.xlu0 %1737 }
 0x12b   : > { %v2016_v31 = vsel %vm1998_vm6, %v1983_v59, %v1738_v53  ;;  %v2018_v5 = vsel %vm1998_vm6, %v1985_v45, %v1740_v63 }
 0x12e   : > { %v1784_v26 = vpop.permute.xlu1 %1783  ;;  %v1782_v55 = vpop.permute.xlu0 %1781 }
 0x12f   : > { %v2049_v35 = vsel %vm2031_vm7, %v2016_v31, %v1782_v55  ;;  %v2051_v54 = vsel %vm2031_vm7, %v2018_v5, %v1784_v26 }
 0x132   : > { %v1483_v62 = vpop.permute.xlu1 %1482  ;;  %v1818_v28 = vpop.permute.xlu0 %1817 }
 0x133   : > { %v2082_v21 = vsel %vm2064_vm9, %v2049_v35, %v1818_v28  ;;  %v1855_v2 = vsel %vm1833_vm1, %v3560_v50, %v1483_v62 }
 0x134   : > { %3050 = vmatprep.mubr.msk.bf16.mxu1 %vm2117_vm0, %v2082_v21 }
 0x136   : > { %v1485_v1 = vpop.permute.xlu1 %1484  ;;  %v1820_v57 = vpop.permute.xlu0 %1819 }
 0x137   : > { %v2084_v60 = vsel %vm2064_vm9, %v2051_v54, %v1820_v57  ;;  %v1857_v6 = vsel %vm1833_vm1, %v3595_v30, %v1485_v1 }
 0x138   : > { %3051 = vmatmul.mubr.msk.bf16.vlgmr.msra.gmra.mrb[0].mxu1 %vm2117_vm0, %v2084_v60 }
 0x13a   : > { %v1598_v32 = vpop.permute.xlu1 %1597  ;;  %v1596_v4 = vpop.permute.xlu0 %1595 }
 0x13b   : > { %v1888_v27 = vsel %vm1866_vm2, %v1855_v2, %v1596_v4  ;;  %v1890_v13 = vsel %vm1866_vm2, %v1857_v6, %v1598_v32 }
 0x13e   : > { %v1631_v11 = vpop.permute.xlu1 %1630  ;;  %v1629_v44 = vpop.permute.xlu0 %1628 }
 0x13f   : > { %v1921_v61 = vsel %vm1899_vm3, %v1888_v27, %v1629_v44  ;;  %v1923_v50 = vsel %vm1899_vm3, %v1890_v13, %v1631_v11 }
 0x142   : > { %v1675_v52 = vpop.permute.xlu1 %1674  ;;  %v1673_v56 = vpop.permute.xlu0 %1672 }
 0x143   : > { %v1954_v12 = vsel %vm1932_vm4, %v1921_v61, %v1673_v56  ;;  %v1956_v14 = vsel %vm1932_vm4, %v1923_v50, %v1675_v52 }
 0x146   : > { %v1711_v23 = vpop.permute.xlu1 %1710  ;;  %v1709_v42 = vpop.permute.xlu0 %1708 }
 0x147   : > { %v1987_v22 = vsel %vm1965_vm5, %v1954_v12, %v1709_v42  ;;  %v1989_v15 = vsel %vm1965_vm5, %v1956_v14, %v1711_v23 }
 0x14a   : > { %v1744_v9 = vpop.permute.xlu1 %1743  ;;  %v1742_v10 = vpop.permute.xlu0 %1741 }
 0x14b   : > { %v2020_v3 = vsel %vm1998_vm6, %v1987_v22, %v1742_v10  ;;  %v2022_v30 = vsel %vm1998_vm6, %v1989_v15, %v1744_v9 }
 0x14e   : > { %v1788_v8 = vpop.permute.xlu1 %1787  ;;  %v1786_v36 = vpop.permute.xlu0 %1785 }
 0x14f   : > { %v2053_v0 = vsel %vm2031_vm7, %v2020_v3, %v1786_v36  ;;  %v2055_v41 = vsel %vm2031_vm7, %v2022_v30, %v1788_v8 }
 0x152   : > { %v1487_v38 = vpop.permute.xlu1 %1486  ;;  %v1822_v39 = vpop.permute.xlu0 %1821 }
 0x153   : > { %v2086_v24 = vsel %vm2064_vm9, %v2053_v0, %v1822_v39  ;;  %v1859_v55 = vsel %vm1833_vm1, %v3688_v49, %v1487_v38 }
 0x154   : > { %3054 = vmatprep.mubr.msk.bf16.mxu1 %vm2117_vm0, %v2086_v24 }
 0x156   : > { %v1489_v17 = vpop.permute.xlu1 %1488  ;;  %v1824_v34 = vpop.permute.xlu0 %1823 }
 0x157   : > { %v2088_v19 = vsel %vm2064_vm9, %v2055_v41, %v1824_v34  ;;  %v1861_v62 = vsel %vm1833_vm1, %v3726_v18, %v1489_v17 }
 0x158   : > { %3055 = vmatmul.mubr.msk.bf16.gmra.mrb[4].mxu1 %vm2117_vm0, %v2088_v19 }
 0x15a   : > { %v1602_v47 = vpop.permute.xlu1 %1601  ;;  %v1600_v43 = vpop.permute.xlu0 %1599 }
 0x15b   : > { %v1892_v29 = vsel %vm1866_vm2, %v1859_v55, %v1600_v43  ;;  %v1894_v35 = vsel %vm1866_vm2, %v1861_v62, %v1602_v47 }
 0x15e   : > { %v1635_v25 = vpop.permute.xlu1 %1634  ;;  %v1633_v20 = vpop.permute.xlu0 %1632 }
 0x15f   : > { %v1925_v59 = vsel %vm1899_vm3, %v1892_v29, %v1633_v20  ;;  %v1927_v49 = vsel %vm1899_vm3, %v1894_v35, %v1635_v25 }
 0x162   : > { %v1679_v63 = vpop.permute.xlu1 %1678  ;;  %v1677_v53 = vpop.permute.xlu0 %1676 }
 0x163   : > { %v1958_v31 = vsel %vm1932_vm4, %v1925_v59, %v1677_v53  ;;  %v1960_v5 = vsel %vm1932_vm4, %v1927_v49, %v1679_v63 }
 0x166   : > { %v1715_v58 = vpop.permute.xlu1 %1714  ;;  %v1713_v48 = vpop.permute.xlu0 %1712 }
 0x167   : > { %v1991_v37 = vsel %vm1965_vm5, %v1958_v31, %v1713_v48  ;;  %v1993_v54 = vsel %vm1965_vm5, %v1960_v5, %v1715_v58 }
 0x16a   : > { %v1748_v26 = vpop.permute.xlu1 %1747  ;;  %v1746_v51 = vpop.permute.xlu0 %1745 }
 0x16b   : > { %v2024_v28 = vsel %vm1998_vm6, %v1991_v37, %v1746_v51  ;;  %v2026_v18 = vsel %vm1998_vm6, %v1993_v54, %v1748_v26 }
 0x16e   : > { %v1792_v7 = vpop.permute.xlu1 %1791  ;;  %v1790_v40 = vpop.permute.xlu0 %1789 }
 0x16f   : > { %v2057_v21 = vsel %vm2031_vm7, %v2024_v28, %v1790_v40  ;;  %v2059_v60 = vsel %vm2031_vm7, %v2026_v18, %v1792_v7 }
 0x172   : > { %v1491_v16 = vpop.permute.xlu1 %1490  ;;  %v1826_v45 = vpop.permute.xlu0 %1825 }
 0x173   : > { %v2090_v1 = vsel %vm2064_vm9, %v2057_v21, %v1826_v45  ;;  %v1863_v61 = vsel %vm1833_vm1, %v3811_v46, %v1491_v16 }
 0x174   : > { %3058 = vmatprep.mubr.msk.bf16.mxu1 %vm2117_vm0, %v2090_v1 }
 0x176   : > { %v1493_v57 = vpop.permute.xlu1 %1492  ;;  %v1828_v32 = vpop.permute.xlu0 %1827 }
 0x177   : > { %v2092_v4 = vsel %vm2064_vm9, %v2059_v60, %v1828_v32  ;;  %v1865_v27 = vsel %vm1833_vm1, %v3838_v33, %v1493_v57 }
 0x178   : > { %3059 = vmatmul.mubr.msk.bf16.gmra.mrb[8].mxu1 %vm2117_vm0, %v2092_v4 }
 0x17a   : > { %v1606_v11 = vpop.permute.xlu1 %1605  ;;  %v1604_v44 = vpop.permute.xlu0 %1603 }
 0x17b   : > { %v1898_v36 = vsel %vm1866_vm2, %v1865_v27, %v1606_v11  ;;  %v1896_v12 = vsel %vm1866_vm2, %v1863_v61, %v1604_v44 }
 0x17e   : > { %v1639_v52 = vpop.permute.xlu1 %1638  ;;  %v1637_v56 = vpop.permute.xlu0 %1636 }
 0x17f   : > { %v1931_v6 = vsel %vm1899_vm3, %v1898_v36, %v1639_v52  ;;  %v1929_v22 = vsel %vm1899_vm3, %v1896_v12, %v1637_v56 }
 0x182   : > { %v1683_v23 = vpop.permute.xlu1 %1682  ;;  %v1681_v42 = vpop.permute.xlu0 %1680 }
 0x183   : > { %v1964_v33 = vsel %vm1932_vm4, %v1931_v6, %v1683_v23  ;;  %v1962_v3 = vsel %vm1932_vm4, %v1929_v22, %v1681_v42 }
 0x186   : > { %v1719_v9 = vpop.permute.xlu1 %1718  ;;  %v1717_v10 = vpop.permute.xlu0 %1716 }
 0x187   : > { %v1997_v38 = vsel %vm1965_vm5, %v1964_v33, %v1719_v9  ;;  %v1995_v14 = vsel %vm1965_vm5, %v1962_v3, %v1717_v10 }
 0x18a   : > { %v1752_v2 = vpop.permute.xlu1 %1751  ;;  %v1750_v8 = vpop.permute.xlu0 %1749 }
 0x18b   : > { %v2030_v24 = vsel %vm1998_vm6, %v1997_v38, %v1752_v2  ;;  %v2028_v41 = vsel %vm1998_vm6, %v1995_v14, %v1750_v8 }
 0x18d   : > { %v3036_v13 = vpop.f32.mrb[0].mxu0 }
 0x18e   : > { %v1796_v46 = vpop.permute.xlu1 %1795  ;;  %v2891_v50 = vpack.c.bf16 %v3036_v13, %v3036_v13  ;;  %v2188_v0 = vpop.f32.mrb[1].mxu0  ;;  %v2547_v34 = vmul.f32 %v3036_v13, %v3036_v13  ;;  %v2479_v48 = vsel %vm1833_vm1, %v3036_v13, 0.0 }
 0x18f   : > { %v1794_v39 = vpop.permute.xlu0 %1793  ;;  %v2889_v15 = vpack.c.bf16 %v2188_v0, %v2188_v0  ;;  %v2545_v30 = vmul.f32 %v2188_v0, %v2188_v0  ;;  %v3037_v17 = vpop.f32.mrb[2].mxu0  ;;  %v2063_v19 = vsel %vm2031_vm7, %v2030_v24, %v1796_v46  ;;  %v2476_v25 = vsel %vm1833_vm1, %v2188_v0, 0.0 }
 0x190   : > { %2446 = vst.msk [vmem:[%s4025_s30 + $0x8] sm:$0xf] %vm2443_vm10, %v2891_v50  ;;  %v2892_v47 = vpack.c.bf16 %v3037_v17, %v3037_v17  ;;  %v2191_v43 = vpop.f32.mrb[3].mxu0  ;;  %v2061_v26 = vsel %vm2031_vm7, %v2028_v41, %v1794_v39  ;;  %v2548_v59 = vmul.f32 %v3037_v17, %v3037_v17  ;;  %v2580_v35 = vsel %vm1833_vm1, %v2547_v34, 0.0 }
 0x191   : > { %2444 = vst.msk [vmem:[%s4025_s30] sm:$0xf] %vm2443_vm10, %v2889_v15  ;;  %v2890_v20 = vpack.c.bf16 %v2191_v43, %v2191_v43  ;;  %v2477_v63 = vsel %vm1833_vm1, %v2191_v43, 0.0  ;;  %v2546_v53 = vmul.f32 %v2191_v43, %v2191_v43  ;;  %v2577_v7 = vsel %vm1833_vm1, %v2545_v30, 0.0 }
 0x192   : > { %v1832_v58 = vpop.permute.xlu1 %1831  ;;  %2447 = vst.msk [vmem:[%s4025_s30 + $0xc] sm:$0xf] %vm2443_vm10, %v2892_v47  ;;  %v2478_v51 = vadd.f32 %v2477_v63, %v2476_v25  ;;  %v2481_v28 = vsel %vm1833_vm1, %v3037_v17, 0.0  ;;  %v2582_v21 = vsel %vm1833_vm1, %v2548_v59, 0.0 }
 0x193   : > { %v2096_v55 = vsel %vm2064_vm9, %v2063_v19, %v1832_v58  ;;  %v1830_v29 = vpop.permute.xlu0 %1829  ;;  %2445 = vst.msk [vmem:[%s4025_s30 + $0x4] sm:$0xf] %vm2443_vm10, %v2890_v20  ;;  %v2578_v40 = vsel %vm1833_vm1, %v2546_v53, 0.0 }
 0x194   : > { %v2094_v31 = vsel %vm2064_vm9, %v2061_v26, %v1830_v29  ;;  %v2480_v62 = vadd.f32 %v2479_v48, %v2478_v51  ;;  %v2579_v37 = vadd.f32 %v2578_v40, %v2577_v7 }
 0x195   : > { %3062 = vmatprep.mubr.msk.bf16.mxu1 %vm2117_vm0, %v2094_v31 }
 0x196   : > { %3063 = vmatmul.mubr.msk.bf16.gmra.mrb[12].mxu1 %vm2117_vm0, %v2096_v55  ;;  %v2581_v16 = vadd.f32 %v2580_v35, %v2579_v37  ;;  %v2482_v49 = vadd.f32 %v2481_v28, %v2480_v62 }
 0x198   : > { %v2583_v45 = vadd.f32 %v2582_v21, %v2581_v16 }
 0x1ac   : > { %v3040_v5 = vpop.f32.mrb[4].mxu0 }
 0x1ad   : > { %v2895_v1 = vpack.c.bf16 %v3040_v5, %v3040_v5  ;;  %v2204_v54 = vpop.f32.mrb[5].mxu0  ;;  %v2551_v42 = vmul.f32 %v3040_v5, %v3040_v5  ;;  %v2487_v27 = vsel %vm1833_vm1, %v3040_v5, 0.0 }
 0x1ae   : > { %v2893_v18 = vpack.c.bf16 %v2204_v54, %v2204_v54  ;;  %v2483_v57 = vsel %vm1833_vm1, %v2204_v54, 0.0  ;;  %v2549_v60 = vmul.f32 %v2204_v54, %v2204_v54  ;;  %v3041_v32 = vpop.f32.mrb[6].mxu0 }
 0x1af   : > { %2450 = vst.msk [vmem:[%s4025_s30 + $0x18] sm:$0xf] %vm2443_vm10, %v2895_v1  ;;  %v2484_v4 = vadd.f32 %v2483_v57, %v2482_v49  ;;  %v2896_v11 = vpack.c.bf16 %v3041_v32, %v3041_v32  ;;  %v2207_v44 = vpop.f32.mrb[7].mxu0  ;;  %v2552_v8 = vmul.f32 %v3041_v32, %v3041_v32  ;;  %v2489_v12 = vsel %vm1833_vm1, %v3041_v32, 0.0 }
 0x1b0   : > { %2448 = vst.msk [vmem:[%s4025_s30 + $0x10] sm:$0xf] %vm2443_vm10, %v2893_v18  ;;  %v2584_v52 = vsel %vm1833_vm1, %v2549_v60, 0.0  ;;  %v2894_v56 = vpack.c.bf16 %v2207_v44, %v2207_v44  ;;  %v2485_v23 = vsel %vm1833_vm1, %v2207_v44, 0.0  ;;  %v2550_v2 = vmul.f32 %v2207_v44, %v2207_v44 }
 0x1b1   : > { %v2585_v9 = vadd.f32 %v2584_v52, %v2583_v45  ;;  %2451 = vst.msk [vmem:[%s4025_s30 + $0x1c] sm:$0xf] %vm2443_vm10, %v2896_v11  ;;  %v2486_v10 = vadd.f32 %v2485_v23, %v2484_v4  ;;  %v2588_v22 = vsel %vm1833_vm1, %v2551_v42, 0.0  ;;  %v2590_v46 = vsel %vm1833_vm1, %v2552_v8, 0.0 }
 0x1b2   : > { %2449 = vst.msk [vmem:[%s4025_s30 + $0x14] sm:$0xf] %vm2443_vm10, %v2894_v56  ;;  %v2586_v36 = vsel %vm1833_vm1, %v2550_v2, 0.0 }
 0x1b3   : > { %v2488_v61 = vadd.f32 %v2487_v27, %v2486_v10  ;;  %v2587_v6 = vadd.f32 %v2586_v36, %v2585_v9 }
 0x1b5   : > { %v2490_v33 = vadd.f32 %v2489_v12, %v2488_v61  ;;  %v2589_v13 = vadd.f32 %v2588_v22, %v2587_v6 }
 0x1b7   : > { %v2591_v3 = vadd.f32 %v2590_v46, %v2589_v13 }
 0x1cc   : > { %v3044_v38 = vpop.f32.mrb[8].mxu0 }
 0x1cd   : > { %v2899_v50 = vpack.c.bf16 %v3044_v38, %v3044_v38  ;;  %v2220_v0 = vpop.f32.mrb[9].mxu0  ;;  %v2555_v43 = vmul.f32 %v3044_v38, %v3044_v38  ;;  %v2495_v53 = vsel %vm1833_vm1, %v3044_v38, 0.0 }
 0x1ce   : > { %v2897_v39 = vpack.c.bf16 %v2220_v0, %v2220_v0  ;;  %v2491_v14 = vsel %vm1833_vm1, %v2220_v0, 0.0  ;;  %v2553_v24 = vmul.f32 %v2220_v0, %v2220_v0  ;;  %v3045_v15 = vpop.f32.mrb[10].mxu0 }
 0x1cf   : > { %2454 = vst.msk [vmem:[%s4025_s30 + $0x28] sm:$0xf] %vm2443_vm10, %v2899_v50  ;;  %v2492_v30 = vadd.f32 %v2491_v14, %v2490_v33  ;;  %v2900_v17 = vpack.c.bf16 %v3045_v15, %v3045_v15  ;;  %v2223_v41 = vpop.f32.mrb[11].mxu0  ;;  %v2556_v58 = vmul.f32 %v3045_v15, %v3045_v15  ;;  %v2497_v51 = vsel %vm1833_vm1, %v3045_v15, 0.0 }
 0x1d0   : > { %2452 = vst.msk [vmem:[%s4025_s30 + $0x20] sm:$0xf] %vm2443_vm10, %v2897_v39  ;;  %v2592_v34 = vsel %vm1833_vm1, %v2553_v24, 0.0  ;;  %v2898_v19 = vpack.c.bf16 %v2223_v41, %v2223_v41  ;;  %v2493_v47 = vsel %vm1833_vm1, %v2223_v41, 0.0  ;;  %v2554_v63 = vmul.f32 %v2223_v41, %v2223_v41 }
 0x1d1   : > { %v2593_v25 = vadd.f32 %v2592_v34, %v2591_v3  ;;  %2455 = vst.msk [vmem:[%s4025_s30 + $0x2c] sm:$0xf] %vm2443_vm10, %v2900_v17  ;;  %v2494_v20 = vadd.f32 %v2493_v47, %v2492_v30  ;;  %v2596_v29 = vsel %vm1833_vm1, %v2555_v43, 0.0  ;;  %v2598_v40 = vsel %vm1833_vm1, %v2556_v58, 0.0 }
 0x1d2   : > { %2453 = vst.msk [vmem:[%s4025_s30 + $0x24] sm:$0xf] %vm2443_vm10, %v2898_v19  ;;  %v2594_v26 = vsel %vm1833_vm1, %v2554_v63, 0.0 }
 0x1d3   : > { %v2496_v48 = vadd.f32 %v2495_v53, %v2494_v20  ;;  %v2595_v55 = vadd.f32 %v2594_v26, %v2593_v25 }
 0x1d5   : > { %v2498_v7 = vadd.f32 %v2497_v51, %v2496_v48  ;;  %v2597_v59 = vadd.f32 %v2596_v29, %v2595_v55 }
 0x1d7   : > { %v2599_v31 = vadd.f32 %v2598_v40, %v2597_v59 }
 0x1ec   : > { %v3048_v62 = vpop.f32.mrb[12].mxu0 }
 0x1ed   : > { %v2903_v37 = vpack.c.bf16 %v3048_v62, %v3048_v62  ;;  %v2236_v35 = vpop.f32.mrb[13].mxu0  ;;  %v2559_v60 = vmul.f32 %v3048_v62, %v3048_v62  ;;  %v2503_v44 = vsel %vm1833_vm1, %v3048_v62, 0.0 }
 0x1ee   : > { %v2901_v28 = vpack.c.bf16 %v2236_v35, %v2236_v35  ;;  %v2499_v16 = vsel %vm1833_vm1, %v2236_v35, 0.0  ;;  %v2557_v49 = vmul.f32 %v2236_v35, %v2236_v35  ;;  %v3049_v21 = vpop.f32.mrb[14].mxu0 }
 0x1ef   : > { %2458 = vst.msk [vmem:[%s4025_s30 + $0x38] sm:$0xf] %vm2443_vm10, %v2903_v37  ;;  %v2500_v45 = vadd.f32 %v2499_v16, %v2498_v7  ;;  %v2904_v5 = vpack.c.bf16 %v3049_v21, %v3049_v21  ;;  %v2239_v1 = vpop.f32.mrb[15].mxu0  ;;  %v2560_v52 = vmul.f32 %v3049_v21, %v3049_v21  ;;  %v2505_v42 = vsel %vm1833_vm1, %v3049_v21, 0.0 }
 0x1f0   : > { %2456 = vst.msk [vmem:[%s4025_s30 + $0x30] sm:$0xf] %vm2443_vm10, %v2901_v28  ;;  %v2600_v54 = vsel %vm1833_vm1, %v2557_v49, 0.0  ;;  %v2902_v18 = vpack.c.bf16 %v2239_v1, %v2239_v1  ;;  %v2501_v57 = vsel %vm1833_vm1, %v2239_v1, 0.0  ;;  %v2558_v11 = vmul.f32 %v2239_v1, %v2239_v1 }
 0x1f1   : > { %v2601_v32 = vadd.f32 %v2600_v54, %v2599_v31  ;;  %2459 = vst.msk [vmem:[%s4025_s30 + $0x3c] sm:$0xf] %vm2443_vm10, %v2904_v5  ;;  %v2502_v4 = vadd.f32 %v2501_v57, %v2500_v45  ;;  %v2604_v10 = vsel %vm1833_vm1, %v2559_v60, 0.0  ;;  %v2606_v8 = vsel %vm1833_vm1, %v2560_v52, 0.0 }
 0x1f2   : > { %2457 = vst.msk [vmem:[%s4025_s30 + $0x34] sm:$0xf] %vm2443_vm10, %v2902_v18  ;;  %v2602_v23 = vsel %vm1833_vm1, %v2558_v11, 0.0 }
 0x1f3   : > { %v2504_v56 = vadd.f32 %v2503_v44, %v2502_v4  ;;  %v2603_v9 = vadd.f32 %v2602_v23, %v2601_v32 }
 0x1f5   : > { %v2506_v2 = vadd.f32 %v2505_v42, %v2504_v56  ;;  %v2605_v27 = vadd.f32 %v2604_v10, %v2603_v9 }
 0x1f7   : > { %v2607_v61 = vadd.f32 %v2606_v8, %v2605_v27 }
 0x20b   : > { %v3052_v36 = vpop.f32.mrb[0].mxu1 }
 0x20c   : > { %v2907_v12 = vpack.c.bf16 %v3052_v36, %v3052_v36  ;;  %v2252_v6 = vpop.f32.mrb[1].mxu1  ;;  %v2563_v24 = vmul.f32 %v3052_v36, %v3052_v36  ;;  %v2511_v41 = vsel %vm1833_vm1, %v3052_v36, 0.0 }
 0x20d   : > { %v2905_v22 = vpack.c.bf16 %v2252_v6, %v2252_v6  ;;  %v2507_v33 = vsel %vm1833_vm1, %v2252_v6, 0.0  ;;  %v2561_v13 = vmul.f32 %v2252_v6, %v2252_v6  ;;  %v3053_v46 = vpop.f32.mrb[2].mxu1 }
 0x20e   : > { %2462 = vst.msk [vmem:[%s4025_s30 + $0x48] sm:$0xf] %vm2443_vm10, %v2907_v12  ;;  %v2508_v3 = vadd.f32 %v2507_v33, %v2506_v2  ;;  %v2908_v38 = vpack.c.bf16 %v3053_v46, %v3053_v46  ;;  %v2255_v50 = vpop.f32.mrb[3].mxu1  ;;  %v2564_v34 = vmul.f32 %v3053_v46, %v3053_v46  ;;  %v2513_v43 = vsel %vm1833_vm1, %v3053_v46, 0.0 }
 0x20f   : > { %2460 = vst.msk [vmem:[%s4025_s30 + $0x40] sm:$0xf] %vm2443_vm10, %v2905_v22  ;;  %v2608_v0 = vsel %vm1833_vm1, %v2561_v13, 0.0  ;;  %v2906_v39 = vpack.c.bf16 %v2255_v50, %v2255_v50  ;;  %v2509_v14 = vsel %vm1833_vm1, %v2255_v50, 0.0  ;;  %v2562_v17 = vmul.f32 %v2255_v50, %v2255_v50 }
 0x210   : > { %v2609_v15 = vadd.f32 %v2608_v0, %v2607_v61  ;;  %2463 = vst.msk [vmem:[%s4025_s30 + $0x4c] sm:$0xf] %vm2443_vm10, %v2908_v38  ;;  %v2510_v30 = vadd.f32 %v2509_v14, %v2508_v3  ;;  %v2612_v20 = vsel %vm1833_vm1, %v2563_v24, 0.0  ;;  %v2614_v58 = vsel %vm1833_vm1, %v2564_v34, 0.0 }
 0x211   : > { %2461 = vst.msk [vmem:[%s4025_s30 + $0x44] sm:$0xf] %vm2443_vm10, %v2906_v39  ;;  %v2610_v47 = vsel %vm1833_vm1, %v2562_v17, 0.0 }
 0x212   : > { %v2512_v19 = vadd.f32 %v2511_v41, %v2510_v30  ;;  %v2611_v25 = vadd.f32 %v2610_v47, %v2609_v15 }
 0x214   : > { %v2514_v63 = vadd.f32 %v2513_v43, %v2512_v19  ;;  %v2613_v53 = vadd.f32 %v2612_v20, %v2611_v25 }
 0x216   : > { %v2615_v48 = vadd.f32 %v2614_v58, %v2613_v53 }
 0x22b   : > { %v3056_v26 = vpop.f32.mrb[4].mxu1 }
 0x22c   : > { %v2911_v51 = vpack.c.bf16 %v3056_v26, %v3056_v26  ;;  %v2268_v55 = vpop.f32.mrb[5].mxu1  ;;  %v2567_v49 = vmul.f32 %v3056_v26, %v3056_v26  ;;  %v2519_v1 = vsel %vm1833_vm1, %v3056_v26, 0.0 }
 0x22d   : > { %v2909_v29 = vpack.c.bf16 %v2268_v55, %v2268_v55  ;;  %v2515_v7 = vsel %vm1833_vm1, %v2268_v55, 0.0  ;;  %v2565_v59 = vmul.f32 %v2268_v55, %v2268_v55  ;;  %v3057_v40 = vpop.f32.mrb[6].mxu1 }
 0x22e   : > { %2466 = vst.msk [vmem:[%s4025_s30 + $0x58] sm:$0xf] %vm2443_vm10, %v2911_v51  ;;  %v2516_v31 = vadd.f32 %v2515_v7, %v2514_v63  ;;  %v2912_v62 = vpack.c.bf16 %v3057_v40, %v3057_v40  ;;  %v2271_v37 = vpop.f32.mrb[7].mxu1  ;;  %v2568_v54 = vmul.f32 %v3057_v40, %v3057_v40  ;;  %v2521_v60 = vsel %vm1833_vm1, %v3057_v40, 0.0 }
 0x22f   : > { %2464 = vst.msk [vmem:[%s4025_s30 + $0x50] sm:$0xf] %vm2443_vm10, %v2909_v29  ;;  %v2616_v35 = vsel %vm1833_vm1, %v2565_v59, 0.0  ;;  %v2910_v28 = vpack.c.bf16 %v2271_v37, %v2271_v37  ;;  %v2517_v16 = vsel %vm1833_vm1, %v2271_v37, 0.0  ;;  %v2566_v5 = vmul.f32 %v2271_v37, %v2271_v37 }
 0x230   : > { %v2617_v21 = vadd.f32 %v2616_v35, %v2615_v48  ;;  %2467 = vst.msk [vmem:[%s4025_s30 + $0x5c] sm:$0xf] %vm2443_vm10, %v2912_v62  ;;  %v2518_v45 = vadd.f32 %v2517_v16, %v2516_v31  ;;  %v2620_v4 = vsel %vm1833_vm1, %v2567_v49, 0.0  ;;  %v2622_v52 = vsel %vm1833_vm1, %v2568_v54, 0.0 }
 0x231   : > { %2465 = vst.msk [vmem:[%s4025_s30 + $0x54] sm:$0xf] %vm2443_vm10, %v2910_v28  ;;  %v2618_v57 = vsel %vm1833_vm1, %v2566_v5, 0.0 }
 0x232   : > { %v2520_v18 = vadd.f32 %v2519_v1, %v2518_v45  ;;  %v2619_v32 = vadd.f32 %v2618_v57, %v2617_v21 }
 0x234   : > { %v2522_v11 = vadd.f32 %v2521_v60, %v2520_v18  ;;  %v2621_v44 = vadd.f32 %v2620_v4, %v2619_v32 }
 0x236   : > { %v2623_v56 = vadd.f32 %v2622_v52, %v2621_v44 }
 0x24b   : > { %v3060_v23 = vpop.f32.mrb[8].mxu1 }
 0x24c   : > { %v2915_v42 = vpack.c.bf16 %v3060_v23, %v3060_v23  ;;  %v2284_v9 = vpop.f32.mrb[9].mxu1  ;;  %v2571_v13 = vmul.f32 %v3060_v23, %v3060_v23  ;;  %v2527_v50 = vsel %vm1833_vm1, %v3060_v23, 0.0 }
 0x24d   : > { %v2913_v10 = vpack.c.bf16 %v2284_v9, %v2284_v9  ;;  %v2523_v2 = vsel %vm1833_vm1, %v2284_v9, 0.0  ;;  %v2569_v27 = vmul.f32 %v2284_v9, %v2284_v9  ;;  %v3061_v8 = vpop.f32.mrb[10].mxu1 }
 0x24e   : > { %2470 = vst.msk [vmem:[%s4025_s30 + $0x68] sm:$0xf] %vm2443_vm10, %v2915_v42  ;;  %v2524_v61 = vadd.f32 %v2523_v2, %v2522_v11  ;;  %v2916_v36 = vpack.c.bf16 %v3061_v8, %v3061_v8  ;;  %v2287_v12 = vpop.f32.mrb[11].mxu1  ;;  %v2572_v0 = vmul.f32 %v3061_v8, %v3061_v8  ;;  %v2529_v24 = vsel %vm1833_vm1, %v3061_v8, 0.0 }
 0x24f   : > { %2468 = vst.msk [vmem:[%s4025_s30 + $0x60] sm:$0xf] %vm2443_vm10, %v2913_v10  ;;  %v2624_v6 = vsel %vm1833_vm1, %v2569_v27, 0.0  ;;  %v2914_v22 = vpack.c.bf16 %v2287_v12, %v2287_v12  ;;  %v2525_v33 = vsel %vm1833_vm1, %v2287_v12, 0.0  ;;  %v2570_v38 = vmul.f32 %v2287_v12, %v2287_v12 }
 0x250   : > { %v2625_v46 = vadd.f32 %v2624_v6, %v2623_v56  ;;  %2471 = vst.msk [vmem:[%s4025_s30 + $0x6c] sm:$0xf] %vm2443_vm10, %v2916_v36  ;;  %v2526_v3 = vadd.f32 %v2525_v33, %v2524_v61  ;;  %v2628_v30 = vsel %vm1833_vm1, %v2571_v13, 0.0  ;;  %v2630_v34 = vsel %vm1833_vm1, %v2572_v0, 0.0 }
 0x251   : > { %2469 = vst.msk [vmem:[%s4025_s30 + $0x64] sm:$0xf] %vm2443_vm10, %v2914_v22  ;;  %v2626_v14 = vsel %vm1833_vm1, %v2570_v38, 0.0 }
 0x252   : > { %v2528_v39 = vadd.f32 %v2527_v50, %v2526_v3  ;;  %v2627_v15 = vadd.f32 %v2626_v14, %v2625_v46 }
 0x254   : > { %v2530_v17 = vadd.f32 %v2529_v24, %v2528_v39  ;;  %v2629_v41 = vadd.f32 %v2628_v30, %v2627_v15 }
 0x256   : > { %v2631_v19 = vadd.f32 %v2630_v34, %v2629_v41 }
 0x269   : > { %v3064_v47 = vpop.f32.mrb[12].mxu1 }
 0x26a   : > { %v2919_v43 = vpack.c.bf16 %v3064_v47, %v3064_v47  ;;  %v2300_v25 = vpop.f32.mrb[13].mxu1  ;;  %v2575_v59 = vmul.f32 %v3064_v47, %v3064_v47  ;;  %v2535_v37 = vsel %vm1833_vm1, %v3064_v47, 0.0 }
 0x26b   : > { %v2917_v20 = vpack.c.bf16 %v2300_v25, %v2300_v25  ;;  %v2531_v63 = vsel %vm1833_vm1, %v2300_v25, 0.0  ;;  %v2573_v53 = vmul.f32 %v2300_v25, %v2300_v25  ;;  %v3065_v58 = vpop.f32.mrb[14].mxu1 }
 0x26c   : > { %2474 = vst.msk [vmem:[%s4025_s30 + $0x78] sm:$0xf] %vm2443_vm10, %v2919_v43  ;;  %v2532_v48 = vadd.f32 %v2531_v63, %v2530_v17  ;;  %v2920_v26 = vpack.c.bf16 %v3065_v58, %v3065_v58  ;;  %v2303_v51 = vpop.f32.mrb[15].mxu1  ;;  %v2576_v35 = vmul.f32 %v3065_v58, %v3065_v58  ;;  %v2537_v49 = vsel %vm1833_vm1, %v3065_v58, 0.0 }
 0x26d   : > { %2472 = vst.msk [vmem:[%s4025_s30 + $0x70] sm:$0xf] %vm2443_vm10, %v2917_v20  ;;  %v2632_v55 = vsel %vm1833_vm1, %v2573_v53, 0.0  ;;  %v2918_v29 = vpack.c.bf16 %v2303_v51, %v2303_v51  ;;  %v2533_v7 = vsel %vm1833_vm1, %v2303_v51, 0.0  ;;  %v2574_v62 = vmul.f32 %v2303_v51, %v2303_v51 }
 0x26e   : > { %v2633_v40 = vadd.f32 %v2632_v55, %v2631_v19  ;;  %2475 = vst.msk [vmem:[%s4025_s30 + $0x7c] sm:$0xf] %vm2443_vm10, %v2920_v26  ;;  %v2534_v31 = vadd.f32 %v2533_v7, %v2532_v48  ;;  %v2636_v45 = vsel %vm1833_vm1, %v2575_v59, 0.0  ;;  %v2638_v54 = vsel %vm1833_vm1, %v2576_v35, 0.0 }
 0x26f   : > { %2473 = vst.msk [vmem:[%s4025_s30 + $0x74] sm:$0xf] %vm2443_vm10, %v2918_v29  ;;  %v2634_v16 = vsel %vm1833_vm1, %v2574_v62, 0.0 }
 0x270   : > { %v2536_v28 = vadd.f32 %v2535_v37, %v2534_v31  ;;  %v2635_v21 = vadd.f32 %v2634_v16, %v2633_v40 }
 0x272   : > { %v2538_v5 = vadd.f32 %v2537_v49, %v2536_v28  ;;  %v2637_v1 = vadd.f32 %v2636_v45, %v2635_v21 }
 0x274   : > { %v2539_v18 = vrot.slane %v2538_v5, 4  ;;  %v2639_v57 = vadd.f32 %v2638_v54, %v2637_v1 }
 0x276   : > { %v2540_v60 = vadd.f32 %v2539_v18, %v2538_v5  ;;  %v2640_v32 = vrot.slane %v2639_v57, 4 }
 0x278   : > { %v2541_v4 = vrot.slane %v2540_v60, 2  ;;  %v2641_v11 = vadd.f32 %v2640_v32, %v2639_v57 }
 0x27a   : > { %v2542_v44 = vadd.f32 %v2541_v4, %v2540_v60  ;;  %v2642_v52 = vrot.slane %v2641_v11, 2 }
 0x27c   : > { %v2543_v56 = vrot.slane %v2542_v44, 1  ;;  %v2643_v23 = vadd.f32 %v2642_v52, %v2641_v11 }
 0x27e   : > { %v2644_v42 = vrot.slane %v2643_v23, 1  ;;  %v2544_v9 = vadd.f32 %v2543_v56, %v2542_v44 }
 0x280   : > { %v2645_v10 = vadd.f32 %v2644_v42, %v2643_v23 }
 0x282   : > { %v2647_v2 = vsel %vm662_vm8, %v2544_v9, %v2645_v10 }
 0x283   : > { %2649 = vst.msk [vmem:[%s268_s8] sm:$0x3] %vm2648_vm11, %v2647_v2 }
 0x284 PF: > { %s16_s20 = sadd.s32 1, %s3136_s20   ;;  %s4196_s18 = smov %s3132_s19 }
 0x285   : > { %p13_p5 = scmp.ge.s32.totalorder %s16_s20, 4   ;;  %s4197_s19 = smov %s4199_s21 }
 0x287   :  { %15 = sbr.rel (!%p13_p5) target bundleno = 2 (0x2), region = 81 }

</bundles_post_ra>
